<compile_context>
chip_gen: v5e
topology: v5e:2x2
jax: 0.10.0
libtpu: 0.0.40
codegen_flags: <defaults>
</compile_context>

<pallas_src>
import jax
import jax.numpy as jnp
from jax.experimental import pallas as pl
from jax.experimental.pallas import tpu as pltpu


_LANE = 128      # TPU vreg lane width (per-gate column stride)
_SUBLANE = 8     # f32 sublane tile


def _round_up(x, m):
    return (x + m - 1) // m * m


def _encoder_classifier_kernel(x2d_ref, wih0_ref, whh0_ref, b0_ref,
                               w1_ref, b1_ref, wfc_ref, bfc_ref,
                               logit_ref, gin0_ref):
    # x2d:  (T*Bp, I)   time-major input, batch padded to Bp
    # wih0: (I,  4*Hp)  layer-0 input weights, gate g at cols [g*Hp, g*Hp+H)
    # whh0: (H,  4*Hp)  layer-0 hidden weights (same gate layout)
    # b0:   (1,  4*Hp)  bias_ih_l0 + bias_hh_l0 (gate layout)
    # w1:   (2H, 4*Hp)  stacked [W_ih_l1 ; W_hh_l1] for the fused layer-1 dot
    # b1:   (1,  4*Hp)
    # wfc:  (H, O), bfc: (1, O)
    # gin0: (T*Bp, 4*Hp) VMEM scratch: hoisted layer-0 input projection (+bias)
    TB = x2d_ref.shape[0]
    Bp, _ = logit_ref.shape
    H = whh0_ref.shape[0]
    Hp = b0_ref.shape[1] // 4
    T = TB // Bp

    # (1) Hoisted: all-timestep layer-0 input projection + bias, ONE matmul.
    gin0_ref[...] = (
        jnp.dot(x2d_ref[...], wih0_ref[...], preferred_element_type=jnp.float32)
        + b0_ref[...])

    # (5) Hoisted: layer-1 bias broadcast (JAX does not CSE broadcast_in_dim).
    b1b = jnp.broadcast_to(b1_ref[...], (Bp, 4 * Hp))

    def gate_combine(gates, c):
        # Gate g lives at lanes [g*Hp, g*Hp + H): slice starts are 128-aligned,
        # so no lane rotation is required.  Torch gate order: i, f, g, o.
        i_g = jax.nn.sigmoid(gates[:, 0 * Hp:0 * Hp + H])
        f_g = jax.nn.sigmoid(gates[:, 1 * Hp:1 * Hp + H])
        g_g = jnp.tanh(gates[:, 2 * Hp:2 * Hp + H])
        o_g = jax.nn.sigmoid(gates[:, 3 * Hp:3 * Hp + H])
        c_new = f_g * c + i_g * g_g
        h_new = o_g * jnp.tanh(c_new)
        return h_new, c_new

    def step(t, carry):
        h0, c0, h1, c1 = carry
        row = pl.multiple_of(t * Bp, _SUBLANE)            # tile-aligned row slice
        gates0 = (gin0_ref[pl.ds(row, Bp), :]
                  + jnp.dot(h0, whh0_ref[...],
                            preferred_element_type=jnp.float32))
        h0, c0 = gate_combine(gates0, c0)
        # (2) Fused layer-1 ih/hh matmul: single dot on concat([h0, h1]).
        hcat = jnp.concatenate([h0, h1], axis=1)          # (Bp, 2H)
        gates1 = (jnp.dot(hcat, w1_ref[...],
                          preferred_element_type=jnp.float32) + b1b)
        h1, c1 = gate_combine(gates1, c1)
        return (h0, c0, h1, c1)

    zeros = jnp.zeros((Bp, H), jnp.float32)
    # (3) Fully unrolled serial recurrence (T is static).
    _, _, h1, _ = jax.lax.fori_loop(0, T, step, (zeros, zeros, zeros, zeros),
                                    unroll=True)

    # Dropout(p=0) is the identity, so it is skipped.
    # TODO(synk): dropout with p > 0 (training mode) and the BCE/accuracy
    # branch (intention_label is not None) are not implemented in-kernel.
    logit_ref[...] = jax.nn.sigmoid(
        jnp.dot(h1, wfc_ref[...], preferred_element_type=jnp.float32)
        + bfc_ref[...])


def _pack_gate_cols(w, H, Hp):
    """Torch-layout (4H, K) gate-stacked weight -> (K, 4*Hp) with gate g at
    columns [g*Hp, g*Hp + H), zero elsewhere (so gate slices are vreg-aligned)."""
    K = w.shape[1]
    wt = jnp.transpose(w.astype(jnp.float32).reshape(4, H, K), (2, 0, 1))  # (K,4,H)
    out = jnp.zeros((K, 4, Hp), jnp.float32).at[:, :, :H].set(wt)
    return out.reshape(K, 4 * Hp)


def _pack_gate_bias(b_ih, b_hh, H, Hp):
    b = (b_ih + b_hh).astype(jnp.float32).reshape(4, H)
    return jnp.zeros((4, Hp), jnp.float32).at[:, :H].set(b).reshape(1, 4 * Hp)


def prepare_params(params):
    """One-time repack of torch-layout LSTM/FC params into the kernel layout.
    Call once at model-load time, NOT inside the per-forward path (item 7)."""
    H = params["weight_hh_l0"].shape[1]
    O = params["fc_weight"].shape[0]
    Hp = _round_up(H, _LANE)
    w1 = jnp.concatenate(
        [_pack_gate_cols(params["weight_ih_l1"], H, Hp),   # rows 0:H   <- h0
         _pack_gate_cols(params["weight_hh_l1"], H, Hp)],  # rows H:2H  <- h1
        axis=0)                                            # (2H, 4*Hp)
    return {
        "wih0": _pack_gate_cols(params["weight_ih_l0"], H, Hp),   # (I, 4*Hp)
        "whh0": _pack_gate_cols(params["weight_hh_l0"], H, Hp),   # (H, 4*Hp)
        "b0": _pack_gate_bias(params["bias_ih_l0"], params["bias_hh_l0"], H, Hp),
        "w1": w1,
        "b1": _pack_gate_bias(params["bias_ih_l1"], params["bias_hh_l1"], H, Hp),
        "wfc": params["fc_weight"].T.astype(jnp.float32),          # (H, O)
        "bfc": params["fc_bias"].reshape(1, O).astype(jnp.float32),
    }


def encoder_classifier_forward(x, prep):
    """x: (B, T, I) float32; prep: output of prepare_params.
    Returns (binary_value, logits), each (B, O)."""
    B, T, I = x.shape
    Hp = prep["b0"].shape[1] // 4
    O = prep["wfc"].shape[1]
    Bp = _round_up(B, _SUBLANE)

    # Glue: time-major, batch padded to the f32 sublane tile, flattened to 2D
    # so the hoisted layer-0 projection is a single in-kernel matmul.
    x_tm = jnp.transpose(x.astype(jnp.float32), (1, 0, 2))       # (T, B, I)
    x_tm = jnp.pad(x_tm, ((0, 0), (0, Bp - B), (0, 0)))          # (T, Bp, I)
    x2d = x_tm.reshape(T * Bp, I)

    vmem = pl.BlockSpec(memory_space=pltpu.MemorySpace.VMEM)
    logits_p = pl.pallas_call(
        _encoder_classifier_kernel,
        out_shape=jax.ShapeDtypeStruct((Bp, O), jnp.float32),
        in_specs=[vmem] * 8,
        out_specs=vmem,
        scratch_shapes=[pltpu.VMEM((T * Bp, 4 * Hp), jnp.float32)],
        # TODO(synk): for large B add a batch grid with
        # dimension_semantics=("parallel",) (v7x megacore); for large T*B stream
        # x per timestep block instead of keeping it fully VMEM-resident.
    )(x2d, prep["wih0"], prep["whh0"], prep["b0"],
      prep["w1"], prep["b1"], prep["wfc"], prep["bfc"])

    logits = logits_p[:B]
    # (6) threshold computed outside the kernel (saves one masked store + DMA).
    binary = (logits >= 0.5).astype(jnp.float32)
    return binary, logits


def _reference_forward(x, params):
    """Pure-JAX reference mirroring torch semantics (sanity check)."""
    B, T, I = x.shape
    H = params["weight_hh_l0"].shape[1]

    def cell(x_t, h, c, wih, whh, bih, bhh):
        gates = x_t @ wih.T + bih + h @ whh.T + bhh
        i_g = jax.nn.sigmoid(gates[:, 0 * H:1 * H])
        f_g = jax.nn.sigmoid(gates[:, 1 * H:2 * H])
        g_g = jnp.tanh(gates[:, 2 * H:3 * H])
        o_g = jax.nn.sigmoid(gates[:, 3 * H:4 * H])
        c = f_g * c + i_g * g_g
        h = o_g * jnp.tanh(c)
        return h, c

    h0 = c0 = h1 = c1 = jnp.zeros((B, H), jnp.float32)
    for t in range(T):
        h0, c0 = cell(x[:, t, :], h0, c0,
                      params["weight_ih_l0"], params["weight_hh_l0"],
                      params["bias_ih_l0"], params["bias_hh_l0"])
        h1, c1 = cell(h0, h1, c1,
                      params["weight_ih_l1"], params["weight_hh_l1"],
                      params["bias_ih_l1"], params["bias_hh_l1"])
    logits = jax.nn.sigmoid(h1 @ params["fc_weight"].T + params["fc_bias"])
    return (logits >= 0.5).astype(jnp.float32), logits


def _init_params(key, input_size, hidden_size, latent_size):
    """Deterministic synthetic init (uniform +-1/sqrt(H), like torch LSTM)."""
    H, I, O = hidden_size, input_size, latent_size
    k = 1.0 / jnp.sqrt(jnp.float32(H))
    names_shapes = [
        ("weight_ih_l0", (4 * H, I)), ("weight_hh_l0", (4 * H, H)),
        ("bias_ih_l0", (4 * H,)), ("bias_hh_l0", (4 * H,)),
        ("weight_ih_l1", (4 * H, H)), ("weight_hh_l1", (4 * H, H)),
        ("bias_ih_l1", (4 * H,)), ("bias_hh_l1", (4 * H,)),
        ("fc_weight", (O, H)), ("fc_bias", (O,)),
    ]
    params = {}
    keys = jax.random.split(key, len(names_shapes))
    for sub, (name, shape) in zip(keys, names_shapes):
        params[name] = jax.random.uniform(sub, shape, jnp.float32, -k, k)
    return params


if __name__ == "__main__":
    # Small shapes consistent with the module defaults/args.
    args = dict(device=None, input_size=10, hidden_size=16,
                latent_size=1, seq_len=8)
    batch = 4

    root = jax.random.PRNGKey(0)
    kx, kp = jax.random.split(root)
    x = jax.random.normal(
        kx, (batch, args["seq_len"], args["input_size"]), jnp.float32)
    params = _init_params(kp, args["input_size"], args["hidden_size"],
                          args["latent_size"])

    prep = prepare_params(params)                  # one-time weight repack
    fwd = jax.jit(encoder_classifier_forward)
    binary, logits = fwd(x, prep)
    jax.block_until_ready((binary, logits))

    ref_binary, ref_logits = _reference_forward(x, params)
    assert logits.shape == (batch, args["latent_size"])
    assert binary.shape == (batch, args["latent_size"])
    assert jnp.allclose(logits, ref_logits, rtol=1e-3, atol=1e-3)
    assert jnp.array_equal(binary, ref_binary)

    print("KERNEL_OK")
</pallas_src>

<mosaic_0001>
module attributes {stable_mosaic.version = 11 : i64} {
  func.func @_encoder_classifier_kernel(%arg0: memref<64x10xf32, #tpu.memory_space<vmem>>, %arg1: memref<10x512xf32, #tpu.memory_space<vmem>>, %arg2: memref<16x512xf32, #tpu.memory_space<vmem>>, %arg3: memref<1x512xf32, #tpu.memory_space<vmem>>, %arg4: memref<32x512xf32, #tpu.memory_space<vmem>>, %arg5: memref<1x512xf32, #tpu.memory_space<vmem>>, %arg6: memref<16x1xf32, #tpu.memory_space<vmem>>, %arg7: memref<1x1xf32, #tpu.memory_space<vmem>>, %arg8: memref<8x1xf32, #tpu.memory_space<vmem>>, %arg9: memref<64x512xf32, #tpu.memory_space<vmem>>) attributes {dimension_semantics = [], scalar_prefetch = 0 : i64, scratch_operands = 1 : i64, tpu.core_type = #tpu.core_type<tc>} {
    %c0 = arith.constant 0 : index
    %c0_0 = arith.constant 0 : index
    %0 = vector.load %arg0[%c0, %c0_0] : memref<64x10xf32, #tpu.memory_space<vmem>>, vector<64x10xf32>
    %c0_1 = arith.constant 0 : index
    %c0_2 = arith.constant 0 : index
    %1 = vector.load %arg1[%c0_1, %c0_2] : memref<10x512xf32, #tpu.memory_space<vmem>>, vector<10x512xf32>
    %cst = arith.constant dense<0.000000e+00> : vector<64x512xf32>
    %2 = tpu.matmul %0, %1, %cst {dimension_numbers = #tpu.dot_dimension_numbers<[1], [0], [0], [1], [0, 0, 1, 1], [], []>} : vector<64x10xf32>, vector<10x512xf32>, vector<64x512xf32> -> vector<64x512xf32>
    %c0_3 = arith.constant 0 : index
    %c0_4 = arith.constant 0 : index
    %3 = vector.load %arg3[%c0_3, %c0_4] : memref<1x512xf32, #tpu.memory_space<vmem>>, vector<1x512xf32>
    %4 = vector.broadcast %3 : vector<1x512xf32> to vector<64x512xf32>
    %5 = arith.addf %2, %4 : vector<64x512xf32>
    %c0_5 = arith.constant 0 : index
    %c0_6 = arith.constant 0 : index
    %6 = vector.load %arg9[%c0_5, %c0_6] : memref<64x512xf32, #tpu.memory_space<vmem>>, vector<64x512xf32>
    tpu.vector_store %arg9[%c0_5, %c0_6], %5 {strides = array<i32>} : memref<64x512xf32, #tpu.memory_space<vmem>>, vector<64x512xf32>,
    %c0_7 = arith.constant 0 : index
    %c0_8 = arith.constant 0 : index
    %7 = vector.load %arg5[%c0_7, %c0_8] : memref<1x512xf32, #tpu.memory_space<vmem>>, vector<1x512xf32>
    %8 = vector.shape_cast %7 : vector<1x512xf32> to vector<1x512xf32>
    %9 = vector.broadcast %8 : vector<1x512xf32> to vector<8x512xf32>
    %cst_9 = arith.constant 0.000000e+00 : f32
    %10 = vector.broadcast %cst_9 : f32 to vector<8x16xf32>
    %c0_i32 = arith.constant 0 : i32
    %c8_i32 = arith.constant 8 : i32
    %11 = arith.muli %c0_i32, %c8_i32 : i32
    %12 = tpu.assume_multiple %11, 8 : i32
    %13 = arith.index_cast %12 : i32 to index
    %c0_10 = arith.constant 0 : index
    %14 = vector.load %arg9[%13, %c0_10] : memref<64x512xf32, #tpu.memory_space<vmem>>, vector<8x512xf32>
    %c0_11 = arith.constant 0 : index
    %c0_12 = arith.constant 0 : index
    %15 = vector.load %arg2[%c0_11, %c0_12] : memref<16x512xf32, #tpu.memory_space<vmem>>, vector<16x512xf32>
    %cst_13 = arith.constant dense<0.000000e+00> : vector<8x512xf32>
    %16 = tpu.matmul %10, %15, %cst_13 {dimension_numbers = #tpu.dot_dimension_numbers<[1], [0], [0], [1], [0, 0, 1, 1], [], []>} : vector<8x16xf32>, vector<16x512xf32>, vector<8x512xf32> -> vector<8x512xf32>
    %17 = arith.addf %14, %16 : vector<8x512xf32>
    %18 = vector.extract_strided_slice %17 {offsets = [0, 0], sizes = [8, 16], strides = [1, 1]} : vector<8x512xf32> to vector<8x16xf32>
    %19 = arith.negf %18 : vector<8x16xf32>
    %20 = math.exp %19 : vector<8x16xf32>
    %cst_14 = arith.constant 1.000000e+00 : f32
    %21 = vector.broadcast %cst_14 : f32 to vector<8x16xf32>
    %22 = arith.addf %21, %20 : vector<8x16xf32>
    %23 = arith.divf %21, %22 : vector<8x16xf32>
    %24 = vector.extract_strided_slice %17 {offsets = [0, 128], sizes = [8, 16], strides = [1, 1]} : vector<8x512xf32> to vector<8x16xf32>
    %25 = arith.negf %24 : vector<8x16xf32>
    %26 = math.exp %25 : vector<8x16xf32>
    %cst_15 = arith.constant 1.000000e+00 : f32
    %27 = vector.broadcast %cst_15 : f32 to vector<8x16xf32>
    %28 = arith.addf %27, %26 : vector<8x16xf32>
    %29 = arith.divf %27, %28 : vector<8x16xf32>
    %30 = vector.extract_strided_slice %17 {offsets = [0, 256], sizes = [8, 16], strides = [1, 1]} : vector<8x512xf32> to vector<8x16xf32>
    %31 = math.tanh %30 : vector<8x16xf32>
    %32 = vector.extract_strided_slice %17 {offsets = [0, 384], sizes = [8, 16], strides = [1, 1]} : vector<8x512xf32> to vector<8x16xf32>
    %33 = arith.negf %32 : vector<8x16xf32>
    %34 = math.exp %33 : vector<8x16xf32>
    %cst_16 = arith.constant 1.000000e+00 : f32
    %35 = vector.broadcast %cst_16 : f32 to vector<8x16xf32>
    %36 = arith.addf %35, %34 : vector<8x16xf32>
    %37 = arith.divf %35, %36 : vector<8x16xf32>
    %38 = arith.mulf %29, %10 : vector<8x16xf32>
    %39 = arith.mulf %23, %31 : vector<8x16xf32>
    %40 = arith.addf %38, %39 : vector<8x16xf32>
    %41 = math.tanh %40 : vector<8x16xf32>
    %42 = arith.mulf %37, %41 : vector<8x16xf32>
    %43 = tpu.concatenate %42, %10 in 1 : vector<8x16xf32>, vector<8x16xf32> -> vector<8x32xf32>
    %c0_17 = arith.constant 0 : index
    %c0_18 = arith.constant 0 : index
    %44 = vector.load %arg4[%c0_17, %c0_18] : memref<32x512xf32, #tpu.memory_space<vmem>>, vector<32x512xf32>
    %cst_19 = arith.constant dense<0.000000e+00> : vector<8x512xf32>
    %45 = tpu.matmul %43, %44, %cst_19 {dimension_numbers = #tpu.dot_dimension_numbers<[1], [0], [0], [1], [0, 0, 1, 1], [], []>} : vector<8x32xf32>, vector<32x512xf32>, vector<8x512xf32> -> vector<8x512xf32>
    %46 = arith.addf %45, %9 : vector<8x512xf32>
    %47 = vector.extract_strided_slice %46 {offsets = [0, 0], sizes = [8, 16], strides = [1, 1]} : vector<8x512xf32> to vector<8x16xf32>
    %48 = arith.negf %47 : vector<8x16xf32>
    %49 = math.exp %48 : vector<8x16xf32>
    %cst_20 = arith.constant 1.000000e+00 : f32
    %50 = vector.broadcast %cst_20 : f32 to vector<8x16xf32>
    %51 = arith.addf %50, %49 : vector<8x16xf32>
    %52 = arith.divf %50, %51 : vector<8x16xf32>
    %53 = vector.extract_strided_slice %46 {offsets = [0, 128], sizes = [8, 16], strides = [1, 1]} : vector<8x512xf32> to vector<8x16xf32>
    %54 = arith.negf %53 : vector<8x16xf32>
    %55 = math.exp %54 : vector<8x16xf32>
    %cst_21 = arith.constant 1.000000e+00 : f32
    %56 = vector.broadcast %cst_21 : f32 to vector<8x16xf32>
    %57 = arith.addf %56, %55 : vector<8x16xf32>
    %58 = arith.divf %56, %57 : vector<8x16xf32>
    %59 = vector.extract_strided_slice %46 {offsets = [0, 256], sizes = [8, 16], strides = [1, 1]} : vector<8x512xf32> to vector<8x16xf32>
    %60 = math.tanh %59 : vector<8x16xf32>
    %61 = vector.extract_strided_slice %46 {offsets = [0, 384], sizes = [8, 16], strides = [1, 1]} : vector<8x512xf32> to vector<8x16xf32>
    %62 = arith.negf %61 : vector<8x16xf32>
    %63 = math.exp %62 : vector<8x16xf32>
    %cst_22 = arith.constant 1.000000e+00 : f32
    %64 = vector.broadcast %cst_22 : f32 to vector<8x16xf32>
    %65 = arith.addf %64, %63 : vector<8x16xf32>
    %66 = arith.divf %64, %65 : vector<8x16xf32>
    %67 = arith.mulf %58, %10 : vector<8x16xf32>
    %68 = arith.mulf %52, %60 : vector<8x16xf32>
    %69 = arith.addf %67, %68 : vector<8x16xf32>
    %70 = math.tanh %69 : vector<8x16xf32>
    %71 = arith.mulf %66, %70 : vector<8x16xf32>
    %c1_i32 = arith.constant 1 : i32
    %c8_i32_23 = arith.constant 8 : i32
    %72 = arith.muli %c1_i32, %c8_i32_23 : i32
    %73 = tpu.assume_multiple %72, 8 : i32
    %74 = arith.index_cast %73 : i32 to index
    %c0_24 = arith.constant 0 : index
    %75 = vector.load %arg9[%74, %c0_24] : memref<64x512xf32, #tpu.memory_space<vmem>>, vector<8x512xf32>
    %c0_25 = arith.constant 0 : index
    %c0_26 = arith.constant 0 : index
    %76 = vector.load %arg2[%c0_25, %c0_26] : memref<16x512xf32, #tpu.memory_space<vmem>>, vector<16x512xf32>
    %cst_27 = arith.constant dense<0.000000e+00> : vector<8x512xf32>
    %77 = tpu.matmul %42, %76, %cst_27 {dimension_numbers = #tpu.dot_dimension_numbers<[1], [0], [0], [1], [0, 0, 1, 1], [], []>} : vector<8x16xf32>, vector<16x512xf32>, vector<8x512xf32> -> vector<8x512xf32>
    %78 = arith.addf %75, %77 : vector<8x512xf32>
    %79 = vector.extract_strided_slice %78 {offsets = [0, 0], sizes = [8, 16], strides = [1, 1]} : vector<8x512xf32> to vector<8x16xf32>
    %80 = arith.negf %79 : vector<8x16xf32>
    %81 = math.exp %80 : vector<8x16xf32>
    %cst_28 = arith.constant 1.000000e+00 : f32
    %82 = vector.broadcast %cst_28 : f32 to vector<8x16xf32>
    %83 = arith.addf %82, %81 : vector<8x16xf32>
    %84 = arith.divf %82, %83 : vector<8x16xf32>
    %85 = vector.extract_strided_slice %78 {offsets = [0, 128], sizes = [8, 16], strides = [1, 1]} : vector<8x512xf32> to vector<8x16xf32>
    %86 = arith.negf %85 : vector<8x16xf32>
    %87 = math.exp %86 : vector<8x16xf32>
    %cst_29 = arith.constant 1.000000e+00 : f32
    %88 = vector.broadcast %cst_29 : f32 to vector<8x16xf32>
    %89 = arith.addf %88, %87 : vector<8x16xf32>
    %90 = arith.divf %88, %89 : vector<8x16xf32>
    %91 = vector.extract_strided_slice %78 {offsets = [0, 256], sizes = [8, 16], strides = [1, 1]} : vector<8x512xf32> to vector<8x16xf32>
    %92 = math.tanh %91 : vector<8x16xf32>
    %93 = vector.extract_strided_slice %78 {offsets = [0, 384], sizes = [8, 16], strides = [1, 1]} : vector<8x512xf32> to vector<8x16xf32>
    %94 = arith.negf %93 : vector<8x16xf32>
    %95 = math.exp %94 : vector<8x16xf32>
    %cst_30 = arith.constant 1.000000e+00 : f32
    %96 = vector.broadcast %cst_30 : f32 to vector<8x16xf32>
    %97 = arith.addf %96, %95 : vector<8x16xf32>
    %98 = arith.divf %96, %97 : vector<8x16xf32>
    %99 = arith.mulf %90, %40 : vector<8x16xf32>
    %100 = arith.mulf %84, %92 : vector<8x16xf32>
    %101 = arith.addf %99, %100 : vector<8x16xf32>
    %102 = math.tanh %101 : vector<8x16xf32>
    %103 = arith.mulf %98, %102 : vector<8x16xf32>
    %104 = tpu.concatenate %103, %71 in 1 : vector<8x16xf32>, vector<8x16xf32> -> vector<8x32xf32>
    %c0_31 = arith.constant 0 : index
    %c0_32 = arith.constant 0 : index
    %105 = vector.load %arg4[%c0_31, %c0_32] : memref<32x512xf32, #tpu.memory_space<vmem>>, vector<32x512xf32>
    %cst_33 = arith.constant dense<0.000000e+00> : vector<8x512xf32>
    %106 = tpu.matmul %104, %105, %cst_33 {dimension_numbers = #tpu.dot_dimension_numbers<[1], [0], [0], [1], [0, 0, 1, 1], [], []>} : vector<8x32xf32>, vector<32x512xf32>, vector<8x512xf32> -> vector<8x512xf32>
    %107 = arith.addf %106, %9 : vector<8x512xf32>
    %108 = vector.extract_strided_slice %107 {offsets = [0, 0], sizes = [8, 16], strides = [1, 1]} : vector<8x512xf32> to vector<8x16xf32>
    %109 = arith.negf %108 : vector<8x16xf32>
    %110 = math.exp %109 : vector<8x16xf32>
    %cst_34 = arith.constant 1.000000e+00 : f32
    %111 = vector.broadcast %cst_34 : f32 to vector<8x16xf32>
    %112 = arith.addf %111, %110 : vector<8x16xf32>
    %113 = arith.divf %111, %112 : vector<8x16xf32>
    %114 = vector.extract_strided_slice %107 {offsets = [0, 128], sizes = [8, 16], strides = [1, 1]} : vector<8x512xf32> to vector<8x16xf32>
    %115 = arith.negf %114 : vector<8x16xf32>
    %116 = math.exp %115 : vector<8x16xf32>
    %cst_35 = arith.constant 1.000000e+00 : f32
    %117 = vector.broadcast %cst_35 : f32 to vector<8x16xf32>
    %118 = arith.addf %117, %116 : vector<8x16xf32>
    %119 = arith.divf %117, %118 : vector<8x16xf32>
    %120 = vector.extract_strided_slice %107 {offsets = [0, 256], sizes = [8, 16], strides = [1, 1]} : vector<8x512xf32> to vector<8x16xf32>
    %121 = math.tanh %120 : vector<8x16xf32>
    %122 = vector.extract_strided_slice %107 {offsets = [0, 384], sizes = [8, 16], strides = [1, 1]} : vector<8x512xf32> to vector<8x16xf32>
    %123 = arith.negf %122 : vector<8x16xf32>
    %124 = math.exp %123 : vector<8x16xf32>
    %cst_36 = arith.constant 1.000000e+00 : f32
    %125 = vector.broadcast %cst_36 : f32 to vector<8x16xf32>
    %126 = arith.addf %125, %124 : vector<8x16xf32>
    %127 = arith.divf %125, %126 : vector<8x16xf32>
    %128 = arith.mulf %119, %69 : vector<8x16xf32>
    %129 = arith.mulf %113, %121 : vector<8x16xf32>
    %130 = arith.addf %128, %129 : vector<8x16xf32>
    %131 = math.tanh %130 : vector<8x16xf32>
    %132 = arith.mulf %127, %131 : vector<8x16xf32>
    %c2_i32 = arith.constant 2 : i32
    %c8_i32_37 = arith.constant 8 : i32
    %133 = arith.muli %c2_i32, %c8_i32_37 : i32
    %134 = tpu.assume_multiple %133, 8 : i32
    %135 = arith.index_cast %134 : i32 to index
    %c0_38 = arith.constant 0 : index
    %136 = vector.load %arg9[%135, %c0_38] : memref<64x512xf32, #tpu.memory_space<vmem>>, vector<8x512xf32>
    %c0_39 = arith.constant 0 : index
    %c0_40 = arith.constant 0 : index
    %137 = vector.load %arg2[%c0_39, %c0_40] : memref<16x512xf32, #tpu.memory_space<vmem>>, vector<16x512xf32>
    %cst_41 = arith.constant dense<0.000000e+00> : vector<8x512xf32>
    %138 = tpu.matmul %103, %137, %cst_41 {dimension_numbers = #tpu.dot_dimension_numbers<[1], [0], [0], [1], [0, 0, 1, 1], [], []>} : vector<8x16xf32>, vector<16x512xf32>, vector<8x512xf32> -> vector<8x512xf32>
    %139 = arith.addf %136, %138 : vector<8x512xf32>
    %140 = vector.extract_strided_slice %139 {offsets = [0, 0], sizes = [8, 16], strides = [1, 1]} : vector<8x512xf32> to vector<8x16xf32>
    %141 = arith.negf %140 : vector<8x16xf32>
    %142 = math.exp %141 : vector<8x16xf32>
    %cst_42 = arith.constant 1.000000e+00 : f32
    %143 = vector.broadcast %cst_42 : f32 to vector<8x16xf32>
    %144 = arith.addf %143, %142 : vector<8x16xf32>
    %145 = arith.divf %143, %144 : vector<8x16xf32>
    %146 = vector.extract_strided_slice %139 {offsets = [0, 128], sizes = [8, 16], strides = [1, 1]} : vector<8x512xf32> to vector<8x16xf32>
    %147 = arith.negf %146 : vector<8x16xf32>
    %148 = math.exp %147 : vector<8x16xf32>
    %cst_43 = arith.constant 1.000000e+00 : f32
    %149 = vector.broadcast %cst_43 : f32 to vector<8x16xf32>
    %150 = arith.addf %149, %148 : vector<8x16xf32>
    %151 = arith.divf %149, %150 : vector<8x16xf32>
    %152 = vector.extract_strided_slice %139 {offsets = [0, 256], sizes = [8, 16], strides = [1, 1]} : vector<8x512xf32> to vector<8x16xf32>
    %153 = math.tanh %152 : vector<8x16xf32>
    %154 = vector.extract_strided_slice %139 {offsets = [0, 384], sizes = [8, 16], strides = [1, 1]} : vector<8x512xf32> to vector<8x16xf32>
    %155 = arith.negf %154 : vector<8x16xf32>
    %156 = math.exp %155 : vector<8x16xf32>
    %cst_44 = arith.constant 1.000000e+00 : f32
    %157 = vector.broadcast %cst_44 : f32 to vector<8x16xf32>
    %158 = arith.addf %157, %156 : vector<8x16xf32>
    %159 = arith.divf %157, %158 : vector<8x16xf32>
    %160 = arith.mulf %151, %101 : vector<8x16xf32>
    %161 = arith.mulf %145, %153 : vector<8x16xf32>
    %162 = arith.addf %160, %161 : vector<8x16xf32>
    %163 = math.tanh %162 : vector<8x16xf32>
    %164 = arith.mulf %159, %163 : vector<8x16xf32>
    %165 = tpu.concatenate %164, %132 in 1 : vector<8x16xf32>, vector<8x16xf32> -> vector<8x32xf32>
    %c0_45 = arith.constant 0 : index
    %c0_46 = arith.constant 0 : index
    %166 = vector.load %arg4[%c0_45, %c0_46] : memref<32x512xf32, #tpu.memory_space<vmem>>, vector<32x512xf32>
    %cst_47 = arith.constant dense<0.000000e+00> : vector<8x512xf32>
    %167 = tpu.matmul %165, %166, %cst_47 {dimension_numbers = #tpu.dot_dimension_numbers<[1], [0], [0], [1], [0, 0, 1, 1], [], []>} : vector<8x32xf32>, vector<32x512xf32>, vector<8x512xf32> -> vector<8x512xf32>
    %168 = arith.addf %167, %9 : vector<8x512xf32>
    %169 = vector.extract_strided_slice %168 {offsets = [0, 0], sizes = [8, 16], strides = [1, 1]} : vector<8x512xf32> to vector<8x16xf32>
    %170 = arith.negf %169 : vector<8x16xf32>
    %171 = math.exp %170 : vector<8x16xf32>
    %cst_48 = arith.constant 1.000000e+00 : f32
    %172 = vector.broadcast %cst_48 : f32 to vector<8x16xf32>
    %173 = arith.addf %172, %171 : vector<8x16xf32>
    %174 = arith.divf %172, %173 : vector<8x16xf32>
    %175 = vector.extract_strided_slice %168 {offsets = [0, 128], sizes = [8, 16], strides = [1, 1]} : vector<8x512xf32> to vector<8x16xf32>
    %176 = arith.negf %175 : vector<8x16xf32>
    %177 = math.exp %176 : vector<8x16xf32>
    %cst_49 = arith.constant 1.000000e+00 : f32
    %178 = vector.broadcast %cst_49 : f32 to vector<8x16xf32>
    %179 = arith.addf %178, %177 : vector<8x16xf32>
    %180 = arith.divf %178, %179 : vector<8x16xf32>
    %181 = vector.extract_strided_slice %168 {offsets = [0, 256], sizes = [8, 16], strides = [1, 1]} : vector<8x512xf32> to vector<8x16xf32>
    %182 = math.tanh %181 : vector<8x16xf32>
    %183 = vector.extract_strided_slice %168 {offsets = [0, 384], sizes = [8, 16], strides = [1, 1]} : vector<8x512xf32> to vector<8x16xf32>
    %184 = arith.negf %183 : vector<8x16xf32>
    %185 = math.exp %184 : vector<8x16xf32>
    %cst_50 = arith.constant 1.000000e+00 : f32
    %186 = vector.broadcast %cst_50 : f32 to vector<8x16xf32>
    %187 = arith.addf %186, %185 : vector<8x16xf32>
    %188 = arith.divf %186, %187 : vector<8x16xf32>
    %189 = arith.mulf %180, %130 : vector<8x16xf32>
    %190 = arith.mulf %174, %182 : vector<8x16xf32>
    %191 = arith.addf %189, %190 : vector<8x16xf32>
    %192 = math.tanh %191 : vector<8x16xf32>
    %193 = arith.mulf %188, %192 : vector<8x16xf32>
    %c3_i32 = arith.constant 3 : i32
    %c8_i32_51 = arith.constant 8 : i32
    %194 = arith.muli %c3_i32, %c8_i32_51 : i32
    %195 = tpu.assume_multiple %194, 8 : i32
    %196 = arith.index_cast %195 : i32 to index
    %c0_52 = arith.constant 0 : index
    %197 = vector.load %arg9[%196, %c0_52] : memref<64x512xf32, #tpu.memory_space<vmem>>, vector<8x512xf32>
    %c0_53 = arith.constant 0 : index
    %c0_54 = arith.constant 0 : index
    %198 = vector.load %arg2[%c0_53, %c0_54] : memref<16x512xf32, #tpu.memory_space<vmem>>, vector<16x512xf32>
    %cst_55 = arith.constant dense<0.000000e+00> : vector<8x512xf32>
    %199 = tpu.matmul %164, %198, %cst_55 {dimension_numbers = #tpu.dot_dimension_numbers<[1], [0], [0], [1], [0, 0, 1, 1], [], []>} : vector<8x16xf32>, vector<16x512xf32>, vector<8x512xf32> -> vector<8x512xf32>
    %200 = arith.addf %197, %199 : vector<8x512xf32>
    %201 = vector.extract_strided_slice %200 {offsets = [0, 0], sizes = [8, 16], strides = [1, 1]} : vector<8x512xf32> to vector<8x16xf32>
    %202 = arith.negf %201 : vector<8x16xf32>
    %203 = math.exp %202 : vector<8x16xf32>
    %cst_56 = arith.constant 1.000000e+00 : f32
    %204 = vector.broadcast %cst_56 : f32 to vector<8x16xf32>
    %205 = arith.addf %204, %203 : vector<8x16xf32>
    %206 = arith.divf %204, %205 : vector<8x16xf32>
    %207 = vector.extract_strided_slice %200 {offsets = [0, 128], sizes = [8, 16], strides = [1, 1]} : vector<8x512xf32> to vector<8x16xf32>
    %208 = arith.negf %207 : vector<8x16xf32>
    %209 = math.exp %208 : vector<8x16xf32>
    %cst_57 = arith.constant 1.000000e+00 : f32
    %210 = vector.broadcast %cst_57 : f32 to vector<8x16xf32>
    %211 = arith.addf %210, %209 : vector<8x16xf32>
    %212 = arith.divf %210, %211 : vector<8x16xf32>
    %213 = vector.extract_strided_slice %200 {offsets = [0, 256], sizes = [8, 16], strides = [1, 1]} : vector<8x512xf32> to vector<8x16xf32>
    %214 = math.tanh %213 : vector<8x16xf32>
    %215 = vector.extract_strided_slice %200 {offsets = [0, 384], sizes = [8, 16], strides = [1, 1]} : vector<8x512xf32> to vector<8x16xf32>
    %216 = arith.negf %215 : vector<8x16xf32>
    %217 = math.exp %216 : vector<8x16xf32>
    %cst_58 = arith.constant 1.000000e+00 : f32
    %218 = vector.broadcast %cst_58 : f32 to vector<8x16xf32>
    %219 = arith.addf %218, %217 : vector<8x16xf32>
    %220 = arith.divf %218, %219 : vector<8x16xf32>
    %221 = arith.mulf %212, %162 : vector<8x16xf32>
    %222 = arith.mulf %206, %214 : vector<8x16xf32>
    %223 = arith.addf %221, %222 : vector<8x16xf32>
    %224 = math.tanh %223 : vector<8x16xf32>
    %225 = arith.mulf %220, %224 : vector<8x16xf32>
    %226 = tpu.concatenate %225, %193 in 1 : vector<8x16xf32>, vector<8x16xf32> -> vector<8x32xf32>
    %c0_59 = arith.constant 0 : index
    %c0_60 = arith.constant 0 : index
    %227 = vector.load %arg4[%c0_59, %c0_60] : memref<32x512xf32, #tpu.memory_space<vmem>>, vector<32x512xf32>
    %cst_61 = arith.constant dense<0.000000e+00> : vector<8x512xf32>
    %228 = tpu.matmul %226, %227, %cst_61 {dimension_numbers = #tpu.dot_dimension_numbers<[1], [0], [0], [1], [0, 0, 1, 1], [], []>} : vector<8x32xf32>, vector<32x512xf32>, vector<8x512xf32> -> vector<8x512xf32>
    %229 = arith.addf %228, %9 : vector<8x512xf32>
    %230 = vector.extract_strided_slice %229 {offsets = [0, 0], sizes = [8, 16], strides = [1, 1]} : vector<8x512xf32> to vector<8x16xf32>
    %231 = arith.negf %230 : vector<8x16xf32>
    %232 = math.exp %231 : vector<8x16xf32>
    %cst_62 = arith.constant 1.000000e+00 : f32
    %233 = vector.broadcast %cst_62 : f32 to vector<8x16xf32>
    %234 = arith.addf %233, %232 : vector<8x16xf32>
    %235 = arith.divf %233, %234 : vector<8x16xf32>
    %236 = vector.extract_strided_slice %229 {offsets = [0, 128], sizes = [8, 16], strides = [1, 1]} : vector<8x512xf32> to vector<8x16xf32>
    %237 = arith.negf %236 : vector<8x16xf32>
    %238 = math.exp %237 : vector<8x16xf32>
    %cst_63 = arith.constant 1.000000e+00 : f32
    %239 = vector.broadcast %cst_63 : f32 to vector<8x16xf32>
    %240 = arith.addf %239, %238 : vector<8x16xf32>
    %241 = arith.divf %239, %240 : vector<8x16xf32>
    %242 = vector.extract_strided_slice %229 {offsets = [0, 256], sizes = [8, 16], strides = [1, 1]} : vector<8x512xf32> to vector<8x16xf32>
    %243 = math.tanh %242 : vector<8x16xf32>
    %244 = vector.extract_strided_slice %229 {offsets = [0, 384], sizes = [8, 16], strides = [1, 1]} : vector<8x512xf32> to vector<8x16xf32>
    %245 = arith.negf %244 : vector<8x16xf32>
    %246 = math.exp %245 : vector<8x16xf32>
    %cst_64 = arith.constant 1.000000e+00 : f32
    %247 = vector.broadcast %cst_64 : f32 to vector<8x16xf32>
    %248 = arith.addf %247, %246 : vector<8x16xf32>
    %249 = arith.divf %247, %248 : vector<8x16xf32>
    %250 = arith.mulf %241, %191 : vector<8x16xf32>
    %251 = arith.mulf %235, %243 : vector<8x16xf32>
    %252 = arith.addf %250, %251 : vector<8x16xf32>
    %253 = math.tanh %252 : vector<8x16xf32>
    %254 = arith.mulf %249, %253 : vector<8x16xf32>
    %c4_i32 = arith.constant 4 : i32
    %c8_i32_65 = arith.constant 8 : i32
    %255 = arith.muli %c4_i32, %c8_i32_65 : i32
    %256 = tpu.assume_multiple %255, 8 : i32
    %257 = arith.index_cast %256 : i32 to index
    %c0_66 = arith.constant 0 : index
    %258 = vector.load %arg9[%257, %c0_66] : memref<64x512xf32, #tpu.memory_space<vmem>>, vector<8x512xf32>
    %c0_67 = arith.constant 0 : index
    %c0_68 = arith.constant 0 : index
    %259 = vector.load %arg2[%c0_67, %c0_68] : memref<16x512xf32, #tpu.memory_space<vmem>>, vector<16x512xf32>
    %cst_69 = arith.constant dense<0.000000e+00> : vector<8x512xf32>
    %260 = tpu.matmul %225, %259, %cst_69 {dimension_numbers = #tpu.dot_dimension_numbers<[1], [0], [0], [1], [0, 0, 1, 1], [], []>} : vector<8x16xf32>, vector<16x512xf32>, vector<8x512xf32> -> vector<8x512xf32>
    %261 = arith.addf %258, %260 : vector<8x512xf32>
    %262 = vector.extract_strided_slice %261 {offsets = [0, 0], sizes = [8, 16], strides = [1, 1]} : vector<8x512xf32> to vector<8x16xf32>
    %263 = arith.negf %262 : vector<8x16xf32>
    %264 = math.exp %263 : vector<8x16xf32>
    %cst_70 = arith.constant 1.000000e+00 : f32
    %265 = vector.broadcast %cst_70 : f32 to vector<8x16xf32>
    %266 = arith.addf %265, %264 : vector<8x16xf32>
    %267 = arith.divf %265, %266 : vector<8x16xf32>
    %268 = vector.extract_strided_slice %261 {offsets = [0, 128], sizes = [8, 16], strides = [1, 1]} : vector<8x512xf32> to vector<8x16xf32>
    %269 = arith.negf %268 : vector<8x16xf32>
    %270 = math.exp %269 : vector<8x16xf32>
    %cst_71 = arith.constant 1.000000e+00 : f32
    %271 = vector.broadcast %cst_71 : f32 to vector<8x16xf32>
    %272 = arith.addf %271, %270 : vector<8x16xf32>
    %273 = arith.divf %271, %272 : vector<8x16xf32>
    %274 = vector.extract_strided_slice %261 {offsets = [0, 256], sizes = [8, 16], strides = [1, 1]} : vector<8x512xf32> to vector<8x16xf32>
    %275 = math.tanh %274 : vector<8x16xf32>
    %276 = vector.extract_strided_slice %261 {offsets = [0, 384], sizes = [8, 16], strides = [1, 1]} : vector<8x512xf32> to vector<8x16xf32>
    %277 = arith.negf %276 : vector<8x16xf32>
    %278 = math.exp %277 : vector<8x16xf32>
    %cst_72 = arith.constant 1.000000e+00 : f32
    %279 = vector.broadcast %cst_72 : f32 to vector<8x16xf32>
    %280 = arith.addf %279, %278 : vector<8x16xf32>
    %281 = arith.divf %279, %280 : vector<8x16xf32>
    %282 = arith.mulf %273, %223 : vector<8x16xf32>
    %283 = arith.mulf %267, %275 : vector<8x16xf32>
    %284 = arith.addf %282, %283 : vector<8x16xf32>
    %285 = math.tanh %284 : vector<8x16xf32>
    %286 = arith.mulf %281, %285 : vector<8x16xf32>
    %287 = tpu.concatenate %286, %254 in 1 : vector<8x16xf32>, vector<8x16xf32> -> vector<8x32xf32>
    %c0_73 = arith.constant 0 : index
    %c0_74 = arith.constant 0 : index
    %288 = vector.load %arg4[%c0_73, %c0_74] : memref<32x512xf32, #tpu.memory_space<vmem>>, vector<32x512xf32>
    %cst_75 = arith.constant dense<0.000000e+00> : vector<8x512xf32>
    %289 = tpu.matmul %287, %288, %cst_75 {dimension_numbers = #tpu.dot_dimension_numbers<[1], [0], [0], [1], [0, 0, 1, 1], [], []>} : vector<8x32xf32>, vector<32x512xf32>, vector<8x512xf32> -> vector<8x512xf32>
    %290 = arith.addf %289, %9 : vector<8x512xf32>
    %291 = vector.extract_strided_slice %290 {offsets = [0, 0], sizes = [8, 16], strides = [1, 1]} : vector<8x512xf32> to vector<8x16xf32>
    %292 = arith.negf %291 : vector<8x16xf32>
    %293 = math.exp %292 : vector<8x16xf32>
    %cst_76 = arith.constant 1.000000e+00 : f32
    %294 = vector.broadcast %cst_76 : f32 to vector<8x16xf32>
    %295 = arith.addf %294, %293 : vector<8x16xf32>
    %296 = arith.divf %294, %295 : vector<8x16xf32>
    %297 = vector.extract_strided_slice %290 {offsets = [0, 128], sizes = [8, 16], strides = [1, 1]} : vector<8x512xf32> to vector<8x16xf32>
    %298 = arith.negf %297 : vector<8x16xf32>
    %299 = math.exp %298 : vector<8x16xf32>
    %cst_77 = arith.constant 1.000000e+00 : f32
    %300 = vector.broadcast %cst_77 : f32 to vector<8x16xf32>
    %301 = arith.addf %300, %299 : vector<8x16xf32>
    %302 = arith.divf %300, %301 : vector<8x16xf32>
    %303 = vector.extract_strided_slice %290 {offsets = [0, 256], sizes = [8, 16], strides = [1, 1]} : vector<8x512xf32> to vector<8x16xf32>
    %304 = math.tanh %303 : vector<8x16xf32>
    %305 = vector.extract_strided_slice %290 {offsets = [0, 384], sizes = [8, 16], strides = [1, 1]} : vector<8x512xf32> to vector<8x16xf32>
    %306 = arith.negf %305 : vector<8x16xf32>
    %307 = math.exp %306 : vector<8x16xf32>
    %cst_78 = arith.constant 1.000000e+00 : f32
    %308 = vector.broadcast %cst_78 : f32 to vector<8x16xf32>
    %309 = arith.addf %308, %307 : vector<8x16xf32>
    %310 = arith.divf %308, %309 : vector<8x16xf32>
    %311 = arith.mulf %302, %252 : vector<8x16xf32>
    %312 = arith.mulf %296, %304 : vector<8x16xf32>
    %313 = arith.addf %311, %312 : vector<8x16xf32>
    %314 = math.tanh %313 : vector<8x16xf32>
    %315 = arith.mulf %310, %314 : vector<8x16xf32>
    %c5_i32 = arith.constant 5 : i32
    %c8_i32_79 = arith.constant 8 : i32
    %316 = arith.muli %c5_i32, %c8_i32_79 : i32
    %317 = tpu.assume_multiple %316, 8 : i32
    %318 = arith.index_cast %317 : i32 to index
    %c0_80 = arith.constant 0 : index
    %319 = vector.load %arg9[%318, %c0_80] : memref<64x512xf32, #tpu.memory_space<vmem>>, vector<8x512xf32>
    %c0_81 = arith.constant 0 : index
    %c0_82 = arith.constant 0 : index
    %320 = vector.load %arg2[%c0_81, %c0_82] : memref<16x512xf32, #tpu.memory_space<vmem>>, vector<16x512xf32>
    %cst_83 = arith.constant dense<0.000000e+00> : vector<8x512xf32>
    %321 = tpu.matmul %286, %320, %cst_83 {dimension_numbers = #tpu.dot_dimension_numbers<[1], [0], [0], [1], [0, 0, 1, 1], [], []>} : vector<8x16xf32>, vector<16x512xf32>, vector<8x512xf32> -> vector<8x512xf32>
    %322 = arith.addf %319, %321 : vector<8x512xf32>
    %323 = vector.extract_strided_slice %322 {offsets = [0, 0], sizes = [8, 16], strides = [1, 1]} : vector<8x512xf32> to vector<8x16xf32>
    %324 = arith.negf %323 : vector<8x16xf32>
    %325 = math.exp %324 : vector<8x16xf32>
    %cst_84 = arith.constant 1.000000e+00 : f32
    %326 = vector.broadcast %cst_84 : f32 to vector<8x16xf32>
    %327 = arith.addf %326, %325 : vector<8x16xf32>
    %328 = arith.divf %326, %327 : vector<8x16xf32>
    %329 = vector.extract_strided_slice %322 {offsets = [0, 128], sizes = [8, 16], strides = [1, 1]} : vector<8x512xf32> to vector<8x16xf32>
    %330 = arith.negf %329 : vector<8x16xf32>
    %331 = math.exp %330 : vector<8x16xf32>
    %cst_85 = arith.constant 1.000000e+00 : f32
    %332 = vector.broadcast %cst_85 : f32 to vector<8x16xf32>
    %333 = arith.addf %332, %331 : vector<8x16xf32>
    %334 = arith.divf %332, %333 : vector<8x16xf32>
    %335 = vector.extract_strided_slice %322 {offsets = [0, 256], sizes = [8, 16], strides = [1, 1]} : vector<8x512xf32> to vector<8x16xf32>
    %336 = math.tanh %335 : vector<8x16xf32>
    %337 = vector.extract_strided_slice %322 {offsets = [0, 384], sizes = [8, 16], strides = [1, 1]} : vector<8x512xf32> to vector<8x16xf32>
    %338 = arith.negf %337 : vector<8x16xf32>
    %339 = math.exp %338 : vector<8x16xf32>
    %cst_86 = arith.constant 1.000000e+00 : f32
    %340 = vector.broadcast %cst_86 : f32 to vector<8x16xf32>
    %341 = arith.addf %340, %339 : vector<8x16xf32>
    %342 = arith.divf %340, %341 : vector<8x16xf32>
    %343 = arith.mulf %334, %284 : vector<8x16xf32>
    %344 = arith.mulf %328, %336 : vector<8x16xf32>
    %345 = arith.addf %343, %344 : vector<8x16xf32>
    %346 = math.tanh %345 : vector<8x16xf32>
    %347 = arith.mulf %342, %346 : vector<8x16xf32>
    %348 = tpu.concatenate %347, %315 in 1 : vector<8x16xf32>, vector<8x16xf32> -> vector<8x32xf32>
    %c0_87 = arith.constant 0 : index
    %c0_88 = arith.constant 0 : index
    %349 = vector.load %arg4[%c0_87, %c0_88] : memref<32x512xf32, #tpu.memory_space<vmem>>, vector<32x512xf32>
    %cst_89 = arith.constant dense<0.000000e+00> : vector<8x512xf32>
    %350 = tpu.matmul %348, %349, %cst_89 {dimension_numbers = #tpu.dot_dimension_numbers<[1], [0], [0], [1], [0, 0, 1, 1], [], []>} : vector<8x32xf32>, vector<32x512xf32>, vector<8x512xf32> -> vector<8x512xf32>
    %351 = arith.addf %350, %9 : vector<8x512xf32>
    %352 = vector.extract_strided_slice %351 {offsets = [0, 0], sizes = [8, 16], strides = [1, 1]} : vector<8x512xf32> to vector<8x16xf32>
    %353 = arith.negf %352 : vector<8x16xf32>
    %354 = math.exp %353 : vector<8x16xf32>
    %cst_90 = arith.constant 1.000000e+00 : f32
    %355 = vector.broadcast %cst_90 : f32 to vector<8x16xf32>
    %356 = arith.addf %355, %354 : vector<8x16xf32>
    %357 = arith.divf %355, %356 : vector<8x16xf32>
    %358 = vector.extract_strided_slice %351 {offsets = [0, 128], sizes = [8, 16], strides = [1, 1]} : vector<8x512xf32> to vector<8x16xf32>
    %359 = arith.negf %358 : vector<8x16xf32>
    %360 = math.exp %359 : vector<8x16xf32>
    %cst_91 = arith.constant 1.000000e+00 : f32
    %361 = vector.broadcast %cst_91 : f32 to vector<8x16xf32>
    %362 = arith.addf %361, %360 : vector<8x16xf32>
    %363 = arith.divf %361, %362 : vector<8x16xf32>
    %364 = vector.extract_strided_slice %351 {offsets = [0, 256], sizes = [8, 16], strides = [1, 1]} : vector<8x512xf32> to vector<8x16xf32>
    %365 = math.tanh %364 : vector<8x16xf32>
    %366 = vector.extract_strided_slice %351 {offsets = [0, 384], sizes = [8, 16], strides = [1, 1]} : vector<8x512xf32> to vector<8x16xf32>
    %367 = arith.negf %366 : vector<8x16xf32>
    %368 = math.exp %367 : vector<8x16xf32>
    %cst_92 = arith.constant 1.000000e+00 : f32
    %369 = vector.broadcast %cst_92 : f32 to vector<8x16xf32>
    %370 = arith.addf %369, %368 : vector<8x16xf32>
    %371 = arith.divf %369, %370 : vector<8x16xf32>
    %372 = arith.mulf %363, %313 : vector<8x16xf32>
    %373 = arith.mulf %357, %365 : vector<8x16xf32>
    %374 = arith.addf %372, %373 : vector<8x16xf32>
    %375 = math.tanh %374 : vector<8x16xf32>
    %376 = arith.mulf %371, %375 : vector<8x16xf32>
    %c6_i32 = arith.constant 6 : i32
    %c8_i32_93 = arith.constant 8 : i32
    %377 = arith.muli %c6_i32, %c8_i32_93 : i32
    %378 = tpu.assume_multiple %377, 8 : i32
    %379 = arith.index_cast %378 : i32 to index
    %c0_94 = arith.constant 0 : index
    %380 = vector.load %arg9[%379, %c0_94] : memref<64x512xf32, #tpu.memory_space<vmem>>, vector<8x512xf32>
    %c0_95 = arith.constant 0 : index
    %c0_96 = arith.constant 0 : index
    %381 = vector.load %arg2[%c0_95, %c0_96] : memref<16x512xf32, #tpu.memory_space<vmem>>, vector<16x512xf32>
    %cst_97 = arith.constant dense<0.000000e+00> : vector<8x512xf32>
    %382 = tpu.matmul %347, %381, %cst_97 {dimension_numbers = #tpu.dot_dimension_numbers<[1], [0], [0], [1], [0, 0, 1, 1], [], []>} : vector<8x16xf32>, vector<16x512xf32>, vector<8x512xf32> -> vector<8x512xf32>
    %383 = arith.addf %380, %382 : vector<8x512xf32>
    %384 = vector.extract_strided_slice %383 {offsets = [0, 0], sizes = [8, 16], strides = [1, 1]} : vector<8x512xf32> to vector<8x16xf32>
    %385 = arith.negf %384 : vector<8x16xf32>
    %386 = math.exp %385 : vector<8x16xf32>
    %cst_98 = arith.constant 1.000000e+00 : f32
    %387 = vector.broadcast %cst_98 : f32 to vector<8x16xf32>
    %388 = arith.addf %387, %386 : vector<8x16xf32>
    %389 = arith.divf %387, %388 : vector<8x16xf32>
    %390 = vector.extract_strided_slice %383 {offsets = [0, 128], sizes = [8, 16], strides = [1, 1]} : vector<8x512xf32> to vector<8x16xf32>
    %391 = arith.negf %390 : vector<8x16xf32>
    %392 = math.exp %391 : vector<8x16xf32>
    %cst_99 = arith.constant 1.000000e+00 : f32
    %393 = vector.broadcast %cst_99 : f32 to vector<8x16xf32>
    %394 = arith.addf %393, %392 : vector<8x16xf32>
    %395 = arith.divf %393, %394 : vector<8x16xf32>
    %396 = vector.extract_strided_slice %383 {offsets = [0, 256], sizes = [8, 16], strides = [1, 1]} : vector<8x512xf32> to vector<8x16xf32>
    %397 = math.tanh %396 : vector<8x16xf32>
    %398 = vector.extract_strided_slice %383 {offsets = [0, 384], sizes = [8, 16], strides = [1, 1]} : vector<8x512xf32> to vector<8x16xf32>
    %399 = arith.negf %398 : vector<8x16xf32>
    %400 = math.exp %399 : vector<8x16xf32>
    %cst_100 = arith.constant 1.000000e+00 : f32
    %401 = vector.broadcast %cst_100 : f32 to vector<8x16xf32>
    %402 = arith.addf %401, %400 : vector<8x16xf32>
    %403 = arith.divf %401, %402 : vector<8x16xf32>
    %404 = arith.mulf %395, %345 : vector<8x16xf32>
    %405 = arith.mulf %389, %397 : vector<8x16xf32>
    %406 = arith.addf %404, %405 : vector<8x16xf32>
    %407 = math.tanh %406 : vector<8x16xf32>
    %408 = arith.mulf %403, %407 : vector<8x16xf32>
    %409 = tpu.concatenate %408, %376 in 1 : vector<8x16xf32>, vector<8x16xf32> -> vector<8x32xf32>
    %c0_101 = arith.constant 0 : index
    %c0_102 = arith.constant 0 : index
    %410 = vector.load %arg4[%c0_101, %c0_102] : memref<32x512xf32, #tpu.memory_space<vmem>>, vector<32x512xf32>
    %cst_103 = arith.constant dense<0.000000e+00> : vector<8x512xf32>
    %411 = tpu.matmul %409, %410, %cst_103 {dimension_numbers = #tpu.dot_dimension_numbers<[1], [0], [0], [1], [0, 0, 1, 1], [], []>} : vector<8x32xf32>, vector<32x512xf32>, vector<8x512xf32> -> vector<8x512xf32>
    %412 = arith.addf %411, %9 : vector<8x512xf32>
    %413 = vector.extract_strided_slice %412 {offsets = [0, 0], sizes = [8, 16], strides = [1, 1]} : vector<8x512xf32> to vector<8x16xf32>
    %414 = arith.negf %413 : vector<8x16xf32>
    %415 = math.exp %414 : vector<8x16xf32>
    %cst_104 = arith.constant 1.000000e+00 : f32
    %416 = vector.broadcast %cst_104 : f32 to vector<8x16xf32>
    %417 = arith.addf %416, %415 : vector<8x16xf32>
    %418 = arith.divf %416, %417 : vector<8x16xf32>
    %419 = vector.extract_strided_slice %412 {offsets = [0, 128], sizes = [8, 16], strides = [1, 1]} : vector<8x512xf32> to vector<8x16xf32>
    %420 = arith.negf %419 : vector<8x16xf32>
    %421 = math.exp %420 : vector<8x16xf32>
    %cst_105 = arith.constant 1.000000e+00 : f32
    %422 = vector.broadcast %cst_105 : f32 to vector<8x16xf32>
    %423 = arith.addf %422, %421 : vector<8x16xf32>
    %424 = arith.divf %422, %423 : vector<8x16xf32>
    %425 = vector.extract_strided_slice %412 {offsets = [0, 256], sizes = [8, 16], strides = [1, 1]} : vector<8x512xf32> to vector<8x16xf32>
    %426 = math.tanh %425 : vector<8x16xf32>
    %427 = vector.extract_strided_slice %412 {offsets = [0, 384], sizes = [8, 16], strides = [1, 1]} : vector<8x512xf32> to vector<8x16xf32>
    %428 = arith.negf %427 : vector<8x16xf32>
    %429 = math.exp %428 : vector<8x16xf32>
    %cst_106 = arith.constant 1.000000e+00 : f32
    %430 = vector.broadcast %cst_106 : f32 to vector<8x16xf32>
    %431 = arith.addf %430, %429 : vector<8x16xf32>
    %432 = arith.divf %430, %431 : vector<8x16xf32>
    %433 = arith.mulf %424, %374 : vector<8x16xf32>
    %434 = arith.mulf %418, %426 : vector<8x16xf32>
    %435 = arith.addf %433, %434 : vector<8x16xf32>
    %436 = math.tanh %435 : vector<8x16xf32>
    %437 = arith.mulf %432, %436 : vector<8x16xf32>
    %c7_i32 = arith.constant 7 : i32
    %c8_i32_107 = arith.constant 8 : i32
    %438 = arith.muli %c7_i32, %c8_i32_107 : i32
    %439 = tpu.assume_multiple %438, 8 : i32
    %440 = arith.index_cast %439 : i32 to index
    %c0_108 = arith.constant 0 : index
    %441 = vector.load %arg9[%440, %c0_108] : memref<64x512xf32, #tpu.memory_space<vmem>>, vector<8x512xf32>
    %c0_109 = arith.constant 0 : index
    %c0_110 = arith.constant 0 : index
    %442 = vector.load %arg2[%c0_109, %c0_110] : memref<16x512xf32, #tpu.memory_space<vmem>>, vector<16x512xf32>
    %cst_111 = arith.constant dense<0.000000e+00> : vector<8x512xf32>
    %443 = tpu.matmul %408, %442, %cst_111 {dimension_numbers = #tpu.dot_dimension_numbers<[1], [0], [0], [1], [0, 0, 1, 1], [], []>} : vector<8x16xf32>, vector<16x512xf32>, vector<8x512xf32> -> vector<8x512xf32>
    %444 = arith.addf %441, %443 : vector<8x512xf32>
    %445 = vector.extract_strided_slice %444 {offsets = [0, 0], sizes = [8, 16], strides = [1, 1]} : vector<8x512xf32> to vector<8x16xf32>
    %446 = arith.negf %445 : vector<8x16xf32>
    %447 = math.exp %446 : vector<8x16xf32>
    %cst_112 = arith.constant 1.000000e+00 : f32
    %448 = vector.broadcast %cst_112 : f32 to vector<8x16xf32>
    %449 = arith.addf %448, %447 : vector<8x16xf32>
    %450 = arith.divf %448, %449 : vector<8x16xf32>
    %451 = vector.extract_strided_slice %444 {offsets = [0, 128], sizes = [8, 16], strides = [1, 1]} : vector<8x512xf32> to vector<8x16xf32>
    %452 = arith.negf %451 : vector<8x16xf32>
    %453 = math.exp %452 : vector<8x16xf32>
    %cst_113 = arith.constant 1.000000e+00 : f32
    %454 = vector.broadcast %cst_113 : f32 to vector<8x16xf32>
    %455 = arith.addf %454, %453 : vector<8x16xf32>
    %456 = arith.divf %454, %455 : vector<8x16xf32>
    %457 = vector.extract_strided_slice %444 {offsets = [0, 256], sizes = [8, 16], strides = [1, 1]} : vector<8x512xf32> to vector<8x16xf32>
    %458 = math.tanh %457 : vector<8x16xf32>
    %459 = vector.extract_strided_slice %444 {offsets = [0, 384], sizes = [8, 16], strides = [1, 1]} : vector<8x512xf32> to vector<8x16xf32>
    %460 = arith.negf %459 : vector<8x16xf32>
    %461 = math.exp %460 : vector<8x16xf32>
    %cst_114 = arith.constant 1.000000e+00 : f32
    %462 = vector.broadcast %cst_114 : f32 to vector<8x16xf32>
    %463 = arith.addf %462, %461 : vector<8x16xf32>
    %464 = arith.divf %462, %463 : vector<8x16xf32>
    %465 = arith.mulf %456, %406 : vector<8x16xf32>
    %466 = arith.mulf %450, %458 : vector<8x16xf32>
    %467 = arith.addf %465, %466 : vector<8x16xf32>
    %468 = math.tanh %467 : vector<8x16xf32>
    %469 = arith.mulf %464, %468 : vector<8x16xf32>
    %470 = tpu.concatenate %469, %437 in 1 : vector<8x16xf32>, vector<8x16xf32> -> vector<8x32xf32>
    %c0_115 = arith.constant 0 : index
    %c0_116 = arith.constant 0 : index
    %471 = vector.load %arg4[%c0_115, %c0_116] : memref<32x512xf32, #tpu.memory_space<vmem>>, vector<32x512xf32>
    %cst_117 = arith.constant dense<0.000000e+00> : vector<8x512xf32>
    %472 = tpu.matmul %470, %471, %cst_117 {dimension_numbers = #tpu.dot_dimension_numbers<[1], [0], [0], [1], [0, 0, 1, 1], [], []>} : vector<8x32xf32>, vector<32x512xf32>, vector<8x512xf32> -> vector<8x512xf32>
    %473 = arith.addf %472, %9 : vector<8x512xf32>
    %474 = vector.extract_strided_slice %473 {offsets = [0, 0], sizes = [8, 16], strides = [1, 1]} : vector<8x512xf32> to vector<8x16xf32>
    %475 = arith.negf %474 : vector<8x16xf32>
    %476 = math.exp %475 : vector<8x16xf32>
    %cst_118 = arith.constant 1.000000e+00 : f32
    %477 = vector.broadcast %cst_118 : f32 to vector<8x16xf32>
    %478 = arith.addf %477, %476 : vector<8x16xf32>
    %479 = arith.divf %477, %478 : vector<8x16xf32>
    %480 = vector.extract_strided_slice %473 {offsets = [0, 128], sizes = [8, 16], strides = [1, 1]} : vector<8x512xf32> to vector<8x16xf32>
    %481 = arith.negf %480 : vector<8x16xf32>
    %482 = math.exp %481 : vector<8x16xf32>
    %cst_119 = arith.constant 1.000000e+00 : f32
    %483 = vector.broadcast %cst_119 : f32 to vector<8x16xf32>
    %484 = arith.addf %483, %482 : vector<8x16xf32>
    %485 = arith.divf %483, %484 : vector<8x16xf32>
    %486 = vector.extract_strided_slice %473 {offsets = [0, 256], sizes = [8, 16], strides = [1, 1]} : vector<8x512xf32> to vector<8x16xf32>
    %487 = math.tanh %486 : vector<8x16xf32>
    %488 = vector.extract_strided_slice %473 {offsets = [0, 384], sizes = [8, 16], strides = [1, 1]} : vector<8x512xf32> to vector<8x16xf32>
    %489 = arith.negf %488 : vector<8x16xf32>
    %490 = math.exp %489 : vector<8x16xf32>
    %cst_120 = arith.constant 1.000000e+00 : f32
    %491 = vector.broadcast %cst_120 : f32 to vector<8x16xf32>
    %492 = arith.addf %491, %490 : vector<8x16xf32>
    %493 = arith.divf %491, %492 : vector<8x16xf32>
    %494 = arith.mulf %485, %435 : vector<8x16xf32>
    %495 = arith.mulf %479, %487 : vector<8x16xf32>
    %496 = arith.addf %494, %495 : vector<8x16xf32>
    %497 = math.tanh %496 : vector<8x16xf32>
    %498 = arith.mulf %493, %497 : vector<8x16xf32>
    %c8_i32_121 = arith.constant 8 : i32
    %c0_122 = arith.constant 0 : index
    %c0_123 = arith.constant 0 : index
    %499 = vector.load %arg6[%c0_122, %c0_123] : memref<16x1xf32, #tpu.memory_space<vmem>>, vector<16x1xf32>
    %cst_124 = arith.constant dense<0.000000e+00> : vector<8x1xf32>
    %500 = tpu.matmul %498, %499, %cst_124 {dimension_numbers = #tpu.dot_dimension_numbers<[1], [0], [0], [1], [0, 0, 1, 1], [], []>} : vector<8x16xf32>, vector<16x1xf32>, vector<8x1xf32> -> vector<8x1xf32>
    %c0_125 = arith.constant 0 : index
    %c0_126 = arith.constant 0 : index
    %501 = vector.load %arg7[%c0_125, %c0_126] : memref<1x1xf32, #tpu.memory_space<vmem>>, vector<1x1xf32>
    %502 = vector.broadcast %501 : vector<1x1xf32> to vector<8x1xf32>
    %503 = arith.addf %500, %502 : vector<8x1xf32>
    %504 = arith.negf %503 : vector<8x1xf32>
    %505 = math.exp %504 : vector<8x1xf32>
    %cst_127 = arith.constant 1.000000e+00 : f32
    %506 = vector.broadcast %cst_127 : f32 to vector<8x1xf32>
    %507 = arith.addf %506, %505 : vector<8x1xf32>
    %508 = arith.divf %506, %507 : vector<8x1xf32>
    %c0_128 = arith.constant 0 : index
    %c0_129 = arith.constant 0 : index
    %509 = vector.load %arg8[%c0_128, %c0_129] : memref<8x1xf32, #tpu.memory_space<vmem>>, vector<8x1xf32>
    tpu.vector_store %arg8[%c0_128, %c0_129], %508 {strides = array<i32>} : memref<8x1xf32, #tpu.memory_space<vmem>>, vector<8x1xf32>,
    return
  }
}

</mosaic_0001>

<bundles_post_ra>
// kernel: encoder_classifier_forward.1
= control target key start
LH: loop header
LB: loop body
LE: loop exit
PB: predicated region body
PF: predicated region fallthrough
CT: control target
= control target key end

     0   :  { %s4421_s0 = inlined_call_operand.vmem [shape: f32[64,10], index: 0, kind: input, shape index: {}]   ;;  %s4422_s1 = inlined_call_operand.hbm [shape: f32[10,512], index: 1, kind: input, shape index: {}]   ;;  %s4423_s2 = inlined_call_operand.hbm [shape: f32[16,512], index: 2, kind: input, shape index: {}]   ;;  %s4424_s3 = inlined_call_operand.vmem [shape: f32[1,512], index: 3, kind: input, shape index: {}]   ;;  %s4425_s4 = inlined_call_operand.vmem [shape: f32[32,512], index: 4, kind: input, shape index: {}]   ;;  %s4426_s5 = inlined_call_operand.vmem [shape: f32[1,512], index: 5, kind: input, shape index: {}]   ;;  %s4427_s6 = inlined_call_operand.vmem [shape: f32[16,1], index: 6, kind: input, shape index: {}]   ;;  %s4428_s7 = inlined_call_operand.<no memory space> [shape: f32[1,1], index: 7, kind: input, shape index: {}]   ;;  %s4429_s8 = inlined_call_operand.vmem [shape: f32[8,1], index: 8, kind: output, shape index: {}]  }
   0x1   :  { %v13_v0 = vstv %s4428_s7 }
   0x2   :  { %14 = vst [vmem:[#allocation3] sm:$0x1] %v13_v0 }
   0x3   :  { %15 = vsyncpa [#allocation5], 0  ;;  %s23_s9 = sshll.u32 %s4422_s1, 4  ;;  %s24_s9 = int_to_ptr.hbm [resolvable:$true] %s23_s9 }
   0x4   :  { %16 = vsyncpa [#allocation7], 0  ;;  %s3395_s10 = smov [#allocation4]   ;;  %s36_s14 = sshll.u32 %s4423_s2, 4  ;;  %s37_s14 = int_to_ptr.hbm [resolvable:$true] %s36_s14 }
   0x5   :  { %s25_s11 = sshll.u32 %s3395_s10, 4  ;;  %s3396_s15 = smov 512   ;;  %s26_s11 = int_to_ptr.vmem [resolvable:$true] %s25_s11 }
   0x6   :  { %s3397_s16 = smov 32   ;;  %s3398_s7 = smov [#allocation6]  }
   0x7   :  { %31 = dma.hbm_to_vmem [thread:$0]  %s24_s9, 1024, %s26_s11, [#allocation5], %s3396_s15, %s3396_s15, %s3397_s16  }
   0x8   :  { %s38_s17 = sshll.u32 %s3398_s7, 4  ;;  %s39_s17 = int_to_ptr.vmem [resolvable:$true] %s38_s17 }
   0x9   :  { %44 = dma.hbm_to_vmem [thread:$0]  %s37_s14, 1024, %s39_s17, [#allocation7], %s3396_s15, %s3396_s15, %s3397_s16  }
   0xa   :  { %3391 = dma.done.wait [#allocation5], 1024  }
   0xb   :  { %3392 = vsyncadd [#allocation5], 4294966272 }
   0xc   :  { %3393 = dma.done.wait [#allocation7], 1024  }
   0xd   :  { %3394 = vsyncadd [#allocation7], 4294966272  ;;  %vm114_vm0 = vcmask 1041408   ;;  %v75_v1 = vld [vmem:[#allocation4 + $0x20] sm:$0x3]  ;;  %v72_v6 = vld [vmem:[#allocation4 + $0x8] sm:$0xff] }
   0xe   :  { %v76_v2 = vld [vmem:[#allocation4 + $0x28] sm:$0x3]  ;;  %v77_v3 = vld [vmem:[#allocation4 + $0x30] sm:$0x3]  ;;  %2882 = vmatpush.msk.msra.mxu0 %vm114_vm0, %v75_v1  ;;  %v78_v4 = vld [vmem:[#allocation4 + $0x38] sm:$0x3] }
   0xf   :  { %2891 = vmatpush.msk.msra.mxu1 %vm114_vm0, %v76_v2  ;;  %v71_v5 = vld [vmem:[#allocation4] sm:$0xff]  ;;  %2900 = vmatpush.msk.msra.mxu2 %vm114_vm0, %v77_v3  ;;  %v73_v7 = vld [vmem:[#allocation4 + $0x10] sm:$0xff]  ;;  %v74_v8 = vld [vmem:[#allocation4 + $0x18] sm:$0xff]  ;;  %vm89_vm1 = vcmask 80896   ;;  %v3399_v25 = vmov 0.0   ;;  %vm348_vm14 = vcmask 130048  }
  0x10   :  { %2909 = vmatpush.msk.msra.mxu3 %vm114_vm0, %v78_v4  ;;  %v63_v9 = vld [vmem:[%s4421_s0] sm:$0xff]  ;;  %142 = vmatpush.msra.mxu0 %v71_v5  ;;  %v3460_v11 = vld [vmem:[#allocation6 + $0x28] sm:$0xff]  ;;  %v3466_v13 = vld [vmem:[#allocation6 + $0x30] sm:$0xff]  ;;  %vm516_vm15 = vcmask 261120  }
  0x11   :  { %183 = vmatpush.msra.mxu1 %v72_v6  ;;  %224 = vmatpush.msra.mxu2 %v73_v7  ;;  %v3458_v10 = vld [vmem:[#allocation6 + $0x20] sm:$0xff]  ;;  %v3464_v12 = vld [vmem:[#allocation6 + $0x38] sm:$0xff]  ;;  %v3472_v15 = vld [vmem:[#allocation6 + $0x8] sm:$0xff] }
  0x12   :  { %265 = vmatpush.msra.mxu3 %v74_v8  ;;  %2883 = vmatmul.msk.f32.vlgmr.msra.gmra.mxu0 %vm89_vm1, %v63_v9  ;;  %v3470_v14 = vld [vmem:[#allocation6] sm:$0xff]  ;;  %v3476_v16 = vld [vmem:[#allocation6 + $0x18] sm:$0xff]  ;;  %v3490_v18 = vld [vmem:[#allocation6 + $0x10] sm:$0xff] }
  0x13   :  { %2892 = vmatmul.msk.f32.vlgmr.msra.gmra.mxu1 %vm89_vm1, %v63_v9  ;;  %2901 = vmatmul.msk.f32.vlgmr.msra.gmra.mxu2 %vm89_vm1, %v63_v9  ;;  %v64_v17 = vld [vmem:[%s4421_s0 + $0x8] sm:$0xff]  ;;  %v65_v19 = vld [vmem:[%s4421_s0 + $0x10] sm:$0xff]  ;;  %v66_v20 = vld [vmem:[%s4421_s0 + $0x18] sm:$0xff] }
  0x14   :  { %2910 = vmatmul.msk.f32.vlgmr.msra.gmra.mxu3 %vm89_vm1, %v63_v9  ;;  %366 = vmatpush.msrb.mxu0 %v3458_v10  ;;  %v67_v21 = vld [vmem:[%s4421_s0 + $0x20] sm:$0xff]  ;;  %v68_v22 = vld [vmem:[%s4421_s0 + $0x28] sm:$0xff]  ;;  %v69_v23 = vld [vmem:[%s4421_s0 + $0x30] sm:$0xff] }
  0x15   :  { %386 = vmatpush.msrb.mxu1 %v3460_v11  ;;  %426 = vmatpush.msrb.mxu3 %v3464_v12  ;;  %v70_v24 = vld [vmem:[%s4421_s0 + $0x38] sm:$0xff]  ;;  %v79_v28 = vld [vmem:[%s4424_s3] sm:$0xf] }
  0x16   :  { %406 = vmatpush.msrb.mxu2 %v3466_v13  ;;  %367 = vmatpush.msrb.mxu0 %v3470_v14  ;;  %v81_v29 = vperm.slane %v79_v28, 0  ;;  %v82_v30 = vperm.slane %v79_v28, 1  ;;  %v3546_v37 = vperm.slane %v79_v28, 2  ;;  %v3548_v38 = vperm.slane %v79_v28, 3 }
  0x17   :  { %387 = vmatpush.msrb.mxu1 %v3472_v15  ;;  %427 = vmatpush.msrb.mxu3 %v3476_v16 }
  0x18   :  { %407 = vmatpush.msrb.mxu2 %v3490_v18 }
  0x1a   :  { %2884 = vmatmul.msk.f32.gmra.mxu0 %vm89_vm1, %v64_v17 }
  0x1b   :  { %2893 = vmatmul.msk.f32.gmra.mxu1 %vm89_vm1, %v64_v17  ;;  %2902 = vmatmul.msk.f32.gmra.mxu2 %vm89_vm1, %v64_v17 }
  0x1c   :  { %2911 = vmatmul.msk.f32.gmra.mxu3 %vm89_vm1, %v64_v17 }
  0x22   :  { %2885 = vmatmul.msk.f32.gmra.mxu0 %vm89_vm1, %v65_v19 }
  0x23   :  { %2894 = vmatmul.msk.f32.gmra.mxu1 %vm89_vm1, %v65_v19  ;;  %2903 = vmatmul.msk.f32.gmra.mxu2 %vm89_vm1, %v65_v19 }
  0x24   :  { %2912 = vmatmul.msk.f32.gmra.mxu3 %vm89_vm1, %v65_v19 }
  0x2a   :  { %2886 = vmatmul.msk.f32.gmra.mxu0 %vm89_vm1, %v66_v20 }
  0x2b   :  { %2895 = vmatmul.msk.f32.gmra.mxu1 %vm89_vm1, %v66_v20  ;;  %2904 = vmatmul.msk.f32.gmra.mxu2 %vm89_vm1, %v66_v20 }
  0x2c   :  { %2913 = vmatmul.msk.f32.gmra.mxu3 %vm89_vm1, %v66_v20 }
  0x32   :  { %2887 = vmatmul.msk.f32.gmra.mxu0 %vm89_vm1, %v67_v21 }
  0x33   :  { %2896 = vmatmul.msk.f32.gmra.mxu1 %vm89_vm1, %v67_v21  ;;  %2905 = vmatmul.msk.f32.gmra.mxu2 %vm89_vm1, %v67_v21 }
  0x34   :  { %2914 = vmatmul.msk.f32.gmra.mxu3 %vm89_vm1, %v67_v21 }
  0x3a   :  { %2888 = vmatmul.msk.f32.gmra.mxu0 %vm89_vm1, %v68_v22 }
  0x3b   :  { %2897 = vmatmul.msk.f32.gmra.mxu1 %vm89_vm1, %v68_v22  ;;  %2906 = vmatmul.msk.f32.gmra.mxu2 %vm89_vm1, %v68_v22 }
  0x3c   :  { %2915 = vmatmul.msk.f32.gmra.mxu3 %vm89_vm1, %v68_v22 }
  0x42   :  { %2889 = vmatmul.msk.f32.gmra.mxu0 %vm89_vm1, %v69_v23 }
  0x43   :  { %2898 = vmatmul.msk.f32.gmra.mxu1 %vm89_vm1, %v69_v23  ;;  %2907 = vmatmul.msk.f32.gmra.mxu2 %vm89_vm1, %v69_v23 }
  0x44   :  { %2916 = vmatmul.msk.f32.gmra.mxu3 %vm89_vm1, %v69_v23 }
  0x4a   :  { %2890 = vmatmul.msk.f32.gmra.mxu0 %vm89_vm1, %v70_v24 }
  0x4b   :  { %2899 = vmatmul.msk.f32.gmra.mxu1 %vm89_vm1, %v70_v24  ;;  %2908 = vmatmul.msk.f32.gmra.mxu2 %vm89_vm1, %v70_v24 }
  0x4c   :  { %2917 = vmatmul.msk.f32.gmra.mxu3 %vm89_vm1, %v70_v24 }
  0x52   :  { %368 = vmatmul.f32.vlgmr.msrb.gmra.mxu0 %v3399_v25 }
  0x53   :  { %388 = vmatmul.f32.vlgmr.msrb.gmra.mxu1 %v3399_v25  ;;  %408 = vmatmul.f32.vlgmr.msrb.gmra.mxu2 %v3399_v25 }
  0x54   :  { %428 = vmatmul.f32.vlgmr.msrb.gmra.mxu3 %v3399_v25 }
  0x8f   :  { %v144_v26 = vpop.f32.mrf.mxu0 }
  0x90   :  { %v185_v27 = vpop.f32.mrf.mxu1 }
  0x96   :  { %v3538_v31 = vpop.f32.mrf.mxu2 }
  0x97   :  { %v3540_v32 = vpop.f32.mrf.mxu3  ;;  %v147_v33 = vpop.f32.mrf.mxu0 }
  0x98   :  { %v188_v34 = vpop.f32.mrf.mxu1  ;;  %v3542_v35 = vadd.f32 %v147_v33, %v81_v29 }
  0x99   :  { %v3544_v36 = vadd.f32 %v188_v34, %v82_v30 }
  0x9e   :  { %v229_v39 = vpop.f32.mrf.mxu2 }
  0x9f   :  { %v270_v40 = vpop.f32.mrf.mxu3  ;;  %v3551_v41 = vadd.f32 %v229_v39, %v3546_v37  ;;  %v150_v43 = vpop.f32.mrf.mxu0 }
  0xa0   :  { %v3554_v42 = vadd.f32 %v270_v40, %v3548_v38  ;;  %v191_v44 = vpop.f32.mrf.mxu1  ;;  %v3556_v45 = vadd.f32 %v150_v43, %v81_v29  ;;  %v145_v43 = vadd.f32 %v144_v26, %v81_v29  ;;  %v3619_v26 = vld [vmem:[%s4425_s4 + $0x60] sm:$0xff] }
  0xa1   :  { %v3558_v46 = vadd.f32 %v191_v44, %v82_v30  ;;  %v186_v44 = vadd.f32 %v185_v27, %v82_v30  ;;  %v3624_v27 = vld [vmem:[%s4425_s4 + $0x68] sm:$0xff]  ;;  %532 = vmatpush.msra.mxu0 %v3619_v26 }
  0xa2   :  { %552 = vmatpush.msra.mxu1 %v3624_v27 }
  0xa6   :  { %v232_v47 = vpop.f32.mrf.mxu2 }
  0xa7   :  { %v273_v48 = vpop.f32.mrf.mxu3  ;;  %v3561_v49 = vadd.f32 %v232_v47, %v3546_v37  ;;  %v153_v51 = vpop.f32.mrf.mxu0 }
  0xa8   :  { %v3564_v50 = vadd.f32 %v273_v48, %v3548_v38  ;;  %v194_v52 = vpop.f32.mrf.mxu1  ;;  %v3566_v53 = vadd.f32 %v153_v51, %v81_v29 }
  0xa9   :  { %v3568_v54 = vadd.f32 %v194_v52, %v82_v30 }
  0xae   :  { %v235_v55 = vpop.f32.mrf.mxu2 }
  0xaf   :  { %v276_v56 = vpop.f32.mrf.mxu3  ;;  %v3571_v57 = vadd.f32 %v235_v55, %v3546_v37  ;;  %v156_v59 = vpop.f32.mrf.mxu0 }
  0xb0   :  { %v3574_v58 = vadd.f32 %v276_v56, %v3548_v38  ;;  %v197_v60 = vpop.f32.mrf.mxu1  ;;  %v3576_v61 = vadd.f32 %v156_v59, %v81_v29 }
  0xb1   :  { %4430 = vst [vmem:[#allocation10_spill] sm:$0xff] %v3571_v57  ;;  %v3578_v62 = vadd.f32 %v197_v60, %v82_v30 }
  0xb2   :  { %4431 = vst [vmem:[#allocation11_spill] sm:$0xff] %v3574_v58 }
  0xb3   :  { %4432 = vst [vmem:[#allocation12_spill] sm:$0xff] %v3576_v61 }
  0xb4   :  { %4433 = vst [vmem:[#allocation13_spill] sm:$0xff] %v3578_v62 }
  0xb6   :  { %v238_v63 = vpop.f32.mrf.mxu2 }
  0xb7   :  { %v279_v0 = vpop.f32.mrf.mxu3  ;;  %v3581_v1 = vadd.f32 %v238_v63, %v3546_v37  ;;  %v159_v3 = vpop.f32.mrf.mxu0 }
  0xb8   :  { %v3584_v2 = vadd.f32 %v279_v0, %v3548_v38  ;;  %v200_v4 = vpop.f32.mrf.mxu1  ;;  %v3586_v5 = vadd.f32 %v159_v3, %v81_v29  ;;  %v3638_v3 = vld [vmem:[%s4425_s4 + $0x78] sm:$0xff] }
  0xb9   :  { %4434 = vst [vmem:[#allocation14_spill] sm:$0xff] %v3581_v1  ;;  %v3588_v6 = vadd.f32 %v200_v4, %v82_v30  ;;  %v3643_v4 = vld [vmem:[%s4425_s4 + $0x40] sm:$0xff]  ;;  %592 = vmatpush.msra.mxu3 %v3638_v3 }
  0xba   :  { %4435 = vst [vmem:[#allocation15_spill] sm:$0xff] %v3584_v2  ;;  %533 = vmatpush.msra.mxu0 %v3643_v4 }
  0xbb   :  { %4436 = vst [vmem:[#allocation16_spill] sm:$0xff] %v3586_v5 }
  0xbc   :  { %4437 = vst [vmem:[#allocation17_spill] sm:$0xff] %v3588_v6 }
  0xbe   :  { %v241_v7 = vpop.f32.mrf.mxu2 }
  0xbf   :  { %v282_v8 = vpop.f32.mrf.mxu3  ;;  %v3591_v9 = vadd.f32 %v241_v7, %v3546_v37  ;;  %v162_v19 = vpop.f32.mrf.mxu0  ;;  %v3648_v7 = vld [vmem:[%s4425_s4 + $0x48] sm:$0xff] }
  0xc0   :  { %v3594_v17 = vadd.f32 %v282_v8, %v3548_v38  ;;  %v203_v20 = vpop.f32.mrf.mxu1  ;;  %v3596_v21 = vadd.f32 %v162_v19, %v81_v29  ;;  %v3660_v8 = vld [vmem:[%s4425_s4 + $0x58] sm:$0xff]  ;;  %v3665_v19 = vld [vmem:[%s4425_s4 + $0x20] sm:$0xff]  ;;  %553 = vmatpush.msra.mxu1 %v3648_v7 }
  0xc1   :  { %4438 = vst [vmem:[#allocation18_spill] sm:$0xff] %v3591_v9  ;;  %v3598_v22 = vadd.f32 %v203_v20, %v82_v30  ;;  %593 = vmatpush.msra.mxu3 %v3660_v8  ;;  %534 = vmatpush.msra.mxu0 %v3665_v19 }
  0xc2   :  { %4439 = vst [vmem:[#allocation19_spill] sm:$0xff] %v3594_v17 }
  0xc3   :  { %4440 = vst [vmem:[#allocation20_spill] sm:$0xff] %v3596_v21 }
  0xc4   :  { %4441 = vst [vmem:[#allocation21_spill] sm:$0xff] %v3598_v22 }
  0xc6   :  { %v244_v23 = vpop.f32.mrf.mxu2 }
  0xc7   :  { %v285_v24 = vpop.f32.mrf.mxu3  ;;  %v3601_v25 = vadd.f32 %v244_v23, %v3546_v37  ;;  %v165_v33 = vpop.f32.mrf.mxu0  ;;  %v3672_v23 = vld [vmem:[%s4425_s4 + $0x28] sm:$0xff] }
  0xc8   :  { %v3604_v28 = vadd.f32 %v285_v24, %v3548_v38  ;;  %v206_v34 = vpop.f32.mrf.mxu1  ;;  %v3606_v39 = vadd.f32 %v165_v33, %v81_v29  ;;  %v3629_v29 = vld [vmem:[%s4425_s4 + $0x70] sm:$0xff]  ;;  %v3682_v33 = vld [vmem:[%s4425_s4 + $0x38] sm:$0xff]  ;;  %554 = vmatpush.msra.mxu1 %v3672_v23 }
  0xc9   :  { %4442 = vst [vmem:[#allocation22_spill] sm:$0xff] %v3601_v25  ;;  %v3608_v40 = vadd.f32 %v206_v34, %v82_v30  ;;  %v268_v30 = vadd.f32 %v3540_v32, %v3548_v38  ;;  %572 = vmatpush.msra.mxu2 %v3629_v29  ;;  %v3677_v24 = vld [vmem:[%s4425_s4 + $0x30] sm:$0xff]  ;;  %v3689_v34 = vld [vmem:[%s4425_s4] sm:$0xff]  ;;  %594 = vmatpush.msra.mxu3 %v3682_v33 }
  0xca   :  { %4443 = vst [vmem:[#allocation23_spill] sm:$0xff] %v3604_v28  ;;  %535 = vmatpush.msra.mxu0 %v3689_v34 }
  0xcb   :  { %4444 = vst [vmem:[#allocation24_spill] sm:$0xff] %v3606_v39 }
  0xcc   :  { %4445 = vst [vmem:[#allocation25_spill] sm:$0xff] %v3608_v40  ;;  %687 = vmatpush.msrb.mxu0 %v3458_v10 }
  0xce   :  { %v247_v47 = vpop.f32.mrf.mxu2  ;;  %688 = vmatpush.msrb.mxu0 %v3470_v14 }
  0xcf   :  { %v288_v48 = vpop.f32.mrf.mxu3  ;;  %v3611_v51 = vadd.f32 %v247_v47, %v3546_v37  ;;  %v369_v55 = vpop.f32.mrf.mxu0  ;;  %v3701_v47 = vld [vmem:[%s4425_s4 + $0x10] sm:$0xff] }
  0xd0   :  { %v3614_v52 = vadd.f32 %v288_v48, %v3548_v38  ;;  %v389_v56 = vpop.f32.mrf.mxu1  ;;  %v432_v59 = vadd.f32 %v369_v55, %v145_v43  ;;  %v3655_v38 = vld [vmem:[%s4425_s4 + $0x50] sm:$0xff]  ;;  %v3694_v43 = vld [vmem:[%s4425_s4 + $0x8] sm:$0xff]  ;;  %v3706_v48 = vld [vmem:[%s4425_s4 + $0x18] sm:$0xff] }
  0xd1   :  { %4446 = vst [vmem:[#allocation26_spill] sm:$0xff] %v3611_v51  ;;  %v433_v60 = vadd.f32 %v389_v56, %v186_v44  ;;  %573 = vmatpush.msra.mxu2 %v3655_v38  ;;  %555 = vmatpush.msra.mxu1 %v3694_v43 }
  0xd2   :  { %4447 = vst [vmem:[#allocation27_spill] sm:$0xff] %v3614_v52  ;;  %v2918_v63 = vmul.f32 -1.442695, %v432_v59  ;;  %595 = vmatpush.msra.mxu3 %v3706_v48 }
  0xd3   :  { %v2919_v0 = vmul.f32 -1.442695, %v433_v60  ;;  %574 = vmatpush.msra.mxu2 %v3677_v24  ;;  %707 = vmatpush.msrb.mxu1 %v3460_v11 }
  0xd4   :  { %3035 = vpow2.f32 %v2918_v63  ;;  %747 = vmatpush.msrb.mxu3 %v3464_v12 }
  0xd5   :  { %3037 = vpow2.f32 %v2919_v0  ;;  %575 = vmatpush.msra.mxu2 %v3701_v47  ;;  %708 = vmatpush.msrb.mxu1 %v3472_v15 }
  0xd6   :  { %v409_v63 = vpop.f32.mrf.mxu2  ;;  %748 = vmatpush.msrb.mxu3 %v3476_v16 }
  0xd7   :  { %v429_v32 = vpop.f32.mrf.mxu3  ;;  %727 = vmatpush.msrb.mxu2 %v3466_v13 }
  0xd8   :  { %v435_v20 = vadd.f32 %v429_v32, %v268_v30  ;;  %v227_v30 = vadd.f32 %v3538_v31, %v3546_v37 }
  0xd9   :  { %728 = vmatpush.msrb.mxu2 %v3490_v18 }
  0xda   :  { %v2920_v44 = vmul.f32 -1.442695, %v435_v20  ;;  %v3036_v55 = vpop.eup %3035 }
  0xdb   :  { %v3038_v56 = vpop.eup %3037  ;;  %v439_v59 = vadd.f32 1.0, %v3036_v55 }
  0xdc   :  { %3039 = vpow2.f32 %v2920_v44  ;;  %v458_v60 = vadd.f32 1.0, %v3038_v56  ;;  %v434_v44 = vadd.f32 %v409_v63, %v227_v30 }
  0xdd   :  { %3041 = vrcp.f32 %v439_v59  ;;  %v451_v39 = vand.u32 2147483648, %v439_v59  ;;  %v449_v22 = vand.u32 2147483647, %v439_v59  ;;  %vm445_vm4 = vweird.f32 %v439_v59 }
  0xde   :  { %3043 = vrcp.f32 %v458_v60  ;;  %v470_v28 = vand.u32 2147483648, %v458_v60  ;;  %v468_v17 = vand.u32 2147483647, %v458_v60  ;;  %vm464_vm5 = vweird.f32 %v458_v60 }
  0xdf   :  { %v452_v37 = vor.u32 1.1754944e-38, %v451_v39  ;;  %vm450_vm7 = vcmp.eq.f32.partialorder %v449_v22, 8.507059e+37 }
  0xe0   :  { %v471_v30 = vor.u32 1.1754944e-38, %v470_v28  ;;  %vm469_vm9 = vcmp.eq.f32.partialorder %v468_v17, 8.507059e+37 }
  0xe2   :  { %v3040_v0 = vpop.eup %3039 }
  0xe3   :  { %v478_v32 = vadd.f32 1.0, %v3040_v0  ;;  %v3042_v20 = vpop.eup %3041 }
  0xe4   :  { %v3044_v55 = vpop.eup %3043  ;;  %v441_v56 = vmul.f32 %v3042_v20, %v439_v59  ;;  %vm446_vm2 = vweird.f32 %v3042_v20 }
  0xe5   :  { %3045 = vrcp.f32 %v478_v32  ;;  %v460_v51 = vmul.f32 %v3044_v55, %v458_v60  ;;  %vm465_vm3 = vweird.f32 %v3044_v55  ;;  %vm447_vm6 = vmor %vm445_vm4, %vm446_vm2  ;;  %vm484_vm11 = vweird.f32 %v478_v32 }
  0xe6   :  { %v442_v52 = vsub.f32 1.0, %v441_v56  ;;  %3047 = vtanh.f32 %v434_v44  ;;  %vm466_vm8 = vmor %vm464_vm5, %vm465_vm3  ;;  %v488_v28 = vand.u32 2147483647, %v478_v32 }
  0xe7   :  { %v461_v40 = vsub.f32 1.0, %v460_v51 }
  0xe8   :  { %v443_v25 = vmul.f32 %v3042_v20, %v442_v52  ;;  %vm489_vm13 = vcmp.eq.f32.partialorder %v488_v28, 8.507059e+37 }
  0xe9   :  { %v462_v21 = vmul.f32 %v3044_v55, %v461_v40 }
  0xea   :  { %v444_v31 = vadd.f32 %v3042_v20, %v443_v25 }
  0xeb   :  { %v3046_v9 = vpop.eup %3045  ;;  %v463_v63 = vadd.f32 %v3044_v55, %v462_v21  ;;  %v490_v21 = vand.u32 2147483648, %v478_v32 }
  0xec   :  { %v480_v0 = vmul.f32 %v3046_v9, %v478_v32  ;;  %v448_v56 = vsel %vm447_vm6, %v3042_v20, %v444_v31  ;;  %v3048_v51 = vpop.eup %3047  ;;  %vm485_vm10 = vweird.f32 %v3046_v9 }
  0xed   :  { %v453_v44 = vsel %vm450_vm7, %v452_v37, %v448_v56  ;;  %v467_v52 = vsel %vm466_vm8, %v3044_v55, %v463_v63  ;;  %vm486_vm12 = vmor %vm484_vm11, %vm485_vm10  ;;  %v491_v39 = vor.u32 1.1754944e-38, %v490_v21 }
  0xee   :  { %v481_v6 = vsub.f32 1.0, %v480_v0  ;;  %v472_v40 = vsel %vm469_vm9, %v471_v30, %v467_v52  ;;  %v495_v5 = vmul.f32 %v3048_v51, %v453_v44 }
  0xef   :  { %v494_v2 = vmul.f32 0.0, %v472_v40 }
  0xf0   :  { %v482_v1 = vmul.f32 %v3046_v9, %v481_v6 }
  0xf1   :  { %v3724_v25 = vadd.f32 %v495_v5, %v494_v2 }
  0xf2   :  { %v483_v59 = vadd.f32 %v3046_v9, %v482_v1  ;;  %v323_v1 = vld [vmem:[%s4426_s5] sm:$0xf]  ;;  %s3400_s5 = smov 16  }
  0xf3   :  { %3049 = vtanh.f32 %v3724_v25  ;;  %v3763_v2 = vperm.slane %v323_v1, 0  ;;  %v3765_v5 = vperm.slane %v323_v1, 1  ;;  %v3769_v0 = vperm.slane %v323_v1, 3 }
  0xf4   :  { %v487_v22 = vsel %vm486_vm12, %v3046_v9, %v483_v59 }
  0xf5   :  { %v492_v17 = vsel %vm489_vm13, %v491_v39, %v487_v22 }
  0xf9   :  { %v3050_v60 = vpop.eup %3049 }
  0xfa   :  { %v498_v20 = vmul.f32 %v3050_v60, %v492_v17 }
  0xfc   :  { %v499_v6 = vsel %vm348_vm14, %v498_v20, 0.0 }
  0xfd   :  { %2921 = vmatmul.msk.f32.vlgmr.msra.gmra.mxu0 %vm516_vm15, %v499_v6  ;;  %2922 = vmatmul.msk.f32.vlgmr.msra.gmra.mxu1 %vm516_vm15, %v499_v6 }
  0xfe   :  { %2923 = vmatmul.msk.f32.vlgmr.msra.gmra.mxu2 %vm516_vm15, %v499_v6  ;;  %2924 = vmatmul.msk.f32.vlgmr.msra.gmra.mxu3 %vm516_vm15, %v499_v6  ;;  %v3774_v6 = vperm.slane %v323_v1, 2 }
  0xff   :  { %840 = vmatpush.msra.mxu0 %v3619_v26  ;;  %860 = vmatpush.msra.mxu1 %v3624_v27 }
 0x100   :  { %880 = vmatpush.msra.mxu2 %v3629_v29  ;;  %900 = vmatpush.msra.mxu3 %v3638_v3 }
 0x101   :  { %841 = vmatpush.msra.mxu0 %v3643_v4  ;;  %861 = vmatpush.msra.mxu1 %v3648_v7 }
 0x102   :  { %881 = vmatpush.msra.mxu2 %v3655_v38  ;;  %901 = vmatpush.msra.mxu3 %v3660_v8 }
 0x103   :  { %842 = vmatpush.msra.mxu0 %v3665_v19  ;;  %862 = vmatpush.msra.mxu1 %v3672_v23 }
 0x104   :  { %882 = vmatpush.msra.mxu2 %v3677_v24  ;;  %902 = vmatpush.msra.mxu3 %v3682_v33 }
 0x105   :  { %2928 = vmatmul.msk.f32.vlgmr.msrb.gmra.mxu0 %vm348_vm14, %v498_v20  ;;  %2929 = vmatmul.msk.f32.vlgmr.msrb.gmra.mxu1 %vm348_vm14, %v498_v20 }
 0x106   :  { %2930 = vmatmul.msk.f32.vlgmr.msrb.gmra.mxu2 %vm348_vm14, %v498_v20  ;;  %2931 = vmatmul.msk.f32.vlgmr.msrb.gmra.mxu3 %vm348_vm14, %v498_v20 }
 0x107   :  { %843 = vmatpush.msra.mxu0 %v3689_v34  ;;  %863 = vmatpush.msra.mxu1 %v3694_v43 }
 0x108   :  { %883 = vmatpush.msra.mxu2 %v3701_v47  ;;  %903 = vmatpush.msra.mxu3 %v3706_v48 }
 0x109   :  { %995 = vmatpush.msrb.mxu0 %v3458_v10  ;;  %1015 = vmatpush.msrb.mxu1 %v3460_v11 }
 0x10a   :  { %1035 = vmatpush.msrb.mxu2 %v3466_v13  ;;  %1055 = vmatpush.msrb.mxu3 %v3464_v12 }
 0x10b   :  { %996 = vmatpush.msrb.mxu0 %v3470_v14  ;;  %1016 = vmatpush.msrb.mxu1 %v3472_v15 }
 0x10c   :  { %1036 = vmatpush.msrb.mxu2 %v3490_v18  ;;  %1056 = vmatpush.msrb.mxu3 %v3476_v16 }
 0x17a   :  { %v537_v9 = vpop.f32.mrf.mxu0  ;;  %v557_v32 = vpop.f32.mrf.mxu1 }
 0x17b   :  { %v538_v55 = vadd.f32 %v537_v9, %v3763_v2  ;;  %v558_v31 = vadd.f32 %v557_v32, %v3765_v5 }
 0x17d   :  { %v2925_v37 = vmul.f32 -1.442695, %v538_v55  ;;  %v2926_v63 = vmul.f32 -1.442695, %v558_v31 }
 0x17f   :  { %3051 = vpow2.f32 %v2925_v37 }
 0x180   :  { %3053 = vpow2.f32 %v2926_v63 }
 0x181   :  { %v597_v30 = vpop.f32.mrf.mxu3  ;;  %v577_v20 = vpop.f32.mrf.mxu2 }
 0x182   :  { %v598_v56 = vadd.f32 %v597_v30, %v3769_v0  ;;  %v690_v51 = vpop.f32.mrf.mxu0  ;;  %v710_v44 = vpop.f32.mrf.mxu1  ;;  %v578_v55 = vadd.f32 %v577_v20, %v3774_v6 }
 0x183   :  { %v753_v52 = vadd.f32 %v690_v51, %v3542_v35  ;;  %v754_v40 = vadd.f32 %v710_v44, %v3544_v36 }
 0x184   :  { %v2927_v59 = vmul.f32 -1.442695, %v598_v56 }
 0x185   :  { %v3052_v21 = vpop.eup %3051  ;;  %v2932_v28 = vmul.f32 -1.442695, %v753_v52  ;;  %v2933_v60 = vmul.f32 -1.442695, %v754_v40 }
 0x186   :  { %v3054_v22 = vpop.eup %3053  ;;  %v603_v39 = vadd.f32 1.0, %v3052_v21  ;;  %3055 = vpow2.f32 %v2927_v59 }
 0x187   :  { %v622_v17 = vadd.f32 1.0, %v3054_v22  ;;  %3057 = vpow2.f32 %v2932_v28 }
 0x188   :  { %3059 = vrcp.f32 %v603_v39  ;;  %v613_v52 = vand.u32 2147483647, %v603_v39  ;;  %v615_v40 = vand.u32 2147483648, %v603_v39  ;;  %vm609_vm3 = vweird.f32 %v603_v39 }
 0x189   :  { %3061 = vrcp.f32 %v622_v17  ;;  %v634_v59 = vand.u32 2147483648, %v622_v17  ;;  %v730_v28 = vpop.f32.mrf.mxu2  ;;  %vm628_vm2 = vweird.f32 %v622_v17 }
 0x18a   :  { %3063 = vpow2.f32 %v2933_v60  ;;  %v632_v60 = vand.u32 2147483647, %v622_v17  ;;  %vm614_vm5 = vcmp.eq.f32.partialorder %v613_v52, 8.507059e+37 }
 0x18c   :  { %v3056_v9 = vpop.eup %3055  ;;  %vm633_vm7 = vcmp.eq.f32.partialorder %v632_v60, 8.507059e+37 }
 0x18d   :  { %v3058_v32 = vpop.eup %3057  ;;  %v3776_v35 = vadd.f32 1.0, %v3056_v9 }
 0x18e   :  { %v3060_v36 = vpop.eup %3059  ;;  %v3779_v31 = vadd.f32 1.0, %v3058_v32 }
 0x18f   :  { %v3062_v37 = vpop.eup %3061  ;;  %v605_v63 = vmul.f32 %v3060_v36, %v603_v39  ;;  %3065 = vrcp.f32 %v3776_v35  ;;  %vm610_vm0 = vweird.f32 %v3060_v36 }
 0x190   :  { %v3064_v30 = vpop.eup %3063  ;;  %v624_v56 = vmul.f32 %v3062_v37, %v622_v17  ;;  %3067 = vrcp.f32 %v3779_v31  ;;  %vm629_vm1 = vweird.f32 %v3062_v37  ;;  %vm611_vm4 = vmor %vm609_vm3, %vm610_vm0  ;;  %vm766_vm8 = vweird.f32 %v3779_v31 }
 0x191   :  { %v606_v1 = vsub.f32 1.0, %v605_v63  ;;  %v3783_v51 = vadd.f32 1.0, %v3064_v30  ;;  %3069 = vtanh.f32 %v578_v55  ;;  %v616_v63 = vor.u32 1.1754944e-38, %v615_v40  ;;  %vm630_vm6 = vmor %vm628_vm2, %vm629_vm1 }
 0x192   :  { %v625_v44 = vsub.f32 1.0, %v624_v56  ;;  %v755_v55 = vadd.f32 %v730_v28, %v3551_v41  ;;  %v772_v41 = vand.u32 2147483648, %v3779_v31  ;;  %vm648_vm0 = vweird.f32 %v3776_v35 }
 0x193   :  { %v607_v21 = vmul.f32 %v3060_v36, %v606_v1  ;;  %3071 = vrcp.f32 %v3783_v51  ;;  %v635_v1 = vor.u32 1.1754944e-38, %v634_v59  ;;  %vm785_vm1 = vweird.f32 %v3783_v51 }
 0x194   :  { %v626_v22 = vmul.f32 %v3062_v37, %v625_v44  ;;  %3073 = vtanh.f32 %v755_v55 }
 0x195   :  { %v3786_v20 = vpop.eup %3065  ;;  %v608_v9 = vadd.f32 %v3060_v36, %v607_v21 }
 0x196   :  { %v3068_v32 = vpop.eup %3067  ;;  %v627_v30 = vadd.f32 %v3062_v37, %v626_v22  ;;  %v644_v56 = vmul.f32 %v3786_v20, %v3776_v35  ;;  %vm649_vm10 = vweird.f32 %v3786_v20 }
 0x197   :  { %v612_v62 = vsel %vm611_vm4, %v3060_v36, %v608_v9  ;;  %v762_v44 = vmul.f32 %v3068_v32, %v3779_v31  ;;  %v3070_v61 = vpop.eup %3069  ;;  %vm767_vm9 = vweird.f32 %v3068_v32  ;;  %v654_v9 = vand.u32 2147483648, %v3776_v35  ;;  %vm650_vm2 = vmor %vm648_vm0, %vm649_vm10 }
 0x198   :  { %v617_v17 = vsel %vm614_vm5, %v616_v63, %v612_v62  ;;  %v631_v21 = vsel %vm630_vm6, %v3062_v37, %v627_v30  ;;  %v645_v39 = vsub.f32 1.0, %v644_v56  ;;  %v770_v62 = vand.u32 2147483647, %v3779_v31  ;;  %vm768_vm12 = vmor %vm766_vm8, %vm767_vm9 }
 0x199   :  { %v3072_v58 = vpop.eup %3071  ;;  %v636_v40 = vsel %vm633_vm7, %v635_v1, %v631_v21  ;;  %v659_v22 = vmul.f32 %v3070_v61, %v617_v17  ;;  %v763_v57 = vsub.f32 1.0, %v762_v44  ;;  %v791_v61 = vand.u32 2147483648, %v3783_v51 }
 0x19a   :  { %v658_v28 = vmul.f32 0.0, %v636_v40  ;;  %v781_v59 = vmul.f32 %v3072_v58, %v3783_v51  ;;  %v646_v36 = vmul.f32 %v3786_v20, %v645_v39  ;;  %v773_v30 = vor.u32 1.1754944e-38, %v772_v41  ;;  %v3074_v44 = vpop.eup %3073 }
 0x19b   :  { %v764_v52 = vmul.f32 %v3068_v32, %v763_v57  ;;  %vm786_vm11 = vweird.f32 %v3072_v58  ;;  %v789_v57 = vand.u32 2147483647, %v3783_v51  ;;  %vm771_vm13 = vcmp.eq.f32.partialorder %v770_v62, 8.507059e+37  ;;  %v750_v51 = vpop.f32.mrf.mxu3 }
 0x19c   :  { %v3798_v37 = vadd.f32 %v659_v22, %v658_v28  ;;  %v782_v60 = vsub.f32 1.0, %v781_v59  ;;  %v647_v56 = vadd.f32 %v3786_v20, %v646_v36  ;;  %v652_v1 = vand.u32 2147483647, %v3776_v35  ;;  %vm787_vm3 = vmor %vm785_vm1, %vm786_vm11 }
 0x19d   :  { %v765_v63 = vadd.f32 %v3068_v32, %v764_v52  ;;  %v792_v39 = vor.u32 1.1754944e-38, %v791_v61  ;;  %vm790_vm4 = vcmp.eq.f32.partialorder %v789_v57, 8.507059e+37  ;;  %v655_v28 = vor.u32 1.1754944e-38, %v654_v9 }
 0x19e   :  { %v783_v55 = vmul.f32 %v3072_v58, %v782_v60  ;;  %3075 = vtanh.f32 %v3798_v37  ;;  %v651_v22 = vsel %vm650_vm2, %v3786_v20, %v647_v56  ;;  %vm653_vm5 = vcmp.eq.f32.partialorder %v652_v1, 8.507059e+37 }
 0x19f   :  { %v769_v31 = vsel %vm768_vm12, %v3068_v32, %v765_v63  ;;  %v656_v35 = vsel %vm653_vm5, %v655_v28, %v651_v22  ;;  %v756_v60 = vadd.f32 %v750_v51, %v3554_v42 }
 0x1a0   :  { %v774_v17 = vsel %vm771_vm13, %v773_v30, %v769_v31  ;;  %v784_v21 = vadd.f32 %v3072_v58, %v783_v55 }
 0x1a1   :  { %v816_v40 = vmul.f32 %v3074_v44, %v774_v17  ;;  %v2934_v61 = vmul.f32 -1.442695, %v756_v60 }
 0x1a2   :  { %v788_v41 = vsel %vm787_vm3, %v3072_v58, %v784_v21 }
 0x1a3   :  { %v793_v32 = vsel %vm790_vm4, %v792_v39, %v788_v41  ;;  %3077 = vpow2.f32 %v2934_v61 }
 0x1a4   :  { %v3076_v59 = vpop.eup %3075  ;;  %v815_v36 = vmul.f32 %v793_v32, %v3724_v25 }
 0x1a5   :  { %v662_v52 = vmul.f32 %v3076_v59, %v656_v35 }
 0x1a6   :  { %v3811_v62 = vadd.f32 %v816_v40, %v815_v36 }
 0x1a7   :  { %821 = vrot.lane.b32.xlu0 %v662_v52, %s3400_s5 }
 0x1a9   :  { %v3078_v58 = vpop.eup %3077 }
 0x1aa   :  { %v799_v20 = vadd.f32 1.0, %v3078_v58 }
 0x1ac   :  { %3079 = vrcp.f32 %v799_v20  ;;  %v811_v55 = vand.u32 2147483648, %v799_v20  ;;  %vm805_vm7 = vweird.f32 %v799_v20  ;;  %v809_v57 = vand.u32 2147483647, %v799_v20 }
 0x1ad   :  { %3081 = vtanh.f32 %v3811_v62 }
 0x1ae   :  { %v812_v42 = vor.u32 1.1754944e-38, %v811_v55  ;;  %vm810_vm9 = vcmp.eq.f32.partialorder %v809_v57, 8.507059e+37 }
 0x1b2   :  { %v3080_v9 = vpop.eup %3079 }
 0x1b3   :  { %v801_v63 = vmul.f32 %v3080_v9, %v799_v20  ;;  %vm806_vm6 = vweird.f32 %v3080_v9  ;;  %v3082_v1 = vpop.eup %3081 }
 0x1b4   :  { %vm807_vm8 = vmor %vm805_vm7, %vm806_vm6 }
 0x1b5   :  { %v802_v30 = vsub.f32 1.0, %v801_v63 }
 0x1b7   :  { %v803_v56 = vmul.f32 %v3080_v9, %v802_v30 }
 0x1b9   :  { %v804_v25 = vadd.f32 %v3080_v9, %v803_v56 }
 0x1bb   :  { %v808_v31 = vsel %vm807_vm8, %v3080_v9, %v804_v25 }
 0x1bc   :  { %v813_v44 = vsel %vm810_vm9, %v812_v42, %v808_v31 }
 0x1bd   :  { %v819_v17 = vmul.f32 %v3082_v1, %v813_v44 }
 0x219   :  { %v822_v21 = vpop.permute.xlu0 %821 }
 0x21a   :  { %v824_v39 = vsel %vm348_vm14, %v819_v17, %v822_v21 }
 0x21b   :  { %2935 = vmatmul.msk.f32.vlgmr.msra.gmra.mxu0 %vm516_vm15, %v824_v39  ;;  %2936 = vmatmul.msk.f32.vlgmr.msra.gmra.mxu1 %vm516_vm15, %v824_v39 }
 0x21c   :  { %2937 = vmatmul.msk.f32.vlgmr.msra.gmra.mxu2 %vm516_vm15, %v824_v39  ;;  %2938 = vmatmul.msk.f32.vlgmr.msra.gmra.mxu3 %vm516_vm15, %v824_v39 }
 0x21d   :  { %1148 = vmatpush.msra.mxu0 %v3619_v26  ;;  %1168 = vmatpush.msra.mxu1 %v3624_v27 }
 0x21e   :  { %1188 = vmatpush.msra.mxu2 %v3629_v29  ;;  %1208 = vmatpush.msra.mxu3 %v3638_v3 }
 0x21f   :  { %1149 = vmatpush.msra.mxu0 %v3643_v4  ;;  %1169 = vmatpush.msra.mxu1 %v3648_v7 }
 0x220   :  { %1189 = vmatpush.msra.mxu2 %v3655_v38  ;;  %1209 = vmatpush.msra.mxu3 %v3660_v8 }
 0x221   :  { %1150 = vmatpush.msra.mxu0 %v3665_v19  ;;  %1170 = vmatpush.msra.mxu1 %v3672_v23 }
 0x222   :  { %1190 = vmatpush.msra.mxu2 %v3677_v24  ;;  %1210 = vmatpush.msra.mxu3 %v3682_v33 }
 0x223   :  { %2942 = vmatmul.msk.f32.vlgmr.msrb.gmra.mxu0 %vm348_vm14, %v819_v17  ;;  %2943 = vmatmul.msk.f32.vlgmr.msrb.gmra.mxu1 %vm348_vm14, %v819_v17 }
 0x224   :  { %2944 = vmatmul.msk.f32.vlgmr.msrb.gmra.mxu2 %vm348_vm14, %v819_v17  ;;  %2945 = vmatmul.msk.f32.vlgmr.msrb.gmra.mxu3 %vm348_vm14, %v819_v17 }
 0x225   :  { %1151 = vmatpush.msra.mxu0 %v3689_v34  ;;  %1171 = vmatpush.msra.mxu1 %v3694_v43 }
 0x226   :  { %1191 = vmatpush.msra.mxu2 %v3701_v47  ;;  %1211 = vmatpush.msra.mxu3 %v3706_v48 }
 0x227   :  { %1303 = vmatpush.msrb.mxu0 %v3458_v10  ;;  %1323 = vmatpush.msrb.mxu1 %v3460_v11 }
 0x228   :  { %1343 = vmatpush.msrb.mxu2 %v3466_v13  ;;  %1363 = vmatpush.msrb.mxu3 %v3464_v12 }
 0x229   :  { %1304 = vmatpush.msrb.mxu0 %v3470_v14  ;;  %1324 = vmatpush.msrb.mxu1 %v3472_v15 }
 0x22a   :  { %1344 = vmatpush.msrb.mxu2 %v3490_v18  ;;  %1364 = vmatpush.msrb.mxu3 %v3476_v16 }
 0x298   :  { %v845_v40 = vpop.f32.mrf.mxu0  ;;  %v865_v22 = vpop.f32.mrf.mxu1 }
 0x299   :  { %v846_v41 = vadd.f32 %v845_v40, %v3763_v2  ;;  %v866_v10 = vadd.f32 %v865_v22, %v3765_v5 }
 0x29b   :  { %v2939_v28 = vmul.f32 -1.442695, %v846_v41  ;;  %v2940_v11 = vmul.f32 -1.442695, %v866_v10 }
 0x29d   :  { %3083 = vpow2.f32 %v2939_v28 }
 0x29e   :  { %3085 = vpow2.f32 %v2940_v11 }
 0x29f   :  { %v905_v13 = vpop.f32.mrf.mxu3  ;;  %v885_v61 = vpop.f32.mrf.mxu2 }
 0x2a0   :  { %v906_v12 = vadd.f32 %v905_v13, %v3769_v0  ;;  %v998_v14 = vpop.f32.mrf.mxu0  ;;  %v1018_v32 = vpop.f32.mrf.mxu1 }
 0x2a1   :  { %v1061_v15 = vadd.f32 %v998_v14, %v3556_v45  ;;  %v1062_v18 = vadd.f32 %v1018_v32, %v3558_v46  ;;  %v886_v46 = vadd.f32 %v885_v61, %v3774_v6 }
 0x2a2   :  { %v2941_v16 = vmul.f32 -1.442695, %v906_v12 }
 0x2a3   :  { %v3084_v59 = vpop.eup %3083  ;;  %v2946_v36 = vmul.f32 -1.442695, %v1061_v15  ;;  %v2947_v51 = vmul.f32 -1.442695, %v1062_v18 }
 0x2a4   :  { %v3086_v35 = vpop.eup %3085  ;;  %v911_v52 = vadd.f32 1.0, %v3084_v59  ;;  %3087 = vpow2.f32 %v2941_v16 }
 0x2a5   :  { %v930_v60 = vadd.f32 1.0, %v3086_v35  ;;  %3089 = vpow2.f32 %v2946_v36 }
 0x2a6   :  { %3091 = vrcp.f32 %v911_v52  ;;  %v921_v42 = vand.u32 2147483647, %v911_v52  ;;  %v923_v44 = vand.u32 2147483648, %v911_v52  ;;  %vm917_vm13 = vweird.f32 %v911_v52 }
 0x2a7   :  { %3093 = vrcp.f32 %v930_v60  ;;  %v942_v17 = vand.u32 2147483648, %v930_v60  ;;  %v1038_v39 = vpop.f32.mrf.mxu2  ;;  %v940_v22 = vand.u32 2147483647, %v930_v60  ;;  %vm936_vm12 = vweird.f32 %v930_v60 }
 0x2a8   :  { %3095 = vpow2.f32 %v2947_v51  ;;  %v924_v11 = vor.u32 1.1754944e-38, %v923_v44  ;;  %v1063_v14 = vadd.f32 %v1038_v39, %v3561_v49  ;;  %vm922_vm2 = vcmp.eq.f32.partialorder %v921_v42, 8.507059e+37 }
 0x2a9   :  { %v943_v32 = vor.u32 1.1754944e-38, %v942_v17  ;;  %vm941_vm3 = vcmp.eq.f32.partialorder %v940_v22, 8.507059e+37 }
 0x2aa   :  { %v3088_v58 = vpop.eup %3087 }
 0x2ab   :  { %v3090_v20 = vpop.eup %3089  ;;  %v3854_v9 = vadd.f32 1.0, %v3088_v58 }
 0x2ac   :  { %v3092_v45 = vpop.eup %3091  ;;  %v3857_v63 = vadd.f32 1.0, %v3090_v20 }
 0x2ad   :  { %v3094_v30 = vpop.eup %3093  ;;  %v913_v56 = vmul.f32 %v3092_v45, %v911_v52  ;;  %3097 = vrcp.f32 %v3854_v9  ;;  %vm918_vm10 = vweird.f32 %v3092_v45 }
 0x2ae   :  { %v3096_v25 = vpop.eup %3095  ;;  %v932_v55 = vmul.f32 %v3094_v30, %v930_v60  ;;  %3099 = vrcp.f32 %v3857_v63  ;;  %vm937_vm11 = vweird.f32 %v3094_v30  ;;  %vm919_vm0 = vmor %vm917_vm13, %vm918_vm10  ;;  %v1080_v58 = vand.u32 2147483648, %v3857_v63 }
 0x2af   :  { %v914_v57 = vsub.f32 1.0, %v913_v56  ;;  %v3861_v31 = vadd.f32 1.0, %v3096_v25  ;;  %3101 = vtanh.f32 %v886_v46  ;;  %vm938_vm1 = vmor %vm936_vm12, %vm937_vm11  ;;  %vm1074_vm4 = vweird.f32 %v3857_v63 }
 0x2b0   :  { %v933_v1 = vsub.f32 1.0, %v932_v55  ;;  %vm956_vm10 = vweird.f32 %v3854_v9 }
 0x2b1   :  { %v915_v21 = vmul.f32 %v3092_v45, %v914_v57  ;;  %3103 = vrcp.f32 %v3861_v31  ;;  %v1099_v55 = vand.u32 2147483648, %v3861_v31  ;;  %v962_v57 = vand.u32 2147483648, %v3854_v9 }
 0x2b2   :  { %v934_v40 = vmul.f32 %v3094_v30, %v933_v1  ;;  %3105 = vtanh.f32 %v1063_v14  ;;  %v1097_v17 = vand.u32 2147483647, %v3861_v31  ;;  %vm1093_vm11 = vweird.f32 %v3861_v31 }
 0x2b3   :  { %v3864_v41 = vpop.eup %3097  ;;  %v916_v10 = vadd.f32 %v3092_v45, %v915_v21  ;;  %v960_v21 = vand.u32 2147483647, %v3854_v9  ;;  %v963_v14 = vor.u32 1.1754944e-38, %v962_v57 }
 0x2b4   :  { %v3100_v28 = vpop.eup %3099  ;;  %v935_v13 = vadd.f32 %v3094_v30, %v934_v40  ;;  %v952_v12 = vmul.f32 %v3864_v41, %v3854_v9  ;;  %vm957_vm6 = vweird.f32 %v3864_v41 }
 0x2b5   :  { %v920_v15 = vsel %vm919_vm0, %v3092_v45, %v916_v10  ;;  %v1070_v18 = vmul.f32 %v3100_v28, %v3857_v63  ;;  %v3102_v16 = vpop.eup %3101  ;;  %vm1075_vm5 = vweird.f32 %v3100_v28  ;;  %vm958_vm12 = vmor %vm956_vm10, %vm957_vm6  ;;  %v1100_v10 = vor.u32 1.1754944e-38, %v1099_v55 }
 0x2b6   :  { %v925_v59 = vsel %vm922_vm2, %v924_v11, %v920_v15  ;;  %v939_v36 = vsel %vm938_vm1, %v3094_v30, %v935_v13  ;;  %v953_v35 = vsub.f32 1.0, %v952_v12  ;;  %v1078_v30 = vand.u32 2147483647, %v3857_v63  ;;  %vm1076_vm8 = vmor %vm1074_vm4, %vm1075_vm5 }
 0x2b7   :  { %v3104_v52 = vpop.eup %3103  ;;  %v944_v51 = vsel %vm941_vm3, %v943_v32, %v939_v36  ;;  %v967_v60 = vmul.f32 %v3102_v16, %v925_v59  ;;  %v1071_v61 = vsub.f32 1.0, %v1070_v18  ;;  %vm1098_vm0 = vcmp.eq.f32.partialorder %v1097_v17, 8.507059e+37 }
 0x2b8   :  { %v966_v20 = vmul.f32 %v944_v51, %v3798_v37  ;;  %v1089_v49 = vmul.f32 %v3104_v52, %v3861_v31  ;;  %v954_v45 = vmul.f32 %v3864_v41, %v953_v35  ;;  %v1081_v37 = vor.u32 1.1754944e-38, %v1080_v58  ;;  %v3106_v39 = vpop.eup %3105  ;;  %v1058_v31 = vpop.f32.mrf.mxu3 }
 0x2b9   :  { %v1072_v46 = vmul.f32 %v3100_v28, %v1071_v61  ;;  %vm1094_vm7 = vweird.f32 %v3104_v52  ;;  %vm1079_vm9 = vcmp.eq.f32.partialorder %v1078_v30, 8.507059e+37  ;;  %vm961_vm1 = vcmp.eq.f32.partialorder %v960_v21, 8.507059e+37 }
 0x2ba   :  { %v3876_v56 = vadd.f32 %v967_v60, %v966_v20  ;;  %v1090_v25 = vsub.f32 1.0, %v1089_v49  ;;  %v955_v42 = vadd.f32 %v3864_v41, %v954_v45  ;;  %vm1095_vm13 = vmor %vm1093_vm11, %vm1094_vm7  ;;  %v1064_v59 = vadd.f32 %v1058_v31, %v3564_v50 }
 0x2bb   :  { %v1073_v1 = vadd.f32 %v3100_v28, %v1072_v46 }
 0x2bc   :  { %v1091_v44 = vmul.f32 %v3104_v52, %v1090_v25  ;;  %3107 = vtanh.f32 %v3876_v56  ;;  %v959_v13 = vsel %vm958_vm12, %v3864_v41, %v955_v42  ;;  %v2948_v36 = vmul.f32 -1.442695, %v1064_v59 }
 0x2bd   :  { %v1077_v63 = vsel %vm1076_vm8, %v3100_v28, %v1073_v1  ;;  %v964_v9 = vsel %vm961_vm1, %v963_v14, %v959_v13 }
 0x2be   :  { %v1082_v40 = vsel %vm1079_vm9, %v1081_v37, %v1077_v63  ;;  %v1092_v22 = vadd.f32 %v3104_v52, %v1091_v44  ;;  %3109 = vpow2.f32 %v2948_v36 }
 0x2bf   :  { %v1124_v11 = vmul.f32 %v3106_v39, %v1082_v40 }
 0x2c0   :  { %v1096_v12 = vsel %vm1095_vm13, %v3104_v52, %v1092_v22 }
 0x2c1   :  { %v1101_v28 = vsel %vm1098_vm0, %v1100_v10, %v1096_v12 }
 0x2c2   :  { %v3108_v32 = vpop.eup %3107  ;;  %v1123_v15 = vmul.f32 %v1101_v28, %v3811_v62 }
 0x2c3   :  { %v970_v18 = vmul.f32 %v3108_v32, %v964_v9 }
 0x2c4   :  { %v3889_v16 = vadd.f32 %v1124_v11, %v1123_v15  ;;  %v3110_v41 = vpop.eup %3109 }
 0x2c5   :  { %1129 = vrot.lane.b32.xlu0 %v970_v18, %s3400_s5  ;;  %v1107_v35 = vadd.f32 1.0, %v3110_v41 }
 0x2c7   :  { %3111 = vrcp.f32 %v1107_v35  ;;  %v1119_v58 = vand.u32 2147483648, %v1107_v35  ;;  %vm1113_vm3 = vweird.f32 %v1107_v35  ;;  %v1117_v20 = vand.u32 2147483647, %v1107_v35 }
 0x2c8   :  { %3113 = vtanh.f32 %v3889_v16 }
 0x2c9   :  { %v1120_v50 = vor.u32 1.1754944e-38, %v1119_v58  ;;  %vm1118_vm5 = vcmp.eq.f32.partialorder %v1117_v20, 8.507059e+37 }
 0x2cd   :  { %v3112_v52 = vpop.eup %3111 }
 0x2ce   :  { %v1109_v51 = vmul.f32 %v3112_v52, %v1107_v35  ;;  %vm1114_vm2 = vweird.f32 %v3112_v52  ;;  %v3114_v45 = vpop.eup %3113 }
 0x2cf   :  { %vm1115_vm4 = vmor %vm1113_vm3, %vm1114_vm2 }
 0x2d0   :  { %v1110_v60 = vsub.f32 1.0, %v1109_v51 }
 0x2d2   :  { %v1111_v61 = vmul.f32 %v3112_v52, %v1110_v60 }
 0x2d4   :  { %v1112_v62 = vadd.f32 %v3112_v52, %v1111_v61 }
 0x2d6   :  { %v1116_v49 = vsel %vm1115_vm4, %v3112_v52, %v1112_v62 }
 0x2d7   :  { %v1121_v46 = vsel %vm1118_vm5, %v1120_v50, %v1116_v49  ;;  %v4448_v50 = vld [vmem:[#allocation10_spill] sm:$0xff] }
 0x2d8   :  { %v1127_v30 = vmul.f32 %v3114_v45, %v1121_v46 }
 0x337   :  { %v1130_v25 = vpop.permute.xlu0 %1129 }
 0x338   :  { %v1132_v55 = vsel %vm348_vm14, %v1127_v30, %v1130_v25 }
 0x339   :  { %2949 = vmatmul.msk.f32.vlgmr.msra.gmra.mxu0 %vm516_vm15, %v1132_v55  ;;  %2950 = vmatmul.msk.f32.vlgmr.msra.gmra.mxu1 %vm516_vm15, %v1132_v55 }
 0x33a   :  { %2951 = vmatmul.msk.f32.vlgmr.msra.gmra.mxu2 %vm516_vm15, %v1132_v55  ;;  %2952 = vmatmul.msk.f32.vlgmr.msra.gmra.mxu3 %vm516_vm15, %v1132_v55 }
 0x33b   :  { %1456 = vmatpush.msra.mxu0 %v3619_v26  ;;  %1476 = vmatpush.msra.mxu1 %v3624_v27  ;;  %v3919_v26 = vld [vmem:[#allocation6 + $0x20] sm:$0xff]  ;;  %v3922_v27 = vld [vmem:[#allocation6 + $0x28] sm:$0xff] }
 0x33c   :  { %1496 = vmatpush.msra.mxu2 %v3629_v29  ;;  %1516 = vmatpush.msra.mxu3 %v3638_v3  ;;  %v3925_v29 = vld [vmem:[#allocation6 + $0x30] sm:$0xff]  ;;  %v3928_v3 = vld [vmem:[#allocation6 + $0x38] sm:$0xff] }
 0x33d   :  { %1457 = vmatpush.msra.mxu0 %v3643_v4  ;;  %1477 = vmatpush.msra.mxu1 %v3648_v7  ;;  %v3931_v4 = vld [vmem:[#allocation6] sm:$0xff]  ;;  %v3934_v7 = vld [vmem:[#allocation6 + $0x8] sm:$0xff] }
 0x33e   :  { %1497 = vmatpush.msra.mxu2 %v3655_v38  ;;  %1517 = vmatpush.msra.mxu3 %v3660_v8  ;;  %v3937_v38 = vld [vmem:[#allocation6 + $0x10] sm:$0xff]  ;;  %v3940_v8 = vld [vmem:[#allocation6 + $0x18] sm:$0xff] }
 0x33f   :  { %1458 = vmatpush.msra.mxu0 %v3665_v19  ;;  %1478 = vmatpush.msra.mxu1 %v3672_v23 }
 0x340   :  { %1498 = vmatpush.msra.mxu2 %v3677_v24  ;;  %1518 = vmatpush.msra.mxu3 %v3682_v33 }
 0x341   :  { %2956 = vmatmul.msk.f32.vlgmr.msrb.gmra.mxu0 %vm348_vm14, %v1127_v30  ;;  %2957 = vmatmul.msk.f32.vlgmr.msrb.gmra.mxu1 %vm348_vm14, %v1127_v30 }
 0x342   :  { %2958 = vmatmul.msk.f32.vlgmr.msrb.gmra.mxu2 %vm348_vm14, %v1127_v30  ;;  %2959 = vmatmul.msk.f32.vlgmr.msrb.gmra.mxu3 %vm348_vm14, %v1127_v30 }
 0x343   :  { %1459 = vmatpush.msra.mxu0 %v3689_v34  ;;  %1479 = vmatpush.msra.mxu1 %v3694_v43 }
 0x344   :  { %1499 = vmatpush.msra.mxu2 %v3701_v47  ;;  %1519 = vmatpush.msra.mxu3 %v3706_v48 }
 0x345   :  { %1611 = vmatpush.msrb.mxu0 %v3919_v26  ;;  %1631 = vmatpush.msrb.mxu1 %v3922_v27 }
 0x346   :  { %1651 = vmatpush.msrb.mxu2 %v3925_v29  ;;  %1671 = vmatpush.msrb.mxu3 %v3928_v3 }
 0x347   :  { %1612 = vmatpush.msrb.mxu0 %v3931_v4  ;;  %1632 = vmatpush.msrb.mxu1 %v3934_v7 }
 0x348   :  { %1652 = vmatpush.msrb.mxu2 %v3937_v38  ;;  %1672 = vmatpush.msrb.mxu3 %v3940_v8 }
 0x3b6   :  { %v1153_v19 = vpop.f32.mrf.mxu0  ;;  %v1173_v23 = vpop.f32.mrf.mxu1 }
 0x3b7   :  { %v1154_v24 = vadd.f32 %v1153_v19, %v3763_v2  ;;  %v1174_v33 = vadd.f32 %v1173_v23, %v3765_v5 }
 0x3b9   :  { %v2953_v34 = vmul.f32 -1.442695, %v1154_v24  ;;  %v2954_v43 = vmul.f32 -1.442695, %v1174_v33 }
 0x3bb   :  { %3115 = vpow2.f32 %v2953_v34 }
 0x3bc   :  { %3117 = vpow2.f32 %v2954_v43 }
 0x3bd   :  { %v1213_v47 = vpop.f32.mrf.mxu3  ;;  %v1193_v10 = vpop.f32.mrf.mxu2 }
 0x3be   :  { %v1214_v48 = vadd.f32 %v1213_v47, %v3769_v0  ;;  %v1306_v57 = vpop.f32.mrf.mxu0  ;;  %v1326_v1 = vpop.f32.mrf.mxu1 }
 0x3bf   :  { %v1369_v37 = vadd.f32 %v1306_v57, %v3566_v53  ;;  %v1370_v42 = vadd.f32 %v1326_v1, %v3568_v54  ;;  %v1194_v54 = vadd.f32 %v1193_v10, %v3774_v6 }
 0x3c0   :  { %v2955_v44 = vmul.f32 -1.442695, %v1214_v48 }
 0x3c1   :  { %v3116_v17 = vpop.eup %3115  ;;  %v2960_v63 = vmul.f32 -1.442695, %v1369_v37  ;;  %v2961_v40 = vmul.f32 -1.442695, %v1370_v42 }
 0x3c2   :  { %v3118_v21 = vpop.eup %3117  ;;  %v1219_v39 = vadd.f32 1.0, %v3116_v17  ;;  %3119 = vpow2.f32 %v2955_v44 }
 0x3c3   :  { %v1238_v22 = vadd.f32 1.0, %v3118_v21  ;;  %3121 = vpow2.f32 %v2960_v63 }
 0x3c4   :  { %3123 = vrcp.f32 %v1219_v39  ;;  %v1229_v36 = vand.u32 2147483647, %v1219_v39  ;;  %v1231_v41 = vand.u32 2147483648, %v1219_v39  ;;  %vm1225_vm9 = vweird.f32 %v1219_v39 }
 0x3c5   :  { %3125 = vrcp.f32 %v1238_v22  ;;  %v1250_v35 = vand.u32 2147483648, %v1238_v22  ;;  %v1346_v51 = vpop.f32.mrf.mxu2  ;;  %v1248_v61 = vand.u32 2147483647, %v1238_v22  ;;  %vm1244_vm8 = vweird.f32 %v1238_v22 }
 0x3c6   :  { %3127 = vpow2.f32 %v2961_v40  ;;  %v1232_v49 = vor.u32 1.1754944e-38, %v1231_v41  ;;  %v1371_v46 = vadd.f32 %v1346_v51, %v4448_v50  ;;  %vm1230_vm12 = vcmp.eq.f32.partialorder %v1229_v36, 8.507059e+37 }
 0x3c7   :  { %v1251_v25 = vor.u32 1.1754944e-38, %v1250_v35  ;;  %vm1249_vm13 = vcmp.eq.f32.partialorder %v1248_v61, 8.507059e+37 }
 0x3c8   :  { %v3120_v11 = vpop.eup %3119 }
 0x3c9   :  { %v3122_v13 = vpop.eup %3121  ;;  %v3948_v12 = vadd.f32 1.0, %v3120_v11 }
 0x3ca   :  { %v3124_v53 = vpop.eup %3123  ;;  %v3951_v14 = vadd.f32 1.0, %v3122_v13 }
 0x3cb   :  { %v3126_v28 = vpop.eup %3125  ;;  %v1221_v32 = vmul.f32 %v3124_v53, %v1219_v39  ;;  %3129 = vrcp.f32 %v3948_v12  ;;  %vm1226_vm6 = vweird.f32 %v3124_v53 }
 0x3cc   :  { %v3128_v15 = vpop.eup %3127  ;;  %v1240_v9 = vmul.f32 %v3126_v28, %v1238_v22  ;;  %3131 = vrcp.f32 %v3951_v14  ;;  %vm1245_vm7 = vweird.f32 %v3126_v28  ;;  %vm1227_vm10 = vmor %vm1225_vm9, %vm1226_vm6  ;;  %v1388_v1 = vand.u32 2147483648, %v3951_v14 }
 0x3cd   :  { %v1222_v18 = vsub.f32 1.0, %v1221_v32  ;;  %v3955_v31 = vadd.f32 1.0, %v3128_v15  ;;  %3133 = vtanh.f32 %v1194_v54  ;;  %vm1246_vm11 = vmor %vm1244_vm8, %vm1245_vm7  ;;  %vm1382_vm0 = vweird.f32 %v3951_v14 }
 0x3ce   :  { %v1241_v59 = vsub.f32 1.0, %v1240_v9  ;;  %v1386_v63 = vand.u32 2147483647, %v3951_v14  ;;  %v1270_v22 = vand.u32 2147483648, %v3948_v12  ;;  %vm1264_vm6 = vweird.f32 %v3948_v12 }
 0x3cf   :  { %v1223_v52 = vmul.f32 %v3124_v53, %v1222_v18  ;;  %3135 = vrcp.f32 %v3955_v31  ;;  %v1407_v40 = vand.u32 2147483648, %v3955_v31  ;;  %vm1401_vm7 = vweird.f32 %v3955_v31 }
 0x3d0   :  { %v1242_v60 = vmul.f32 %v3126_v28, %v1241_v59  ;;  %3137 = vtanh.f32 %v1371_v46  ;;  %vm1387_vm5 = vcmp.eq.f32.partialorder %v1386_v63, 8.507059e+37  ;;  %v1271_v41 = vor.u32 1.1754944e-38, %v1270_v22  ;;  %v4032_v63 = vld [vmem:[%s4425_s4 + $0x50] sm:$0xff]  ;;  %v4050_v22 = vld [vmem:[%s4425_s4 + $0x28] sm:$0xff] }
 0x3d1   :  { %v3958_v62 = vpop.eup %3129  ;;  %v1224_v58 = vadd.f32 %v3124_v53, %v1223_v52  ;;  %v1408_v9 = vor.u32 1.1754944e-38, %v1407_v40  ;;  %v4044_v40 = vld [vmem:[%s4425_s4 + $0x20] sm:$0xff] }
 0x3d2   :  { %v3132_v20 = vpop.eup %3131  ;;  %v1243_v45 = vadd.f32 %v3126_v28, %v1242_v60  ;;  %v1260_v30 = vmul.f32 %v3958_v62, %v3948_v12  ;;  %vm1265_vm2 = vweird.f32 %v3958_v62 }
 0x3d3   :  { %v1228_v55 = vsel %vm1227_vm10, %v3124_v53, %v1224_v58  ;;  %v1378_v19 = vmul.f32 %v3132_v20, %v3951_v14  ;;  %v3134_v23 = vpop.eup %3133  ;;  %vm1383_vm1 = vweird.f32 %v3132_v20  ;;  %v1405_v53 = vand.u32 2147483647, %v3955_v31  ;;  %vm1266_vm8 = vmor %vm1264_vm6, %vm1265_vm2  ;;  %v4449_v58 = vld [vmem:[#allocation11_spill] sm:$0xff] }
 0x3d4   :  { %v1233_v24 = vsel %vm1230_vm12, %v1232_v49, %v1228_v55  ;;  %v1247_v33 = vsel %vm1246_vm11, %v3126_v28, %v1243_v45  ;;  %v1261_v34 = vsub.f32 1.0, %v1260_v30  ;;  %vm1384_vm4 = vmor %vm1382_vm0, %vm1383_vm1  ;;  %v1268_v14 = vand.u32 2147483647, %v3948_v12 }
 0x3d5   :  { %v3136_v43 = vpop.eup %3135  ;;  %v1252_v47 = vsel %vm1249_vm13, %v1251_v25, %v1247_v33  ;;  %v1275_v48 = vmul.f32 %v3134_v23, %v1233_v24  ;;  %v1379_v57 = vsub.f32 1.0, %v1378_v19  ;;  %vm1406_vm10 = vcmp.eq.f32.partialorder %v1405_v53, 8.507059e+37  ;;  %v4084_v53 = vld [vmem:[%s4425_s4 + $0x10] sm:$0xff] }
 0x3d6   :  { %v1274_v37 = vmul.f32 %v1252_v47, %v3876_v56  ;;  %v1397_v42 = vmul.f32 %v3136_v43, %v3955_v31  ;;  %v1262_v44 = vmul.f32 %v3958_v62, %v1261_v34  ;;  %v1389_v56 = vor.u32 1.1754944e-38, %v1388_v1  ;;  %v3138_v28 = vpop.eup %3137  ;;  %v1366_v31 = vpop.f32.mrf.mxu3  ;;  %v4002_v1 = vld [vmem:[%s4425_s4 + $0x68] sm:$0xff] }
 0x3d7   :  { %v1380_v17 = vmul.f32 %v3132_v20, %v1379_v57  ;;  %vm1402_vm3 = vweird.f32 %v3136_v43  ;;  %vm1269_vm11 = vcmp.eq.f32.partialorder %v1268_v14, 8.507059e+37  ;;  %v3996_v57 = vld [vmem:[%s4425_s4 + $0x60] sm:$0xff] }
 0x3d8   :  { %v3970_v21 = vadd.f32 %v1275_v48, %v1274_v37  ;;  %v1398_v39 = vsub.f32 1.0, %v1397_v42  ;;  %v1263_v11 = vadd.f32 %v3958_v62, %v1262_v44  ;;  %vm1403_vm9 = vmor %vm1401_vm7, %vm1402_vm3  ;;  %v4008_v37 = vld [vmem:[%s4425_s4 + $0x70] sm:$0xff]  ;;  %v4014_v42 = vld [vmem:[%s4425_s4 + $0x78] sm:$0xff] }
 0x3d9   :  { %v1381_v10 = vadd.f32 %v3132_v20, %v1380_v17  ;;  %v4020_v44 = vld [vmem:[%s4425_s4 + $0x40] sm:$0xff]  ;;  %v4026_v17 = vld [vmem:[%s4425_s4 + $0x48] sm:$0xff] }
 0x3da   :  { %v1399_v13 = vmul.f32 %v3136_v43, %v1398_v39  ;;  %3139 = vtanh.f32 %v3970_v21  ;;  %v1267_v59 = vsel %vm1266_vm8, %v3958_v62, %v1263_v11  ;;  %v4038_v39 = vld [vmem:[%s4425_s4 + $0x58] sm:$0xff]  ;;  %v4072_v11 = vld [vmem:[%s4425_s4] sm:$0xff] }
 0x3db   :  { %v1385_v54 = vsel %vm1384_vm4, %v3132_v20, %v1381_v10  ;;  %v1272_v12 = vsel %vm1269_vm11, %v1271_v41, %v1267_v59  ;;  %v1372_v20 = vadd.f32 %v1366_v31, %v4449_v58  ;;  %v4056_v10 = vld [vmem:[%s4425_s4 + $0x30] sm:$0xff] }
 0x3dc   :  { %v1390_v32 = vsel %vm1387_vm5, %v1389_v56, %v1385_v54  ;;  %v1400_v15 = vadd.f32 %v3136_v43, %v1399_v13  ;;  %v4062_v56 = vld [vmem:[%s4425_s4 + $0x38] sm:$0xff]  ;;  %v4078_v13 = vld [vmem:[%s4425_s4 + $0x8] sm:$0xff] }
 0x3dd   :  { %v1432_v18 = vmul.f32 %v3138_v28, %v1390_v32  ;;  %v2962_v49 = vmul.f32 -1.442695, %v1372_v20  ;;  %v4090_v54 = vld [vmem:[%s4425_s4 + $0x18] sm:$0xff] }
 0x3de   :  { %v1404_v36 = vsel %vm1403_vm9, %v3136_v43, %v1400_v15 }
 0x3df   :  { %v1409_v35 = vsel %vm1406_vm10, %v1408_v9, %v1404_v36  ;;  %3141 = vpow2.f32 %v2962_v49 }
 0x3e0   :  { %v3140_v52 = vpop.eup %3139  ;;  %v1431_v51 = vmul.f32 %v1409_v35, %v3889_v16 }
 0x3e1   :  { %v1278_v60 = vmul.f32 %v3140_v52, %v1272_v12  ;;  %v4450_v52 = vld [vmem:[#allocation12_spill] sm:$0xff]  ;;  %v4451_v12 = vld [vmem:[#allocation13_spill] sm:$0xff] }
 0x3e2   :  { %v3983_v61 = vadd.f32 %v1432_v18, %v1431_v51 }
 0x3e3   :  { %1437 = vrot.lane.b32.xlu1 %v1278_v60, %s3400_s5 }
 0x3e5   :  { %v3142_v62 = vpop.eup %3141 }
 0x3e6   :  { %v1415_v45 = vadd.f32 1.0, %v3142_v62 }
 0x3e8   :  { %3143 = vrcp.f32 %v1415_v45  ;;  %v1427_v55 = vand.u32 2147483648, %v1415_v45  ;;  %vm1421_vm13 = vweird.f32 %v1415_v45  ;;  %v1425_v19 = vand.u32 2147483647, %v1415_v45 }
 0x3e9   :  { %3145 = vtanh.f32 %v3983_v61 }
 0x3ea   :  { %v1428_v33 = vor.u32 1.1754944e-38, %v1427_v55  ;;  %vm1426_vm1 = vcmp.eq.f32.partialorder %v1425_v19, 8.507059e+37 }
 0x3ee   :  { %v3144_v50 = vpop.eup %3143 }
 0x3ef   :  { %v1417_v46 = vmul.f32 %v3144_v50, %v1415_v45  ;;  %vm1422_vm12 = vweird.f32 %v3144_v50  ;;  %v3146_v24 = vpop.eup %3145 }
 0x3f0   :  { %vm1423_vm0 = vmor %vm1421_vm13, %vm1422_vm12 }
 0x3f1   :  { %v1418_v30 = vsub.f32 1.0, %v1417_v46 }
 0x3f3   :  { %v1419_v25 = vmul.f32 %v3144_v50, %v1418_v30 }
 0x3f5   :  { %v1420_v16 = vadd.f32 %v3144_v50, %v1419_v25 }
 0x3f7   :  { %v1424_v23 = vsel %vm1423_vm0, %v3144_v50, %v1420_v16 }
 0x3f8   :  { %v1429_v34 = vsel %vm1426_vm1, %v1428_v33, %v1424_v23 }
 0x3f9   :  { %v1435_v43 = vmul.f32 %v3146_v24, %v1429_v34 }
 0x455   :  { %v1438_v47 = vpop.permute.xlu1 %1437 }
 0x456   :  { %v1440_v48 = vsel %vm348_vm14, %v1435_v43, %v1438_v47 }
 0x457   :  { %2963 = vmatmul.msk.f32.vlgmr.msra.gmra.mxu0 %vm516_vm15, %v1440_v48  ;;  %2964 = vmatmul.msk.f32.vlgmr.msra.gmra.mxu1 %vm516_vm15, %v1440_v48 }
 0x458   :  { %2965 = vmatmul.msk.f32.vlgmr.msra.gmra.mxu2 %vm516_vm15, %v1440_v48  ;;  %2966 = vmatmul.msk.f32.vlgmr.msra.gmra.mxu3 %vm516_vm15, %v1440_v48 }
 0x459   :  { %1764 = vmatpush.msra.mxu0 %v3996_v57  ;;  %1784 = vmatpush.msra.mxu1 %v4002_v1 }
 0x45a   :  { %1804 = vmatpush.msra.mxu2 %v4008_v37  ;;  %1824 = vmatpush.msra.mxu3 %v4014_v42 }
 0x45b   :  { %1765 = vmatpush.msra.mxu0 %v4020_v44  ;;  %1785 = vmatpush.msra.mxu1 %v4026_v17 }
 0x45c   :  { %1805 = vmatpush.msra.mxu2 %v4032_v63  ;;  %1825 = vmatpush.msra.mxu3 %v4038_v39 }
 0x45d   :  { %1766 = vmatpush.msra.mxu0 %v4044_v40  ;;  %1786 = vmatpush.msra.mxu1 %v4050_v22 }
 0x45e   :  { %1806 = vmatpush.msra.mxu2 %v4056_v10  ;;  %1826 = vmatpush.msra.mxu3 %v4062_v56 }
 0x45f   :  { %2970 = vmatmul.msk.f32.vlgmr.msrb.gmra.mxu0 %vm348_vm14, %v1435_v43  ;;  %2971 = vmatmul.msk.f32.vlgmr.msrb.gmra.mxu1 %vm348_vm14, %v1435_v43 }
 0x460   :  { %2972 = vmatmul.msk.f32.vlgmr.msrb.gmra.mxu2 %vm348_vm14, %v1435_v43  ;;  %2973 = vmatmul.msk.f32.vlgmr.msrb.gmra.mxu3 %vm348_vm14, %v1435_v43 }
 0x461   :  { %1767 = vmatpush.msra.mxu0 %v4072_v11  ;;  %1787 = vmatpush.msra.mxu1 %v4078_v13 }
 0x462   :  { %1807 = vmatpush.msra.mxu2 %v4084_v53  ;;  %1827 = vmatpush.msra.mxu3 %v4090_v54 }
 0x463   :  { %1919 = vmatpush.msrb.mxu0 %v3919_v26  ;;  %1939 = vmatpush.msrb.mxu1 %v3922_v27 }
 0x464   :  { %1959 = vmatpush.msrb.mxu2 %v3925_v29  ;;  %1979 = vmatpush.msrb.mxu3 %v3928_v3 }
 0x465   :  { %1920 = vmatpush.msrb.mxu0 %v3931_v4  ;;  %1940 = vmatpush.msrb.mxu1 %v3934_v7 }
 0x466   :  { %1960 = vmatpush.msrb.mxu2 %v3937_v38  ;;  %1980 = vmatpush.msrb.mxu3 %v3940_v8 }
 0x4d4   :  { %v1461_v14 = vpop.f32.mrf.mxu0  ;;  %v1481_v28 = vpop.f32.mrf.mxu1 }
 0x4d5   :  { %v1462_v32 = vadd.f32 %v1461_v14, %v3763_v2  ;;  %v1482_v15 = vadd.f32 %v1481_v28, %v3765_v5 }
 0x4d7   :  { %v2967_v9 = vmul.f32 -1.442695, %v1462_v32  ;;  %v2968_v18 = vmul.f32 -1.442695, %v1482_v15 }
 0x4d9   :  { %3147 = vpow2.f32 %v2967_v9 }
 0x4da   :  { %3149 = vpow2.f32 %v2968_v18 }
 0x4db   :  { %v1521_v59 = vpop.f32.mrf.mxu3  ;;  %v1501_v46 = vpop.f32.mrf.mxu2 }
 0x4dc   :  { %v1522_v36 = vadd.f32 %v1521_v59, %v3769_v0  ;;  %v1614_v41 = vpop.f32.mrf.mxu0  ;;  %v1634_v35 = vpop.f32.mrf.mxu1  ;;  %v1502_v19 = vadd.f32 %v1501_v46, %v3774_v6 }
 0x4dd   :  { %v1677_v51 = vadd.f32 %v1614_v41, %v4450_v52  ;;  %v1678_v60 = vadd.f32 %v1634_v35, %v4451_v12 }
 0x4de   :  { %v2969_v31 = vmul.f32 -1.442695, %v1522_v36 }
 0x4df   :  { %v3148_v58 = vpop.eup %3147  ;;  %v2974_v20 = vmul.f32 -1.442695, %v1677_v51  ;;  %v2975_v45 = vmul.f32 -1.442695, %v1678_v60 }
 0x4e0   :  { %v3150_v49 = vpop.eup %3149  ;;  %v1527_v62 = vadd.f32 1.0, %v3148_v58  ;;  %3151 = vpow2.f32 %v2969_v31  ;;  %v4452_v31 = vld [vmem:[#allocation14_spill] sm:$0xff] }
 0x4e1   :  { %v1546_v50 = vadd.f32 1.0, %v3150_v49  ;;  %3153 = vpow2.f32 %v2974_v20 }
 0x4e2   :  { %3155 = vrcp.f32 %v1527_v62  ;;  %v1537_v28 = vand.u32 2147483647, %v1527_v62  ;;  %v1539_v32 = vand.u32 2147483648, %v1527_v62  ;;  %vm1533_vm5 = vweird.f32 %v1527_v62 }
 0x4e3   :  { %3157 = vrcp.f32 %v1546_v50  ;;  %v1558_v15 = vand.u32 2147483648, %v1546_v50  ;;  %v1654_v18 = vpop.f32.mrf.mxu2  ;;  %v1556_v36 = vand.u32 2147483647, %v1546_v50  ;;  %vm1552_vm4 = vweird.f32 %v1546_v50 }
 0x4e4   :  { %3159 = vpow2.f32 %v2975_v45  ;;  %v1540_v51 = vor.u32 1.1754944e-38, %v1539_v32  ;;  %v1679_v58 = vadd.f32 %v1654_v18, %v4452_v31  ;;  %vm1538_vm8 = vcmp.eq.f32.partialorder %v1537_v28, 8.507059e+37 }
 0x4e5   :  { %v1559_v20 = vor.u32 1.1754944e-38, %v1558_v15  ;;  %vm1557_vm9 = vcmp.eq.f32.partialorder %v1556_v36, 8.507059e+37 }
 0x4e6   :  { %v3152_v30 = vpop.eup %3151 }
 0x4e7   :  { %v3154_v25 = vpop.eup %3153  ;;  %v4106_v16 = vadd.f32 1.0, %v3152_v30 }
 0x4e8   :  { %v3156_v55 = vpop.eup %3155  ;;  %v4109_v23 = vadd.f32 1.0, %v3154_v25 }
 0x4e9   :  { %v3158_v24 = vpop.eup %3157  ;;  %v1529_v33 = vmul.f32 %v3156_v55, %v1527_v62  ;;  %3161 = vrcp.f32 %v4106_v16  ;;  %vm1534_vm2 = vweird.f32 %v3156_v55  ;;  %v1578_v18 = vand.u32 2147483648, %v4106_v16 }
 0x4ea   :  { %v3160_v34 = vpop.eup %3159  ;;  %v1548_v43 = vmul.f32 %v3158_v24, %v1546_v50  ;;  %3163 = vrcp.f32 %v4109_v23  ;;  %vm1553_vm3 = vweird.f32 %v3158_v24  ;;  %vm1535_vm6 = vmor %vm1533_vm5, %vm1534_vm2  ;;  %vm1690_vm10 = vweird.f32 %v4109_v23 }
 0x4eb   :  { %v1530_v47 = vsub.f32 1.0, %v1529_v33  ;;  %v4113_v48 = vadd.f32 1.0, %v3160_v34  ;;  %3165 = vtanh.f32 %v1502_v19  ;;  %vm1554_vm7 = vmor %vm1552_vm4, %vm1553_vm3  ;;  %vm1572_vm2 = vweird.f32 %v4106_v16 }
 0x4ec   :  { %v1549_v14 = vsub.f32 1.0, %v1548_v43  ;;  %v1696_v43 = vand.u32 2147483648, %v4109_v23 }
 0x4ed   :  { %v1531_v9 = vmul.f32 %v3156_v55, %v1530_v47  ;;  %3167 = vrcp.f32 %v4113_v48  ;;  %vm1709_vm3 = vweird.f32 %v4113_v48 }
 0x4ee   :  { %v1550_v59 = vmul.f32 %v3158_v24, %v1549_v14  ;;  %3169 = vtanh.f32 %v1679_v58 }
 0x4ef   :  { %v4116_v41 = vpop.eup %3161  ;;  %v1532_v35 = vadd.f32 %v3156_v55, %v1531_v9  ;;  %v1715_v9 = vand.u32 2147483648, %v4113_v48 }
 0x4f0   :  { %v3164_v52 = vpop.eup %3163  ;;  %v1551_v12 = vadd.f32 %v3158_v24, %v1550_v59  ;;  %v1568_v60 = vmul.f32 %v4116_v41, %v4106_v16  ;;  %vm1573_vm12 = vweird.f32 %v4116_v41 }
 0x4f1   :  { %v1536_v49 = vsel %vm1535_vm6, %v3156_v55, %v1532_v35  ;;  %v1686_v45 = vmul.f32 %v3164_v52, %v4109_v23  ;;  %v3166_v46 = vpop.eup %3165  ;;  %vm1691_vm11 = vweird.f32 %v3164_v52  ;;  %vm1574_vm4 = vmor %vm1572_vm2, %vm1573_vm12 }
 0x4f2   :  { %v1541_v30 = vsel %vm1538_vm8, %v1540_v51, %v1536_v49  ;;  %v1555_v50 = vsel %vm1554_vm7, %v3158_v24, %v1551_v12  ;;  %v1569_v62 = vsub.f32 1.0, %v1568_v60  ;;  %v1694_v24 = vand.u32 2147483647, %v4109_v23  ;;  %vm1692_vm0 = vmor %vm1690_vm10, %vm1691_vm11 }
 0x4f3   :  { %v3168_v25 = vpop.eup %3167  ;;  %v1560_v19 = vsel %vm1557_vm9, %v1559_v20, %v1555_v50  ;;  %v1583_v33 = vmul.f32 %v3166_v46, %v1541_v30  ;;  %v1687_v34 = vsub.f32 1.0, %v1686_v45  ;;  %v1713_v51 = vand.u32 2147483647, %v4113_v48 }
 0x4f4   :  { %v1582_v47 = vmul.f32 %v1560_v19, %v3970_v21  ;;  %v1705_v14 = vmul.f32 %v3168_v25, %v4113_v48  ;;  %v1570_v55 = vmul.f32 %v4116_v41, %v1569_v62  ;;  %v1697_v21 = vor.u32 1.1754944e-38, %v1696_v43  ;;  %v3170_v60 = vpop.eup %3169  ;;  %v1674_v48 = vpop.f32.mrf.mxu3 }
 0x4f5   :  { %v1688_v28 = vmul.f32 %v3164_v52, %v1687_v34  ;;  %vm1710_vm13 = vweird.f32 %v3168_v25  ;;  %vm1695_vm1 = vcmp.eq.f32.partialorder %v1694_v24, 8.507059e+37  ;;  %v1576_v12 = vand.u32 2147483647, %v4106_v16  ;;  %v4453_v34 = vld [vmem:[#allocation15_spill] sm:$0xff] }
 0x4f6   :  { %v4128_v32 = vadd.f32 %v1583_v33, %v1582_v47  ;;  %v1706_v15 = vsub.f32 1.0, %v1705_v14  ;;  %v1571_v36 = vadd.f32 %v4116_v41, %v1570_v55  ;;  %vm1711_vm5 = vmor %vm1709_vm3, %vm1710_vm13  ;;  %v1716_v20 = vor.u32 1.1754944e-38, %v1715_v9 }
 0x4f7   :  { %v1689_v59 = vadd.f32 %v3164_v52, %v1688_v28  ;;  %vm1714_vm6 = vcmp.eq.f32.partialorder %v1713_v51, 8.507059e+37  ;;  %v1579_v30 = vor.u32 1.1754944e-38, %v1578_v18  ;;  %vm1577_vm7 = vcmp.eq.f32.partialorder %v1576_v12, 8.507059e+37 }
 0x4f8   :  { %v1707_v35 = vmul.f32 %v3168_v25, %v1706_v15  ;;  %3171 = vtanh.f32 %v4128_v32  ;;  %v1575_v45 = vsel %vm1574_vm4, %v4116_v41, %v1571_v36  ;;  %v1680_v43 = vadd.f32 %v1674_v48, %v4453_v34 }
 0x4f9   :  { %v1693_v23 = vsel %vm1692_vm0, %v3164_v52, %v1689_v59  ;;  %v1580_v16 = vsel %vm1577_vm7, %v1579_v30, %v1575_v45 }
 0x4fa   :  { %v1698_v31 = vsel %vm1695_vm1, %v1697_v21, %v1693_v23  ;;  %v1708_v58 = vadd.f32 %v3168_v25, %v1707_v35  ;;  %v2976_v47 = vmul.f32 -1.442695, %v1680_v43 }
 0x4fb   :  { %v1740_v49 = vmul.f32 %v3170_v60, %v1698_v31 }
 0x4fc   :  { %v1712_v46 = vsel %vm1711_vm5, %v3168_v25, %v1708_v58  ;;  %3173 = vpow2.f32 %v2976_v47 }
 0x4fd   :  { %v1717_v52 = vsel %vm1714_vm6, %v1716_v20, %v1712_v46 }
 0x4fe   :  { %v3172_v50 = vpop.eup %3171  ;;  %v1739_v62 = vmul.f32 %v1717_v52, %v3983_v61 }
 0x4ff   :  { %v1586_v19 = vmul.f32 %v3172_v50, %v1580_v16 }
 0x500   :  { %v4141_v33 = vadd.f32 %v1740_v49, %v1739_v62 }
 0x501   :  { %1745 = vrot.lane.b32.xlu1 %v1586_v19, %s3400_s5 }
 0x502   :  { %v3174_v41 = vpop.eup %3173 }
 0x503   :  { %v1723_v25 = vadd.f32 1.0, %v3174_v41 }
 0x505   :  { %3175 = vrcp.f32 %v1723_v25  ;;  %v1735_v15 = vand.u32 2147483648, %v1723_v25  ;;  %vm1729_vm9 = vweird.f32 %v1723_v25  ;;  %v1733_v9 = vand.u32 2147483647, %v1723_v25 }
 0x506   :  { %3177 = vtanh.f32 %v4141_v33 }
 0x507   :  { %v1736_v21 = vor.u32 1.1754944e-38, %v1735_v15  ;;  %vm1734_vm11 = vcmp.eq.f32.partialorder %v1733_v9, 8.507059e+37 }
 0x50b   :  { %v3176_v14 = vpop.eup %3175 }
 0x50c   :  { %v1725_v55 = vmul.f32 %v3176_v14, %v1723_v25  ;;  %vm1730_vm8 = vweird.f32 %v3176_v14  ;;  %v3178_v59 = vpop.eup %3177 }
 0x50d   :  { %vm1731_vm10 = vmor %vm1729_vm9, %vm1730_vm8 }
 0x50e   :  { %v1726_v28 = vsub.f32 1.0, %v1725_v55 }
 0x510   :  { %v1727_v24 = vmul.f32 %v3176_v14, %v1726_v28 }
 0x512   :  { %v1728_v61 = vadd.f32 %v3176_v14, %v1727_v24 }
 0x514   :  { %v1732_v18 = vsel %vm1731_vm10, %v3176_v14, %v1728_v61 }
 0x515   :  { %v1737_v36 = vsel %vm1734_vm11, %v1736_v21, %v1732_v18 }
 0x516   :  { %v1743_v35 = vmul.f32 %v3178_v59, %v1737_v36 }
 0x573   :  { %v1746_v51 = vpop.permute.xlu1 %1745 }
 0x574   :  { %v1748_v23 = vsel %vm348_vm14, %v1743_v35, %v1746_v51 }
 0x575   :  { %2977 = vmatmul.msk.f32.vlgmr.msra.gmra.mxu0 %vm516_vm15, %v1748_v23  ;;  %2978 = vmatmul.msk.f32.vlgmr.msra.gmra.mxu1 %vm516_vm15, %v1748_v23 }
 0x576   :  { %2979 = vmatmul.msk.f32.vlgmr.msra.gmra.mxu2 %vm516_vm15, %v1748_v23  ;;  %2980 = vmatmul.msk.f32.vlgmr.msra.gmra.mxu3 %vm516_vm15, %v1748_v23 }
 0x577   :  { %2072 = vmatpush.msra.mxu0 %v3996_v57  ;;  %2092 = vmatpush.msra.mxu1 %v4002_v1 }
 0x578   :  { %2112 = vmatpush.msra.mxu2 %v4008_v37  ;;  %2132 = vmatpush.msra.mxu3 %v4014_v42 }
 0x579   :  { %2073 = vmatpush.msra.mxu0 %v4020_v44  ;;  %2093 = vmatpush.msra.mxu1 %v4026_v17 }
 0x57a   :  { %2113 = vmatpush.msra.mxu2 %v4032_v63  ;;  %2133 = vmatpush.msra.mxu3 %v4038_v39 }
 0x57b   :  { %2074 = vmatpush.msra.mxu0 %v4044_v40  ;;  %2094 = vmatpush.msra.mxu1 %v4050_v22 }
 0x57c   :  { %2114 = vmatpush.msra.mxu2 %v4056_v10  ;;  %2134 = vmatpush.msra.mxu3 %v4062_v56 }
 0x57d   :  { %2984 = vmatmul.msk.f32.vlgmr.msrb.gmra.mxu0 %vm348_vm14, %v1743_v35  ;;  %2985 = vmatmul.msk.f32.vlgmr.msrb.gmra.mxu1 %vm348_vm14, %v1743_v35 }
 0x57e   :  { %2986 = vmatmul.msk.f32.vlgmr.msrb.gmra.mxu2 %vm348_vm14, %v1743_v35  ;;  %2987 = vmatmul.msk.f32.vlgmr.msrb.gmra.mxu3 %vm348_vm14, %v1743_v35 }
 0x57f   :  { %2075 = vmatpush.msra.mxu0 %v4072_v11  ;;  %2095 = vmatpush.msra.mxu1 %v4078_v13 }
 0x580   :  { %2115 = vmatpush.msra.mxu2 %v4084_v53  ;;  %2135 = vmatpush.msra.mxu3 %v4090_v54 }
 0x581   :  { %2227 = vmatpush.msrb.mxu0 %v3919_v26  ;;  %2247 = vmatpush.msrb.mxu1 %v3922_v27 }
 0x582   :  { %2267 = vmatpush.msrb.mxu2 %v3925_v29  ;;  %2287 = vmatpush.msrb.mxu3 %v3928_v3 }
 0x583   :  { %2228 = vmatpush.msrb.mxu0 %v3931_v4  ;;  %2248 = vmatpush.msrb.mxu1 %v3934_v7  ;;  %v4454_v7 = vld [vmem:[#allocation16_spill] sm:$0xff] }
 0x584   :  { %2268 = vmatpush.msrb.mxu2 %v3937_v38  ;;  %2288 = vmatpush.msrb.mxu3 %v3940_v8  ;;  %v4455_v38 = vld [vmem:[#allocation17_spill] sm:$0xff] }
 0x5f2   :  { %v1769_v12 = vpop.f32.mrf.mxu0  ;;  %v1789_v60 = vpop.f32.mrf.mxu1 }
 0x5f3   :  { %v1770_v31 = vadd.f32 %v1769_v12, %v3763_v2  ;;  %v1790_v26 = vadd.f32 %v1789_v60, %v3765_v5 }
 0x5f5   :  { %v2981_v58 = vmul.f32 -1.442695, %v1770_v31  ;;  %v2982_v27 = vmul.f32 -1.442695, %v1790_v26 }
 0x5f7   :  { %3179 = vpow2.f32 %v2981_v58 }
 0x5f8   :  { %3181 = vpow2.f32 %v2982_v27  ;;  %v4456_v27 = vld [vmem:[#allocation18_spill] sm:$0xff] }
 0x5f9   :  { %v1829_v29 = vpop.f32.mrf.mxu3  ;;  %v1809_v19 = vpop.f32.mrf.mxu2 }
 0x5fa   :  { %v1830_v3 = vadd.f32 %v1829_v29, %v3769_v0  ;;  %v1922_v4 = vpop.f32.mrf.mxu0  ;;  %v1942_v20 = vpop.f32.mrf.mxu1  ;;  %v1810_v41 = vadd.f32 %v1809_v19, %v3774_v6 }
 0x5fb   :  { %v1985_v49 = vadd.f32 %v1922_v4, %v4454_v7  ;;  %v1986_v45 = vadd.f32 %v1942_v20, %v4455_v38 }
 0x5fc   :  { %v2983_v8 = vmul.f32 -1.442695, %v1830_v3 }
 0x5fd   :  { %v3180_v46 = vpop.eup %3179  ;;  %v2988_v30 = vmul.f32 -1.442695, %v1985_v49  ;;  %v2989_v62 = vmul.f32 -1.442695, %v1986_v45 }
 0x5fe   :  { %v3182_v52 = vpop.eup %3181  ;;  %v1835_v50 = vadd.f32 1.0, %v3180_v46  ;;  %3183 = vpow2.f32 %v2983_v8 }
 0x5ff   :  { %v1854_v16 = vadd.f32 1.0, %v3182_v52  ;;  %3185 = vpow2.f32 %v2988_v30 }
 0x600   :  { %3187 = vrcp.f32 %v1835_v50  ;;  %v1845_v18 = vand.u32 2147483647, %v1835_v50  ;;  %v1847_v59 = vand.u32 2147483648, %v1835_v50  ;;  %vm1841_vm1 = vweird.f32 %v1835_v50 }
 0x601   :  { %3189 = vrcp.f32 %v1854_v16  ;;  %v1866_v21 = vand.u32 2147483648, %v1854_v16  ;;  %v1962_v35 = vpop.f32.mrf.mxu2  ;;  %v1864_v23 = vand.u32 2147483647, %v1854_v16  ;;  %vm1860_vm0 = vweird.f32 %v1854_v16 }
 0x602   :  { %3191 = vpow2.f32 %v2989_v62  ;;  %v1848_v26 = vor.u32 1.1754944e-38, %v1847_v59  ;;  %v1987_v29 = vadd.f32 %v1962_v35, %v4456_v27  ;;  %vm1846_vm4 = vcmp.eq.f32.partialorder %v1845_v18, 8.507059e+37 }
 0x603   :  { %v1867_v4 = vor.u32 1.1754944e-38, %v1866_v21  ;;  %vm1865_vm5 = vcmp.eq.f32.partialorder %v1864_v23, 8.507059e+37 }
 0x604   :  { %v3184_v48 = vpop.eup %3183 }
 0x605   :  { %v3186_v34 = vpop.eup %3185  ;;  %v4184_v43 = vadd.f32 1.0, %v3184_v48 }
 0x606   :  { %v3188_v47 = vpop.eup %3187  ;;  %v4187_v25 = vadd.f32 1.0, %v3186_v34 }
 0x607   :  { %v3190_v14 = vpop.eup %3189  ;;  %v1837_v55 = vmul.f32 %v3188_v47, %v1835_v50  ;;  %3193 = vrcp.f32 %v4184_v43  ;;  %vm1842_vm12 = vweird.f32 %v3188_v47  ;;  %v1884_v59 = vand.u32 2147483647, %v4184_v43 }
 0x608   :  { %v3192_v28 = vpop.eup %3191  ;;  %v1856_v24 = vmul.f32 %v3190_v14, %v1854_v16  ;;  %3195 = vrcp.f32 %v4187_v25  ;;  %vm1861_vm13 = vweird.f32 %v3190_v14  ;;  %vm1843_vm2 = vmor %vm1841_vm1, %vm1842_vm12  ;;  %v2004_v62 = vand.u32 2147483648, %v4187_v25 }
 0x609   :  { %v1838_v61 = vsub.f32 1.0, %v1837_v55  ;;  %v4191_v15 = vadd.f32 1.0, %v3192_v28  ;;  %3197 = vtanh.f32 %v1810_v41  ;;  %vm1862_vm3 = vmor %vm1860_vm0, %vm1861_vm13  ;;  %vm1998_vm6 = vweird.f32 %v4187_v25 }
 0x60a   :  { %v1857_v9 = vsub.f32 1.0, %v1856_v24  ;;  %v1886_v28 = vand.u32 2147483648, %v4184_v43  ;;  %vm1880_vm12 = vweird.f32 %v4184_v43 }
 0x60b   :  { %v1839_v36 = vmul.f32 %v3188_v47, %v1838_v61  ;;  %3199 = vrcp.f32 %v4191_v15  ;;  %v2023_v55 = vand.u32 2147483648, %v4191_v15  ;;  %v2021_v18 = vand.u32 2147483647, %v4191_v15 }
 0x60c   :  { %v1858_v51 = vmul.f32 %v3190_v14, %v1857_v9  ;;  %3201 = vtanh.f32 %v1987_v29  ;;  %vm2017_vm13 = vweird.f32 %v4191_v15 }
 0x60d   :  { %v4194_v12 = vpop.eup %3193  ;;  %v1840_v60 = vadd.f32 %v3188_v47, %v1839_v36 }
 0x60e   :  { %v3196_v31 = vpop.eup %3195  ;;  %v1859_v58 = vadd.f32 %v3190_v14, %v1858_v51  ;;  %v1876_v3 = vmul.f32 %v4194_v12, %v4184_v43  ;;  %vm1881_vm8 = vweird.f32 %v4194_v12  ;;  %v2024_v51 = vor.u32 1.1754944e-38, %v2023_v55 }
 0x60f   :  { %v1844_v20 = vsel %vm1843_vm2, %v3188_v47, %v1840_v60  ;;  %v1994_v7 = vmul.f32 %v3196_v31, %v4187_v25  ;;  %v3198_v49 = vpop.eup %3197  ;;  %vm1999_vm7 = vweird.f32 %v3196_v31  ;;  %v2002_v47 = vand.u32 2147483647, %v4187_v25  ;;  %vm1882_vm0 = vmor %vm1880_vm12, %vm1881_vm8 }
 0x610   :  { %v1849_v38 = vsel %vm1846_vm4, %v1848_v26, %v1844_v20  ;;  %v1863_v45 = vsel %vm1862_vm3, %v3190_v14, %v1859_v58  ;;  %v1877_v8 = vsub.f32 1.0, %v1876_v3  ;;  %vm2000_vm10 = vmor %vm1998_vm6, %vm1999_vm7  ;;  %vm2022_vm2 = vcmp.eq.f32.partialorder %v2021_v18, 8.507059e+37  ;;  %v4457_v20 = vld [vmem:[#allocation19_spill] sm:$0xff] }
 0x611   :  { %v3200_v46 = vpop.eup %3199  ;;  %v1868_v30 = vsel %vm1865_vm5, %v1867_v4, %v1863_v45  ;;  %v1891_v52 = vmul.f32 %v3198_v49, %v1849_v38  ;;  %v1995_v50 = vsub.f32 1.0, %v1994_v7  ;;  %vm2003_vm11 = vcmp.eq.f32.partialorder %v2002_v47, 8.507059e+37 }
 0x612   :  { %v1890_v16 = vmul.f32 %v1868_v30, %v4128_v32  ;;  %v2013_v19 = vmul.f32 %v3200_v46, %v4191_v15  ;;  %v1878_v48 = vmul.f32 %v4194_v12, %v1877_v8  ;;  %v2005_v32 = vor.u32 1.1754944e-38, %v2004_v62  ;;  %v3202_v21 = vpop.eup %3201  ;;  %v1982_v15 = vpop.f32.mrf.mxu3 }
 0x613   :  { %v1996_v34 = vmul.f32 %v3196_v31, %v1995_v50  ;;  %vm2018_vm9 = vweird.f32 %v3200_v46  ;;  %v1887_v58 = vor.u32 1.1754944e-38, %v1886_v28  ;;  %vm1885_vm3 = vcmp.eq.f32.partialorder %v1884_v59, 8.507059e+37 }
 0x614   :  { %v4206_v41 = vadd.f32 %v1891_v52, %v1890_v16  ;;  %v2014_v14 = vsub.f32 1.0, %v2013_v19  ;;  %v1879_v61 = vadd.f32 %v4194_v12, %v1878_v48  ;;  %vm2019_vm1 = vmor %vm2017_vm13, %vm2018_vm9  ;;  %v1988_v7 = vadd.f32 %v1982_v15, %v4457_v20 }
 0x615   :  { %v1997_v24 = vadd.f32 %v3196_v31, %v1996_v34 }
 0x616   :  { %v2015_v9 = vmul.f32 %v3200_v46, %v2014_v14  ;;  %3203 = vtanh.f32 %v4206_v41  ;;  %v1883_v60 = vsel %vm1882_vm0, %v4194_v12, %v1879_v61  ;;  %v2990_v49 = vmul.f32 -1.442695, %v1988_v7  ;;  %v4459_v61 = vld [vmem:[#allocation21_spill] sm:$0xff] }
 0x617   :  { %v2001_v25 = vsel %vm2000_vm10, %v3196_v31, %v1997_v24  ;;  %v1888_v43 = vsel %vm1885_vm3, %v1887_v58, %v1883_v60  ;;  %v4458_v24 = vld [vmem:[#allocation20_spill] sm:$0xff] }
 0x618   :  { %v2006_v36 = vsel %vm2003_vm11, %v2005_v32, %v2001_v25  ;;  %v2016_v35 = vadd.f32 %v3200_v46, %v2015_v9  ;;  %3205 = vpow2.f32 %v2990_v49 }
 0x619   :  { %v2048_v23 = vmul.f32 %v3202_v21, %v2006_v36 }
 0x61a   :  { %v2020_v26 = vsel %vm2019_vm1, %v3200_v46, %v2016_v35 }
 0x61b   :  { %v2025_v31 = vsel %vm2022_vm2, %v2024_v51, %v2020_v26 }
 0x61c   :  { %v3204_v27 = vpop.eup %3203  ;;  %v2047_v29 = vmul.f32 %v2025_v31, %v4141_v33 }
 0x61d   :  { %v1894_v3 = vmul.f32 %v3204_v27, %v1888_v43 }
 0x61e   :  { %v4219_v4 = vadd.f32 %v2048_v23, %v2047_v29  ;;  %v3206_v12 = vpop.eup %3205 }
 0x61f   :  { %2053 = vrot.lane.b32.xlu2 %v1894_v3, %s3400_s5  ;;  %v2031_v38 = vadd.f32 1.0, %v3206_v12 }
 0x621   :  { %3207 = vrcp.f32 %v2031_v38  ;;  %v2043_v52 = vand.u32 2147483648, %v2031_v38  ;;  %vm2037_vm5 = vweird.f32 %v2031_v38  ;;  %v2041_v50 = vand.u32 2147483647, %v2031_v38 }
 0x622   :  { %3209 = vtanh.f32 %v4219_v4 }
 0x623   :  { %v2044_v19 = vor.u32 1.1754944e-38, %v2043_v52  ;;  %vm2042_vm7 = vcmp.eq.f32.partialorder %v2041_v50, 8.507059e+37 }
 0x627   :  { %v3208_v45 = vpop.eup %3207 }
 0x628   :  { %v2033_v8 = vmul.f32 %v3208_v45, %v2031_v38  ;;  %vm2038_vm4 = vweird.f32 %v3208_v45  ;;  %v3210_v16 = vpop.eup %3209 }
 0x629   :  { %vm2039_vm6 = vmor %vm2037_vm5, %vm2038_vm4 }
 0x62a   :  { %v2034_v46 = vsub.f32 1.0, %v2033_v8 }
 0x62c   :  { %v2035_v30 = vmul.f32 %v3208_v45, %v2034_v46 }
 0x62e   :  { %v2036_v33 = vadd.f32 %v3208_v45, %v2035_v30 }
 0x630   :  { %v2040_v62 = vsel %vm2039_vm6, %v3208_v45, %v2036_v33 }
 0x631   :  { %v2045_v48 = vsel %vm2042_vm7, %v2044_v19, %v2040_v62 }
 0x632   :  { %v2051_v34 = vmul.f32 %v3210_v16, %v2045_v48 }
 0x679   :  { %v2054_v47 = vpop.permute.xlu2 %2053 }
 0x67a   :  { %v2056_v14 = vsel %vm348_vm14, %v2051_v34, %v2054_v47  ;;  %v4460_v47 = vld [vmem:[#allocation22_spill] sm:$0xff] }
 0x67b   :  { %2991 = vmatmul.msk.f32.vlgmr.msra.gmra.mxu0 %vm516_vm15, %v2056_v14  ;;  %2992 = vmatmul.msk.f32.vlgmr.msra.gmra.mxu1 %vm516_vm15, %v2056_v14 }
 0x67c   :  { %2993 = vmatmul.msk.f32.vlgmr.msra.gmra.mxu2 %vm516_vm15, %v2056_v14  ;;  %2994 = vmatmul.msk.f32.vlgmr.msra.gmra.mxu3 %vm516_vm15, %v2056_v14 }
 0x67d   :  { %2380 = vmatpush.msra.mxu0 %v3996_v57  ;;  %2400 = vmatpush.msra.mxu1 %v4002_v1  ;;  %v3319_v57 = vld [vmem:[#allocation6 + $0x20] sm:$0xff]  ;;  %v3320_v1 = vld [vmem:[#allocation6 + $0x28] sm:$0xff] }
 0x67e   :  { %2420 = vmatpush.msra.mxu2 %v4008_v37  ;;  %2440 = vmatpush.msra.mxu3 %v4014_v42  ;;  %v3321_v37 = vld [vmem:[#allocation6 + $0x30] sm:$0xff]  ;;  %v3322_v42 = vld [vmem:[#allocation6 + $0x38] sm:$0xff] }
 0x67f   :  { %2381 = vmatpush.msra.mxu0 %v4020_v44  ;;  %2401 = vmatpush.msra.mxu1 %v4026_v17  ;;  %v3323_v44 = vld [vmem:[#allocation6] sm:$0xff]  ;;  %v3324_v17 = vld [vmem:[#allocation6 + $0x8] sm:$0xff] }
 0x680   :  { %2421 = vmatpush.msra.mxu2 %v4032_v63  ;;  %2441 = vmatpush.msra.mxu3 %v4038_v39  ;;  %v3325_v63 = vld [vmem:[#allocation6 + $0x10] sm:$0xff]  ;;  %v3326_v39 = vld [vmem:[#allocation6 + $0x18] sm:$0xff] }
 0x681   :  { %2382 = vmatpush.msra.mxu0 %v4044_v40  ;;  %2402 = vmatpush.msra.mxu1 %v4050_v22 }
 0x682   :  { %2422 = vmatpush.msra.mxu2 %v4056_v10  ;;  %2442 = vmatpush.msra.mxu3 %v4062_v56 }
 0x683   :  { %2998 = vmatmul.msk.f32.vlgmr.msrb.gmra.mxu0 %vm348_vm14, %v2051_v34  ;;  %2999 = vmatmul.msk.f32.vlgmr.msrb.gmra.mxu1 %vm348_vm14, %v2051_v34 }
 0x684   :  { %3000 = vmatmul.msk.f32.vlgmr.msrb.gmra.mxu2 %vm348_vm14, %v2051_v34  ;;  %3001 = vmatmul.msk.f32.vlgmr.msrb.gmra.mxu3 %vm348_vm14, %v2051_v34 }
 0x685   :  { %2383 = vmatpush.msra.mxu0 %v4072_v11  ;;  %2403 = vmatpush.msra.mxu1 %v4078_v13 }
 0x686   :  { %2423 = vmatpush.msra.mxu2 %v4084_v53  ;;  %2443 = vmatpush.msra.mxu3 %v4090_v54 }
 0x687   :  { %2535 = vmatpush.msrb.mxu0 %v3319_v57  ;;  %2555 = vmatpush.msrb.mxu1 %v3320_v1 }
 0x688   :  { %2575 = vmatpush.msrb.mxu2 %v3321_v37  ;;  %2595 = vmatpush.msrb.mxu3 %v3322_v42 }
 0x689   :  { %2536 = vmatpush.msrb.mxu0 %v3323_v44  ;;  %2556 = vmatpush.msrb.mxu1 %v3324_v17 }
 0x68a   :  { %2576 = vmatpush.msrb.mxu2 %v3325_v63  ;;  %2596 = vmatpush.msrb.mxu3 %v3326_v39 }
 0x6f8   :  { %v2077_v40 = vpop.f32.mrf.mxu0  ;;  %v2097_v22 = vpop.f32.mrf.mxu1 }
 0x6f9   :  { %v2078_v10 = vadd.f32 %v2077_v40, %v3763_v2  ;;  %v2098_v56 = vadd.f32 %v2097_v22, %v3765_v5 }
 0x6fb   :  { %v2995_v11 = vmul.f32 -1.442695, %v2078_v10  ;;  %v2996_v13 = vmul.f32 -1.442695, %v2098_v56 }
 0x6fd   :  { %3211 = vpow2.f32 %v2995_v11 }
 0x6fe   :  { %3213 = vpow2.f32 %v2996_v13 }
 0x6ff   :  { %v2137_v53 = vpop.f32.mrf.mxu3  ;;  %v2117_v23 = vpop.f32.mrf.mxu2 }
 0x700   :  { %v2138_v54 = vadd.f32 %v2137_v53, %v3769_v0  ;;  %v2230_v55 = vpop.f32.mrf.mxu0  ;;  %v2250_v28 = vpop.f32.mrf.mxu1  ;;  %v2118_v27 = vadd.f32 %v2117_v23, %v3774_v6 }
 0x701   :  { %v2293_v32 = vadd.f32 %v2230_v55, %v4458_v24  ;;  %v2294_v9 = vadd.f32 %v2250_v28, %v4459_v61 }
 0x702   :  { %v2997_v18 = vmul.f32 -1.442695, %v2138_v54 }
 0x703   :  { %v3212_v25 = vpop.eup %3211  ;;  %v3002_v59 = vmul.f32 -1.442695, %v2293_v32  ;;  %v3003_v35 = vmul.f32 -1.442695, %v2294_v9 }
 0x704   :  { %v3214_v21 = vpop.eup %3213  ;;  %v2143_v36 = vadd.f32 1.0, %v3212_v25  ;;  %3215 = vpow2.f32 %v2997_v18 }
 0x705   :  { %v2162_v51 = vadd.f32 1.0, %v3214_v21  ;;  %3217 = vpow2.f32 %v3002_v59 }
 0x706   :  { %3219 = vrcp.f32 %v2143_v36  ;;  %v2153_v38 = vand.u32 2147483647, %v2143_v36  ;;  %v2155_v45 = vand.u32 2147483648, %v2143_v36  ;;  %vm2149_vm11 = vweird.f32 %v2143_v36 }
 0x707   :  { %3221 = vrcp.f32 %v2162_v51  ;;  %v2174_v8 = vand.u32 2147483648, %v2162_v51  ;;  %v2270_v30 = vpop.f32.mrf.mxu2  ;;  %v2172_v52 = vand.u32 2147483647, %v2162_v51  ;;  %vm2168_vm10 = vweird.f32 %v2162_v51 }
 0x708   :  { %3223 = vpow2.f32 %v3003_v35  ;;  %v2156_v19 = vor.u32 1.1754944e-38, %v2155_v45  ;;  %v2295_v14 = vadd.f32 %v2270_v30, %v4460_v47  ;;  %vm2154_vm0 = vcmp.eq.f32.partialorder %v2153_v38, 8.507059e+37 }
 0x709   :  { %v2175_v57 = vor.u32 1.1754944e-38, %v2174_v8  ;;  %vm2173_vm1 = vcmp.eq.f32.partialorder %v2172_v52, 8.507059e+37 }
 0x70a   :  { %v3216_v60 = vpop.eup %3215 }
 0x70b   :  { %v3218_v26 = vpop.eup %3217  ;;  %v4254_v58 = vadd.f32 1.0, %v3216_v60 }
 0x70c   :  { %v3220_v31 = vpop.eup %3219  ;;  %v4257_v29 = vadd.f32 1.0, %v3218_v26 }
 0x70d   :  { %v3222_v43 = vpop.eup %3221  ;;  %v2145_v3 = vmul.f32 %v3220_v31, %v2143_v36  ;;  %3225 = vrcp.f32 %v4254_v58  ;;  %vm2150_vm8 = vweird.f32 %v3220_v31  ;;  %v2194_v61 = vand.u32 2147483648, %v4254_v58 }
 0x70e   :  { %v3224_v15 = vpop.eup %3223  ;;  %v2164_v20 = vmul.f32 %v3222_v43, %v2162_v51  ;;  %3227 = vrcp.f32 %v4257_v29  ;;  %vm2169_vm9 = vweird.f32 %v3222_v43  ;;  %vm2151_vm12 = vmor %vm2149_vm11, %vm2150_vm8  ;;  %v2312_v56 = vand.u32 2147483648, %v4257_v29 }
 0x70f   :  { %v2146_v7 = vsub.f32 1.0, %v2145_v3  ;;  %v4261_v49 = vadd.f32 1.0, %v3224_v15  ;;  %3229 = vtanh.f32 %v2118_v27  ;;  %vm2170_vm13 = vmor %vm2168_vm10, %vm2169_vm9  ;;  %vm2306_vm2 = vweird.f32 %v4257_v29 }
 0x710   :  { %v2165_v12 = vsub.f32 1.0, %v2164_v20  ;;  %v2310_v55 = vand.u32 2147483647, %v4257_v29  ;;  %vm2188_vm8 = vweird.f32 %v4254_v58  ;;  %v2192_v36 = vand.u32 2147483647, %v4254_v58 }
 0x711   :  { %v2147_v46 = vmul.f32 %v3220_v31, %v2146_v7  ;;  %3231 = vrcp.f32 %v4261_v49  ;;  %v2331_v32 = vand.u32 2147483648, %v4261_v49  ;;  %v2329_v59 = vand.u32 2147483647, %v4261_v49 }
 0x712   :  { %v2166_v33 = vmul.f32 %v3222_v43, %v2165_v12  ;;  %3233 = vtanh.f32 %v2295_v14  ;;  %vm2311_vm7 = vcmp.eq.f32.partialorder %v2310_v55, 8.507059e+37  ;;  %vm2325_vm9 = vweird.f32 %v4261_v49  ;;  %v4461_v12 = vld [vmem:[#allocation23_spill] sm:$0xff] }
 0x713   :  { %v4264_v50 = vpop.eup %3225  ;;  %v2148_v62 = vadd.f32 %v3220_v31, %v2147_v46  ;;  %v2332_v60 = vor.u32 1.1754944e-38, %v2331_v32  ;;  %v3341_v55 = vld [vmem:[%s4425_s4 + $0x10] sm:$0xff] }
 0x714   :  { %v3228_v16 = vpop.eup %3227  ;;  %v2167_v48 = vadd.f32 %v3222_v43, %v2166_v33  ;;  %v2184_v34 = vmul.f32 %v4264_v50, %v4254_v58  ;;  %vm2189_vm4 = vweird.f32 %v4264_v50 }
 0x715   :  { %v2152_v1 = vsel %vm2151_vm12, %v3220_v31, %v2148_v62  ;;  %v2302_v37 = vmul.f32 %v3228_v16, %v4257_v29  ;;  %v3230_v42 = vpop.eup %3229  ;;  %vm2307_vm3 = vweird.f32 %v3228_v16  ;;  %vm2190_vm10 = vmor %vm2188_vm8, %vm2189_vm4  ;;  %vm2330_vm12 = vcmp.eq.f32.partialorder %v2329_v59, 8.507059e+37 }
 0x716   :  { %v2157_v44 = vsel %vm2154_vm0, %v2156_v19, %v2152_v1  ;;  %v2171_v17 = vsel %vm2170_vm13, %v3222_v43, %v2167_v48  ;;  %v2185_v63 = vsub.f32 1.0, %v2184_v34  ;;  %vm2308_vm6 = vmor %vm2306_vm2, %vm2307_vm3  ;;  %v2195_v29 = vor.u32 1.1754944e-38, %v2194_v61 }
 0x717   :  { %v3232_v39 = vpop.eup %3231  ;;  %v2176_v40 = vsel %vm2173_vm1, %v2175_v57, %v2171_v17  ;;  %v2199_v22 = vmul.f32 %v3230_v42, %v2157_v44  ;;  %v2303_v10 = vsub.f32 1.0, %v2302_v37  ;;  %vm2193_vm13 = vcmp.eq.f32.partialorder %v2192_v36, 8.507059e+37  ;;  %v3327_v37 = vld [vmem:[%s4425_s4 + $0x60] sm:$0xff]  ;;  %v3328_v42 = vld [vmem:[%s4425_s4 + $0x68] sm:$0xff]  ;;  %v3329_v44 = vld [vmem:[%s4425_s4 + $0x70] sm:$0xff] }
 0x718   :  { %v2198_v11 = vmul.f32 %v2176_v40, %v4206_v41  ;;  %v2321_v13 = vmul.f32 %v3232_v39, %v4261_v49  ;;  %v2186_v53 = vmul.f32 %v4264_v50, %v2185_v63  ;;  %v2313_v41 = vor.u32 1.1754944e-38, %v2312_v56  ;;  %v3234_v35 = vpop.eup %3233  ;;  %v2290_v49 = vpop.f32.mrf.mxu3  ;;  %v3330_v17 = vld [vmem:[%s4425_s4 + $0x78] sm:$0xff]  ;;  %v3331_v63 = vld [vmem:[%s4425_s4 + $0x40] sm:$0xff]  ;;  %v3333_v40 = vld [vmem:[%s4425_s4 + $0x50] sm:$0xff] }
 0x719   :  { %v2304_v54 = vmul.f32 %v3228_v16, %v2303_v10  ;;  %vm2326_vm5 = vweird.f32 %v3232_v39  ;;  %v2296_v38 = vadd.f32 %v2290_v49, %v4461_v12  ;;  %v3335_v10 = vld [vmem:[%s4425_s4 + $0x20] sm:$0xff]  ;;  %v3336_v56 = vld [vmem:[%s4425_s4 + $0x28] sm:$0xff] }
 0x71a   :  { %v4276_v28 = vadd.f32 %v2199_v22, %v2198_v11  ;;  %v2322_v24 = vsub.f32 1.0, %v2321_v13  ;;  %v2187_v18 = vadd.f32 %v4264_v50, %v2186_v53  ;;  %vm2327_vm11 = vmor %vm2325_vm9, %vm2326_vm5  ;;  %v3334_v22 = vld [vmem:[%s4425_s4 + $0x58] sm:$0xff]  ;;  %v3337_v11 = vld [vmem:[%s4425_s4 + $0x30] sm:$0xff] }
 0x71b   :  { %v2305_v9 = vadd.f32 %v3228_v16, %v2304_v54  ;;  %v3004_v45 = vmul.f32 -1.442695, %v2296_v38  ;;  %v3338_v13 = vld [vmem:[%s4425_s4 + $0x38] sm:$0xff]  ;;  %v3339_v53 = vld [vmem:[%s4425_s4] sm:$0xff]  ;;  %v3340_v54 = vld [vmem:[%s4425_s4 + $0x8] sm:$0xff] }
 0x71c   :  { %v2323_v25 = vmul.f32 %v3232_v39, %v2322_v24  ;;  %3235 = vtanh.f32 %v4276_v28  ;;  %v2191_v31 = vsel %vm2190_vm10, %v4264_v50, %v2187_v18  ;;  %v3342_v24 = vld [vmem:[%s4425_s4 + $0x18] sm:$0xff]  ;;  %v4464_v38 = vld [vmem:[#allocation27_spill] sm:$0xff] }
 0x71d   :  { %v2309_v21 = vsel %vm2308_vm6, %v3228_v16, %v2305_v9  ;;  %v2196_v58 = vsel %vm2193_vm13, %v2195_v29, %v2191_v31  ;;  %3237 = vpow2.f32 %v3004_v45 }
 0x71e   :  { %v2314_v51 = vsel %vm2311_vm7, %v2313_v41, %v2309_v21  ;;  %v2324_v23 = vadd.f32 %v3232_v39, %v2323_v25 }
 0x71f   :  { %v2356_v26 = vmul.f32 %v3234_v35, %v2314_v51  ;;  %v4462_v51 = vld [vmem:[#allocation24_spill] sm:$0xff] }
 0x720   :  { %v2328_v27 = vsel %vm2327_vm11, %v3232_v39, %v2324_v23  ;;  %v3332_v39 = vld [vmem:[%s4425_s4 + $0x48] sm:$0xff] }
 0x721   :  { %v2333_v43 = vsel %vm2330_vm12, %v2332_v60, %v2328_v27  ;;  %v4463_v60 = vld [vmem:[#allocation25_spill] sm:$0xff] }
 0x722   :  { %v3236_v3 = vpop.eup %3235  ;;  %v2355_v15 = vmul.f32 %v2333_v43, %v4219_v4 }
 0x723   :  { %v2202_v20 = vmul.f32 %v3236_v3, %v2196_v58  ;;  %v3238_v8 = vpop.eup %3237 }
 0x724   :  { %v4289_v7 = vadd.f32 %v2356_v26, %v2355_v15  ;;  %v2339_v46 = vadd.f32 1.0, %v3238_v8 }
 0x725   :  { %2361 = vrot.lane.b32.xlu2 %v2202_v20, %s3400_s5 }
 0x726   :  { %3239 = vrcp.f32 %v2339_v46  ;;  %v2351_v62 = vand.u32 2147483648, %v2339_v46  ;;  %vm2345_vm1 = vweird.f32 %v2339_v46  ;;  %v2349_v16 = vand.u32 2147483647, %v2339_v46 }
 0x727   :  { %3241 = vtanh.f32 %v4289_v7 }
 0x728   :  { %v2352_v34 = vor.u32 1.1754944e-38, %v2351_v62  ;;  %vm2350_vm3 = vcmp.eq.f32.partialorder %v2349_v16, 8.507059e+37 }
 0x72c   :  { %v3240_v30 = vpop.eup %3239 }
 0x72d   :  { %v2341_v33 = vmul.f32 %v3240_v30, %v2339_v46  ;;  %vm2346_vm0 = vweird.f32 %v3240_v30  ;;  %v3242_v48 = vpop.eup %3241 }
 0x72e   :  { %vm2347_vm2 = vmor %vm2345_vm1, %vm2346_vm0 }
 0x72f   :  { %v2342_v52 = vsub.f32 1.0, %v2341_v33 }
 0x731   :  { %v2343_v50 = vmul.f32 %v3240_v30, %v2342_v52 }
 0x733   :  { %v2344_v4 = vadd.f32 %v3240_v30, %v2343_v50 }
 0x735   :  { %v2348_v19 = vsel %vm2347_vm2, %v3240_v30, %v2344_v4 }
 0x736   :  { %v2353_v47 = vsel %vm2350_vm3, %v2352_v34, %v2348_v19 }
 0x737   :  { %v2359_v14 = vmul.f32 %v3242_v48, %v2353_v47 }
 0x77f   :  { %v2362_v57 = vpop.permute.xlu2 %2361 }
 0x780   :  { %v2364_v1 = vsel %vm348_vm14, %v2359_v14, %v2362_v57 }
 0x781   :  { %3005 = vmatmul.msk.f32.vlgmr.msra.gmra.mxu0 %vm516_vm15, %v2364_v1  ;;  %3006 = vmatmul.msk.f32.vlgmr.msra.gmra.mxu1 %vm516_vm15, %v2364_v1 }
 0x782   :  { %3007 = vmatmul.msk.f32.vlgmr.msra.gmra.mxu2 %vm516_vm15, %v2364_v1  ;;  %3008 = vmatmul.msk.f32.vlgmr.msra.gmra.mxu3 %vm516_vm15, %v2364_v1 }
 0x783   :  { %2688 = vmatpush.msra.mxu0 %v3327_v37  ;;  %2708 = vmatpush.msra.mxu1 %v3328_v42 }
 0x784   :  { %2728 = vmatpush.msra.mxu2 %v3329_v44  ;;  %2748 = vmatpush.msra.mxu3 %v3330_v17  ;;  %v4465_v17 = vld [vmem:[#allocation26_spill] sm:$0xff] }
 0x785   :  { %2689 = vmatpush.msra.mxu0 %v3331_v63  ;;  %2709 = vmatpush.msra.mxu1 %v3332_v39 }
 0x786   :  { %2729 = vmatpush.msra.mxu2 %v3333_v40  ;;  %2749 = vmatpush.msra.mxu3 %v3334_v22 }
 0x787   :  { %2690 = vmatpush.msra.mxu0 %v3335_v10  ;;  %2710 = vmatpush.msra.mxu1 %v3336_v56 }
 0x788   :  { %2730 = vmatpush.msra.mxu2 %v3337_v11  ;;  %2750 = vmatpush.msra.mxu3 %v3338_v13 }
 0x789   :  { %3012 = vmatmul.msk.f32.vlgmr.msrb.gmra.mxu0 %vm348_vm14, %v2359_v14  ;;  %3013 = vmatmul.msk.f32.vlgmr.msrb.gmra.mxu1 %vm348_vm14, %v2359_v14 }
 0x78a   :  { %3014 = vmatmul.msk.f32.vlgmr.msrb.gmra.mxu2 %vm348_vm14, %v2359_v14  ;;  %3015 = vmatmul.msk.f32.vlgmr.msrb.gmra.mxu3 %vm348_vm14, %v2359_v14 }
 0x78b   :  { %2691 = vmatpush.msra.mxu0 %v3339_v53  ;;  %2711 = vmatpush.msra.mxu1 %v3340_v54 }
 0x78c   :  { %2731 = vmatpush.msra.mxu2 %v3341_v55  ;;  %2751 = vmatpush.msra.mxu3 %v3342_v24 }
 0x7fe   :  { %v2385_v32 = vpop.f32.mrf.mxu0  ;;  %v2405_v61 = vpop.f32.mrf.mxu1 }
 0x7ff   :  { %v2386_v9 = vadd.f32 %v2385_v32, %v3763_v2  ;;  %v2406_v41 = vadd.f32 %v2405_v61, %v3765_v5 }
 0x801   :  { %v3009_v18 = vmul.f32 -1.442695, %v2386_v9  ;;  %v3010_v25 = vmul.f32 -1.442695, %v2406_v41 }
 0x803   :  { %3243 = vpow2.f32 %v3009_v18 }
 0x804   :  { %3245 = vpow2.f32 %v3010_v25 }
 0x805   :  { %v2445_v59 = vpop.f32.mrf.mxu3  ;;  %v2425_v15 = vpop.f32.mrf.mxu2 }
 0x806   :  { %v2446_v21 = vadd.f32 %v2445_v59, %v3769_v0  ;;  %v2538_v36 = vpop.f32.mrf.mxu0  ;;  %v2558_v35 = vpop.f32.mrf.mxu1  ;;  %v2426_v12 = vadd.f32 %v2425_v15, %v3774_v6 }
 0x807   :  { %v2601_v23 = vadd.f32 %v2538_v36, %v4462_v51  ;;  %v2602_v26 = vadd.f32 %v2558_v35, %v4463_v60 }
 0x808   :  { %v3011_v31 = vmul.f32 -1.442695, %v2446_v21 }
 0x809   :  { %v3244_v27 = vpop.eup %3243  ;;  %v3016_v29 = vmul.f32 -1.442695, %v2601_v23  ;;  %v3017_v58 = vmul.f32 -1.442695, %v2602_v26 }
 0x80a   :  { %v3246_v43 = vpop.eup %3245  ;;  %v2451_v3 = vadd.f32 1.0, %v3244_v27  ;;  %3247 = vpow2.f32 %v3011_v31 }
 0x80b   :  { %v2470_v20 = vadd.f32 1.0, %v3246_v43  ;;  %3249 = vpow2.f32 %v3016_v29 }
 0x80c   :  { %3251 = vrcp.f32 %v2451_v3  ;;  %v2461_v47 = vand.u32 2147483647, %v2451_v3  ;;  %v2463_v14 = vand.u32 2147483648, %v2451_v3  ;;  %vm2457_vm7 = vweird.f32 %v2451_v3 }
 0x80d   :  { %3253 = vrcp.f32 %v2470_v20  ;;  %v2598_v49 = vpop.f32.mrf.mxu3  ;;  %v2578_v48 = vpop.f32.mrf.mxu2  ;;  %v2482_v37 = vand.u32 2147483648, %v2470_v20  ;;  %v2480_v42 = vand.u32 2147483647, %v2470_v20  ;;  %vm2476_vm6 = vweird.f32 %v2470_v20 }
 0x80e   :  { %3255 = vpow2.f32 %v3017_v58  ;;  %v2604_v45 = vadd.f32 %v2598_v49, %v4464_v38  ;;  %v2603_v63 = vadd.f32 %v2578_v48, %v4465_v17  ;;  %vm2462_vm8 = vcmp.eq.f32.partialorder %v2461_v47, 8.507059e+37 }
 0x80f   :  { %3257 = vtanh.f32 %v2426_v12  ;;  %v2483_v11 = vor.u32 1.1754944e-38, %v2482_v37  ;;  %v2464_v13 = vor.u32 1.1754944e-38, %v2463_v14  ;;  %vm2481_vm11 = vcmp.eq.f32.partialorder %v2480_v42, 8.507059e+37 }
 0x810   :  { %v3248_v8 = vpop.eup %3247  ;;  %v3018_v50 = vmul.f32 -1.442695, %v2604_v45 }
 0x811   :  { %v3250_v46 = vpop.eup %3249  ;;  %v4358_v30 = vadd.f32 1.0, %v3248_v8 }
 0x812   :  { %v3252_v33 = vpop.eup %3251  ;;  %v4360_v52 = vadd.f32 1.0, %v3250_v46 }
 0x813   :  { %v3254_v4 = vpop.eup %3253  ;;  %v2453_v62 = vmul.f32 %v3252_v33, %v2451_v3  ;;  %3259 = vrcp.f32 %v4358_v30  ;;  %vm2458_vm4 = vweird.f32 %v3252_v33  ;;  %v2502_v3 = vand.u32 2147483648, %v4358_v30 }
 0x814   :  { %v3256_v16 = vpop.eup %3255  ;;  %v2472_v19 = vmul.f32 %v3254_v4, %v2470_v20  ;;  %3261 = vrcp.f32 %v4360_v52  ;;  %vm2477_vm5 = vweird.f32 %v3254_v4  ;;  %vm2459_vm9 = vmor %vm2457_vm7, %vm2458_vm4  ;;  %v2620_v41 = vand.u32 2147483648, %v4360_v52 }
 0x815   :  { %v2454_v34 = vsub.f32 1.0, %v2453_v62  ;;  %v4364_v57 = vadd.f32 1.0, %v3256_v16  ;;  %3263 = vpow2.f32 %v3018_v50  ;;  %v3258_v39 = vpop.eup %3257  ;;  %vm2478_vm10 = vmor %vm2476_vm6, %vm2477_vm5  ;;  %vm2614_vm12 = vweird.f32 %v4360_v52 }
 0x816   :  { %v2473_v1 = vsub.f32 1.0, %v2472_v19  ;;  %v2618_v31 = vand.u32 2147483647, %v4360_v52  ;;  %v2621_v58 = vor.u32 1.1754944e-38, %v2620_v41  ;;  %vm2496_vm4 = vweird.f32 %v4358_v30 }
 0x817   :  { %v2455_v44 = vmul.f32 %v3252_v33, %v2454_v34  ;;  %3265 = vrcp.f32 %v4364_v57  ;;  %v2639_v43 = vand.u32 2147483648, %v4364_v57  ;;  %v2637_v12 = vand.u32 2147483647, %v4364_v57 }
 0x818   :  { %v2474_v40 = vmul.f32 %v3254_v4, %v2473_v1  ;;  %3267 = vtanh.f32 %v2603_v63  ;;  %vm2619_vm3 = vcmp.eq.f32.partialorder %v2618_v31, 8.507059e+37  ;;  %v2500_v45 = vand.u32 2147483647, %v4358_v30 }
 0x819   :  { %v4368_v22 = vpop.eup %3259  ;;  %v2456_v10 = vadd.f32 %v3252_v33, %v2455_v44  ;;  %vm2633_vm5 = vweird.f32 %v4364_v57  ;;  %v2640_v50 = vor.u32 1.1754944e-38, %v2639_v43 }
 0x81a   :  { %v3262_v56 = vpop.eup %3261  ;;  %v2475_v53 = vadd.f32 %v3254_v4, %v2474_v40  ;;  %v2492_v54 = vmul.f32 %v4368_v22, %v4358_v30  ;;  %vm2497_vm0 = vweird.f32 %v4368_v22  ;;  %v2503_v30 = vor.u32 1.1754944e-38, %v2502_v3 }
 0x81b   :  { %v2460_v55 = vsel %vm2459_vm9, %v3252_v33, %v2456_v10  ;;  %v2610_v24 = vmul.f32 %v3262_v56, %v4360_v52  ;;  %v3264_v32 = vpop.eup %3263  ;;  %vm2615_vm13 = vweird.f32 %v3262_v56  ;;  %vm4392_vm6 = vmor %vm2496_vm4, %vm2497_vm0  ;;  %vm2501_vm9 = vcmp.eq.f32.partialorder %v2500_v45, 8.507059e+37 }
 0x81c   :  { %v2465_v61 = vsel %vm2462_vm8, %v2464_v13, %v2460_v55  ;;  %v2479_v9 = vsel %vm2478_vm10, %v3254_v4, %v2475_v53  ;;  %v2493_v18 = vsub.f32 1.0, %v2492_v54  ;;  %v2647_v35 = vadd.f32 1.0, %v3264_v32  ;;  %vm2616_vm2 = vmor %vm2614_vm12, %vm2615_vm13 }
 0x81d   :  { %v3266_v25 = vpop.eup %3265  ;;  %v2484_v59 = vsel %vm2481_vm11, %v2483_v11, %v2479_v9  ;;  %v2507_v21 = vmul.f32 %v3258_v39, %v2465_v61  ;;  %v2611_v36 = vsub.f32 1.0, %v2610_v24  ;;  %vm2638_vm8 = vcmp.eq.f32.partialorder %v2637_v12, 8.507059e+37  ;;  %v2820_v61 = vld [vmem:[%s4427_s6 + $0x8] sm:$0xff]  ;;  %v2819_v9 = vld [vmem:[%s4427_s6] sm:$0xff] }
 0x81e   :  { %v2506_v51 = vmul.f32 %v2484_v59, %v4276_v28  ;;  %v2629_v23 = vmul.f32 %v3266_v25, %v4364_v57  ;;  %v2494_v60 = vmul.f32 %v4368_v22, %v2493_v18  ;;  %3269 = vrcp.f32 %v2647_v35  ;;  %v3268_v15 = vpop.eup %3267  ;;  %2842 = vmatpush.msrb.mxu0 %v2820_v61 }
 0x81f   :  { %v2612_v26 = vmul.f32 %v3262_v56, %v2611_v36  ;;  %vm2634_vm1 = vweird.f32 %v3266_v25  ;;  %v2659_v17 = vand.u32 2147483648, %v2647_v35  ;;  %vm2653_vm11 = vweird.f32 %v2647_v35 }
 0x820   :  { %v4379_v27 = vadd.f32 %v2507_v21, %v2506_v51  ;;  %v2630_v29 = vsub.f32 1.0, %v2629_v23  ;;  %v2495_v20 = vadd.f32 %v4368_v22, %v2494_v60  ;;  %vm2635_vm7 = vmor %vm2633_vm5, %vm2634_vm1  ;;  %v2657_v63 = vand.u32 2147483647, %v2647_v35  ;;  %2843 = vmatpush.msrb.mxu0 %v2819_v9 }
 0x821   :  { %v2613_v28 = vadd.f32 %v3262_v56, %v2612_v26  ;;  %v2660_v40 = vor.u32 1.1754944e-38, %v2659_v17 }
 0x822   :  { %v2631_v49 = vmul.f32 %v3266_v25, %v2630_v29  ;;  %3271 = vtanh.f32 %v4379_v27  ;;  %v2499_v62 = vsel %vm4392_vm6, %v4368_v22, %v2495_v20  ;;  %vm2658_vm13 = vcmp.eq.f32.partialorder %v2657_v63, 8.507059e+37  ;;  %v3034_v63 = vld [vmem:[#allocation3] ss:$0 sm:$0xff] }
 0x823   :  { %v2617_v38 = vsel %vm2616_vm2, %v3262_v56, %v2613_v28  ;;  %v2504_v57 = vsel %vm2501_vm9, %v2503_v30, %v2499_v62 }
 0x824   :  { %v2622_v8 = vsel %vm2619_vm3, %v2621_v58, %v2617_v38  ;;  %v2632_v46 = vadd.f32 %v3266_v25, %v2631_v49  ;;  %v3270_v52 = vpop.eup %3269 }
 0x825   :  { %v2664_v4 = vmul.f32 %v3268_v15, %v2622_v8  ;;  %v2649_v19 = vmul.f32 %v3270_v52, %v2647_v35  ;;  %vm2654_vm10 = vweird.f32 %v3270_v52 }
 0x826   :  { %v2636_v16 = vsel %vm2635_vm7, %v3266_v25, %v2632_v46  ;;  %vm2655_vm12 = vmor %vm2653_vm11, %vm2654_vm10 }
 0x827   :  { %v2641_v48 = vsel %vm2638_vm8, %v2640_v50, %v2636_v16  ;;  %v2650_v14 = vsub.f32 1.0, %v2649_v19 }
 0x828   :  { %v3272_v34 = vpop.eup %3271  ;;  %v2663_v47 = vmul.f32 %v2641_v48, %v4289_v7 }
 0x829   :  { %v2510_v1 = vmul.f32 %v3272_v34, %v2504_v57  ;;  %v2651_v42 = vmul.f32 %v3270_v52, %v2650_v14 }
 0x82a   :  { %v2665_v37 = vadd.f32 %v2664_v4, %v2663_v47 }
 0x82b   :  { %2669 = vrot.lane.b32.xlu0 %v2510_v1, %s3400_s5  ;;  %v2652_v44 = vadd.f32 %v3270_v52, %v2651_v42 }
 0x82c   :  { %3273 = vtanh.f32 %v2665_v37 }
 0x82d   :  { %v2656_v39 = vsel %vm2655_vm12, %v3270_v52, %v2652_v44 }
 0x82e   :  { %v2661_v10 = vsel %vm2658_vm13, %v2660_v40, %v2656_v39 }
 0x832   :  { %v3274_v22 = vpop.eup %3273 }
 0x833   :  { %v2667_v7 = vmul.f32 %v3274_v22, %v2661_v10 }
 0x89d   :  { %v2670_v56 = vpop.permute.xlu0 %2669 }
 0x89e   :  { %v2672_v11 = vsel %vm348_vm14, %v2667_v7, %v2670_v56 }
 0x89f   :  { %3019 = vmatmul.msk.f32.vlgmr.msra.gmra.mxu0 %vm516_vm15, %v2672_v11  ;;  %3020 = vmatmul.msk.f32.vlgmr.msra.gmra.mxu1 %vm516_vm15, %v2672_v11 }
 0x8a0   :  { %3021 = vmatmul.msk.f32.vlgmr.msra.gmra.mxu2 %vm516_vm15, %v2672_v11  ;;  %3022 = vmatmul.msk.f32.vlgmr.msra.gmra.mxu3 %vm516_vm15, %v2672_v11 }
 0x91c   :  { %v2693_v13 = vpop.f32.mrf.mxu0  ;;  %v2713_v53 = vpop.f32.mrf.mxu1 }
 0x91d   :  { %v2694_v54 = vadd.f32 %v2693_v13, %v3763_v2  ;;  %v2714_v55 = vadd.f32 %v2713_v53, %v3765_v5 }
 0x91f   :  { %v3023_v24 = vmul.f32 -1.442695, %v2694_v54  ;;  %v3024_v32 = vmul.f32 -1.442695, %v2714_v55 }
 0x921   :  { %3275 = vpow2.f32 %v3023_v24 }
 0x922   :  { %3277 = vpow2.f32 %v3024_v32 }
 0x923   :  { %v2753_v41 = vpop.f32.mrf.mxu3  ;;  %v2733_v36 = vpop.f32.mrf.mxu2 }
 0x924   :  { %v2754_v18 = vadd.f32 %v2753_v41, %v3769_v0  ;;  %v2734_v60 = vadd.f32 %v2733_v36, %v3774_v6 }
 0x926   :  { %v3025_v2 = vmul.f32 -1.442695, %v2754_v18 }
 0x927   :  { %v3276_v25 = vpop.eup %3275 }
 0x928   :  { %v3278_v5 = vpop.eup %3277  ;;  %v2759_v59 = vadd.f32 1.0, %v3276_v25  ;;  %3279 = vpow2.f32 %v3025_v2 }
 0x929   :  { %v2778_v21 = vadd.f32 1.0, %v3278_v5 }
 0x92a   :  { %3281 = vrcp.f32 %v2759_v59  ;;  %v2771_v3 = vand.u32 2147483648, %v2759_v59  ;;  %v2769_v58 = vand.u32 2147483647, %v2759_v59  ;;  %vm2765_vm1 = vweird.f32 %v2759_v59 }
 0x92b   :  { %3283 = vrcp.f32 %v2778_v21  ;;  %v2790_v15 = vand.u32 2147483648, %v2778_v21  ;;  %v2788_v49 = vand.u32 2147483647, %v2778_v21  ;;  %vm2784_vm2 = vweird.f32 %v2778_v21 }
 0x92c   :  { %v2772_v6 = vor.u32 1.1754944e-38, %v2771_v3  ;;  %vm2770_vm5 = vcmp.eq.f32.partialorder %v2769_v58, 8.507059e+37 }
 0x92d   :  { %v2791_v46 = vor.u32 1.1754944e-38, %v2790_v15  ;;  %vm2789_vm6 = vcmp.eq.f32.partialorder %v2788_v49, 8.507059e+37 }
 0x92e   :  { %v3280_v35 = vpop.eup %3279 }
 0x92f   :  { %v2798_v51 = vadd.f32 1.0, %v3280_v35 }
 0x930   :  { %v3282_v23 = vpop.eup %3281 }
 0x931   :  { %v3284_v26 = vpop.eup %3283  ;;  %v2761_v31 = vmul.f32 %v3282_v23, %v2759_v59  ;;  %3285 = vrcp.f32 %v2798_v51  ;;  %vm2766_vm15 = vweird.f32 %v3282_v23  ;;  %v2810_v14 = vand.u32 2147483648, %v2798_v51 }
 0x932   :  { %v2780_v29 = vmul.f32 %v3284_v26, %v2778_v21  ;;  %3287 = vtanh.f32 %v2734_v60  ;;  %vm2785_vm0 = vweird.f32 %v3284_v26  ;;  %vm2767_vm3 = vmor %vm2765_vm1, %vm2766_vm15  ;;  %vm2804_vm8 = vweird.f32 %v2798_v51 }
 0x933   :  { %v2762_v43 = vsub.f32 1.0, %v2761_v31  ;;  %vm2786_vm4 = vmor %vm2784_vm2, %vm2785_vm0  ;;  %v2808_v57 = vand.u32 2147483647, %v2798_v51  ;;  %v2811_v37 = vor.u32 1.1754944e-38, %v2810_v14 }
 0x934   :  { %v2781_v0 = vsub.f32 1.0, %v2780_v29 }
 0x935   :  { %v2763_v28 = vmul.f32 %v3282_v23, %v2762_v43  ;;  %vm2809_vm10 = vcmp.eq.f32.partialorder %v2808_v57, 8.507059e+37 }
 0x936   :  { %v2782_v20 = vmul.f32 %v3284_v26, %v2781_v0 }
 0x937   :  { %v3286_v12 = vpop.eup %3285  ;;  %v2764_v38 = vadd.f32 %v3282_v23, %v2763_v28 }
 0x938   :  { %v2783_v45 = vadd.f32 %v3284_v26, %v2782_v20  ;;  %v2800_v8 = vmul.f32 %v3286_v12, %v2798_v51  ;;  %v3288_v52 = vpop.eup %3287  ;;  %vm2805_vm7 = vweird.f32 %v3286_v12 }
 0x939   :  { %v2768_v33 = vsel %vm2767_vm3, %v3282_v23, %v2764_v38  ;;  %vm2806_vm9 = vmor %vm2804_vm8, %vm2805_vm7 }
 0x93a   :  { %v2773_v50 = vsel %vm2770_vm5, %v2772_v6, %v2768_v33  ;;  %v2787_v4 = vsel %vm2786_vm4, %v3284_v26, %v2783_v45  ;;  %v2801_v62 = vsub.f32 1.0, %v2800_v8 }
 0x93b   :  { %v2792_v16 = vsel %vm2789_vm6, %v2791_v46, %v2787_v4  ;;  %v2815_v19 = vmul.f32 %v3288_v52, %v2773_v50 }
 0x93c   :  { %v2814_v30 = vmul.f32 %v2792_v16, %v4379_v27  ;;  %v2802_v48 = vmul.f32 %v3286_v12, %v2801_v62 }
 0x93e   :  { %v2816_v34 = vadd.f32 %v2815_v19, %v2814_v30  ;;  %v2803_v47 = vadd.f32 %v3286_v12, %v2802_v48 }
 0x940   :  { %3289 = vtanh.f32 %v2816_v34  ;;  %v2807_v1 = vsel %vm2806_vm9, %v3286_v12, %v2803_v47 }
 0x941   :  { %v2812_v44 = vsel %vm2809_vm10, %v2811_v37, %v2807_v1 }
 0x946   :  { %v3290_v42 = vpop.eup %3289 }
 0x947   :  { %v2818_v17 = vmul.f32 %v3290_v42, %v2812_v44 }
 0x949   :  { %3026 = vmatmul.msk.f32.vlgmr.msrb.gmra.mxu0 %vm348_vm14, %v2818_v17  ;;  %vm2867_vm14 = vcmask 7168  }
 0x9c6   :  { %v2845_v39 = vpop.f32.mrf.mxu0 }
 0x9c7   :  { %v2846_v27 = vadd.f32 %v3034_v63, %v2845_v39 }
 0x9c9   :  { %v3027_v40 = vmul.f32 -1.442695, %v2846_v27 }
 0x9cb   :  { %3291 = vpow2.f32 %v3027_v40 }
 0x9d1   :  { %v3292_v22 = vpop.eup %3291 }
 0x9d2   :  { %v2851_v10 = vadd.f32 1.0, %v3292_v22 }
 0x9d4   :  { %3293 = vrcp.f32 %v2851_v10  ;;  %v2863_v13 = vand.u32 2147483648, %v2851_v10  ;;  %v2861_v54 = vand.u32 2147483647, %v2851_v10  ;;  %vm2857_vm12 = vweird.f32 %v2851_v10 }
 0x9d6   :  { %v2864_v24 = vor.u32 1.1754944e-38, %v2863_v13  ;;  %vm2862_vm15 = vcmp.eq.f32.partialorder %v2861_v54, 8.507059e+37 }
 0x9da   :  { %v3294_v7 = vpop.eup %3293 }
 0x9db   :  { %v2853_v56 = vmul.f32 %v3294_v7, %v2851_v10  ;;  %vm2858_vm11 = vweird.f32 %v3294_v7 }
 0x9dc   :  { %vm2859_vm13 = vmor %vm2857_vm12, %vm2858_vm11 }
 0x9dd   :  { %v2854_v11 = vsub.f32 1.0, %v2853_v56 }
 0x9df   :  { %v2855_v53 = vmul.f32 %v3294_v7, %v2854_v11 }
 0x9e1   :  { %v2856_v55 = vadd.f32 %v3294_v7, %v2855_v53 }
 0x9e3   :  { %v2860_v32 = vsel %vm2859_vm13, %v3294_v7, %v2856_v55 }
 0x9e4   :  { %v2865_v61 = vsel %vm2862_vm15, %v2864_v24, %v2860_v32 }
 0x9e5   :  { %2868 = vst.msk [vmem:[%s4429_s8] sm:$0xff] %vm2867_vm14, %v2865_v61 }
 0x9e6   :  { %2873 = vsyncpa [#allocation5], 1 }
 0x9e7   :  { %2874 = vsyncpa [#allocation7], 1 }

</bundles_post_ra>
